<compile_context>
chip_gen: v6e
topology: v6e:2x2x1
jax: 0.10.0
libtpu: 0.0.40
codegen_flags: <defaults>
</compile_context>

<pallas_src>
import functools

import jax
import jax.numpy as jnp
from jax import lax
from jax.experimental import pallas as pl
from jax.experimental.pallas import tpu as pltpu


# ----------------------------------------------------------------------------
# Fused kernel: one batch element per grid step.
#   stage 0: zero-padded input tile in VMEM scratch
#   stage 1: conv1 as a single im2col matmul, fused folded-BN + ReLU
#   stage 2: conv2 the same way (conv1 output never leaves VMEM)
#   stage 3: maxpool 3x3 / stride 2 / pad 1 fused into the epilogue
# ----------------------------------------------------------------------------
def _block_a_kernel(x_ref, w1_ref, s1_ref, t1_ref, w2_ref, s2_ref, t2_ref,
                    o_ref, xpad, col1, y1pad, col2, y2pad,
                    *, H, W, Cin, Cout, Ho, Wo):
    f32 = jnp.float32
    taps = [(dy, dx) for dy in range(3) for dx in range(3)]

    # ---- stage 0: zero-padded input lives in VMEM (no host-side jnp.pad) ----
    xpad[...] = jnp.zeros((H + 2, W + 2, Cin), f32)
    xpad[1:H + 1, 1:W + 1, :] = x_ref[0].astype(f32)

    # ---- stage 1: conv1 (+ folded BN + ReLU) as one K=9*Cin matmul ----------
    for t, (dy, dx) in enumerate(taps):
        tap = xpad[dy:dy + H, dx:dx + W, :]                  # (H, W, Cin)
        col1[:, t * Cin:(t + 1) * Cin] = tap.reshape(H * W, Cin)
    y = jnp.dot(col1[...], w1_ref[...], preferred_element_type=f32)  # (H*W, Cout)
    y = jnp.maximum(y * s1_ref[...] + t1_ref[...], 0.0)

    # ---- stage 2: conv2 (+ folded BN + ReLU), intermediate stays in VMEM ----
    y1pad[...] = jnp.zeros((H + 2, W + 2, Cout), f32)
    y1pad[1:H + 1, 1:W + 1, :] = y.reshape(H, W, Cout)
    for t, (dy, dx) in enumerate(taps):
        tap = y1pad[dy:dy + H, dx:dx + W, :]                 # (H, W, Cout)
        col2[:, t * Cout:(t + 1) * Cout] = tap.reshape(H * W, Cout)
    z = jnp.dot(col2[...], w2_ref[...], preferred_element_type=f32)  # (H*W, Cout)
    z = jnp.maximum(z * s2_ref[...] + t2_ref[...], 0.0)

    # ---- stage 3: fused maxpool 3x3 / stride 2 / pad 1 ----------------------
    # 0 is a valid pad identity because z is post-ReLU (z >= 0).
    y2pad[...] = jnp.zeros((H + 2, W + 2, Cout), f32)
    y2pad[1:H + 1, 1:W + 1, :] = z.reshape(H, W, Cout)
    vmax = jnp.maximum(jnp.maximum(y2pad[0:H, :, :], y2pad[1:H + 1, :, :]),
                       y2pad[2:H + 2, :, :])                 # (H, W+2, Cout)
    vmax = vmax.reshape(Ho, 2, W + 2, Cout)[:, 0]            # even row starts
    hmax = jnp.maximum(jnp.maximum(vmax[:, 0:W, :], vmax[:, 1:W + 1, :]),
                       vmax[:, 2:W + 2, :])                  # (Ho, W, Cout)
    # even column starts, static slices only (no strided ref loads).
    # TODO(synk): with Cout < 128 these stores are lane-masked; pad channels
    # to 128 for fully dense vst on production channel counts.
    for j in range(Wo):
        o_ref[0, :, j, :] = hmax[:, 2 * j, :].astype(o_ref.dtype)


# ----------------------------------------------------------------------------
# Public wrapper: NCHW in / NCHW out to match the PyTorch module.
# ----------------------------------------------------------------------------
def stm_renet_block_a(x_nchw, params):
    w1, scale1, shift1, w2, scale2, shift2 = params
    B, Cin, H, W = x_nchw.shape
    Cout = w1.shape[-1]
    assert H % 2 == 0 and W % 2 == 0, "kernel assumes even spatial dims"
    Ho, Wo = H // 2, W // 2

    # NCHW -> NHWC (channels on the TPU lane axis).  Weights flattened so row
    # (dy*3+dx)*Cin + cin matches the in-kernel im2col column order.
    x = jnp.transpose(x_nchw, (0, 2, 3, 1))
    w1f = w1.reshape(9 * Cin, Cout)
    w2f = w2.reshape(9 * Cout, Cout)

    kernel = functools.partial(_block_a_kernel, H=H, W=W, Cin=Cin, Cout=Cout,
                               Ho=Ho, Wo=Wo)

    flops = 2 * B * H * W * (9 * Cin * Cout + 9 * Cout * Cout)
    bytes_accessed = 4 * (B * H * W * Cin + B * Ho * Wo * Cout
                          + 9 * Cin * Cout + 9 * Cout * Cout + 4 * Cout)

    out_nhwc = pl.pallas_call(
        kernel,
        out_shape=jax.ShapeDtypeStruct((B, Ho, Wo, Cout), x.dtype),
        grid=(B,),
        in_specs=[
            pl.BlockSpec((1, H, W, Cin), lambda b: (b, 0, 0, 0)),   # x
            pl.BlockSpec((9 * Cin, Cout), lambda b: (0, 0)),        # w1 (9*Cin, Cout)
            pl.BlockSpec((1, Cout), lambda b: (0, 0)),              # bn1 scale
            pl.BlockSpec((1, Cout), lambda b: (0, 0)),              # bn1 shift
            pl.BlockSpec((9 * Cout, Cout), lambda b: (0, 0)),       # w2 (9*Cout, Cout)
            pl.BlockSpec((1, Cout), lambda b: (0, 0)),              # bn2 scale
            pl.BlockSpec((1, Cout), lambda b: (0, 0)),              # bn2 shift
        ],
        out_specs=pl.BlockSpec((1, Ho, Wo, Cout), lambda b: (b, 0, 0, 0)),
        scratch_shapes=[
            pltpu.VMEM((H + 2, W + 2, Cin), jnp.float32),    # padded input
            pltpu.VMEM((H * W, 9 * Cin), jnp.float32),       # im2col for conv1
            pltpu.VMEM((H + 2, W + 2, Cout), jnp.float32),   # padded conv1 out
            pltpu.VMEM((H * W, 9 * Cout), jnp.float32),      # im2col for conv2
            pltpu.VMEM((H + 2, W + 2, Cout), jnp.float32),   # padded conv2 out
        ],
        compiler_params=pltpu.CompilerParams(
            dimension_semantics=("parallel",)),
        cost_estimate=pl.CostEstimate(flops=flops, transcendentals=0,
                                      bytes_accessed=bytes_accessed),
    )(x, w1f,
      scale1.reshape(1, Cout), shift1.reshape(1, Cout),
      w2f,
      scale2.reshape(1, Cout), shift2.reshape(1, Cout))
    return jnp.transpose(out_nhwc, (0, 3, 1, 2))             # NHWC -> NCHW


# ----------------------------------------------------------------------------
# Pure-JAX reference (correctness check only).
# ----------------------------------------------------------------------------
def reference(x_nchw, params):
    w1, scale1, shift1, w2, scale2, shift2 = params
    x = jnp.transpose(x_nchw, (0, 2, 3, 1))
    dn = ('NHWC', 'HWIO', 'NHWC')
    x = lax.conv_general_dilated(x, w1, (1, 1), 'SAME', dimension_numbers=dn)
    x = jnp.maximum(x * scale1 + shift1, 0.0)
    x = lax.conv_general_dilated(x, w2, (1, 1), 'SAME', dimension_numbers=dn)
    x = jnp.maximum(x * scale2 + shift2, 0.0)
    x = lax.reduce_window(x, -jnp.inf, lax.max,
                          (1, 3, 3, 1), (1, 2, 2, 1),
                          ((0, 0), (1, 1), (1, 1), (0, 0)))
    return jnp.transpose(x, (0, 3, 1, 2))


def _fold_bn(bias, gamma, beta, running_mean, running_var, eps=1e-5):
    scale = gamma / jnp.sqrt(running_var + eps)
    shift = beta + (bias - running_mean) * scale
    return scale.astype(jnp.float32), shift.astype(jnp.float32)


if __name__ == "__main__":
    B, Cin, Cout, H, W = 2, 4, 8, 16, 16

    key = jax.random.PRNGKey(0)
    ks = jax.random.split(key, 13)

    # conv1 + bn1 parameters (deterministic synthetic init, HWIO weights)
    w1 = 0.1 * jax.random.normal(ks[0], (3, 3, Cin, Cout), jnp.float32)
    b1 = 0.1 * jax.random.normal(ks[1], (Cout,), jnp.float32)
    g1 = 1.0 + 0.1 * jax.random.normal(ks[2], (Cout,), jnp.float32)
    be1 = 0.1 * jax.random.normal(ks[3], (Cout,), jnp.float32)
    rm1 = 0.1 * jax.random.normal(ks[4], (Cout,), jnp.float32)
    rv1 = 1.0 + 0.5 * jax.random.uniform(ks[5], (Cout,), jnp.float32)

    # conv2 + bn2 parameters
    w2 = 0.1 * jax.random.normal(ks[6], (3, 3, Cout, Cout), jnp.float32)
    b2 = 0.1 * jax.random.normal(ks[7], (Cout,), jnp.float32)
    g2 = 1.0 + 0.1 * jax.random.normal(ks[8], (Cout,), jnp.float32)
    be2 = 0.1 * jax.random.normal(ks[9], (Cout,), jnp.float32)
    rm2 = 0.1 * jax.random.normal(ks[10], (Cout,), jnp.float32)
    rv2 = 1.0 + 0.5 * jax.random.uniform(ks[11], (Cout,), jnp.float32)

    scale1, shift1 = _fold_bn(b1, g1, be1, rm1, rv1)
    scale2, shift2 = _fold_bn(b2, g2, be2, rm2, rv2)
    params = (w1, scale1, shift1, w2, scale2, shift2)

    x = jax.random.normal(ks[12], (B, Cin, H, W), jnp.float32)

    out = stm_renet_block_a(x, params)
    out = jax.block_until_ready(out)

    ref = reference(x, params)
    assert out.shape == (B, Cout, H // 2, W // 2), out.shape
    assert jnp.allclose(out, ref, atol=1e-3, rtol=1e-3), float(
        jnp.max(jnp.abs(out - ref)))

    print("KERNEL_OK")
</pallas_src>

<mosaic_0001>
module attributes {stable_mosaic.version = 11 : i64} {
  func.func @_block_a_kernel(%arg0: i32, %arg1: memref<1x16x16x4xf32, #tpu.memory_space<vmem>>, %arg2: memref<36x8xf32, #tpu.memory_space<vmem>>, %arg3: memref<1x8xf32, #tpu.memory_space<vmem>>, %arg4: memref<1x8xf32, #tpu.memory_space<vmem>>, %arg5: memref<72x8xf32, #tpu.memory_space<vmem>>, %arg6: memref<1x8xf32, #tpu.memory_space<vmem>>, %arg7: memref<1x8xf32, #tpu.memory_space<vmem>>, %arg8: memref<1x8x8x8xf32, #tpu.memory_space<vmem>>, %arg9: memref<18x18x4xf32, #tpu.memory_space<vmem>>, %arg10: memref<256x36xf32, #tpu.memory_space<vmem>>, %arg11: memref<18x18x8xf32, #tpu.memory_space<vmem>>, %arg12: memref<256x72xf32, #tpu.memory_space<vmem>>, %arg13: memref<18x18x8xf32, #tpu.memory_space<vmem>>) attributes {dimension_semantics = [#tpu.dimension_semantics<parallel>], iteration_bounds = array<i64: 2>, scalar_prefetch = 0 : i64, scratch_operands = 5 : i64, tpu.core_type = #tpu.core_type<tc>, window_params = [{transform_indices = @transform_0, window_bounds = array<i64: 1, 16, 16, 4>}, {pipeline_mode = #tpu.pipeline_mode<synchronous>, transform_indices = @transform_1, window_bounds = array<i64: 36, 8>}, {pipeline_mode = #tpu.pipeline_mode<synchronous>, transform_indices = @transform_2, window_bounds = array<i64: 1, 8>}, {pipeline_mode = #tpu.pipeline_mode<synchronous>, transform_indices = @transform_3, window_bounds = array<i64: 1, 8>}, {pipeline_mode = #tpu.pipeline_mode<synchronous>, transform_indices = @transform_4, window_bounds = array<i64: 72, 8>}, {pipeline_mode = #tpu.pipeline_mode<synchronous>, transform_indices = @transform_5, window_bounds = array<i64: 1, 8>}, {pipeline_mode = #tpu.pipeline_mode<synchronous>, transform_indices = @transform_6, window_bounds = array<i64: 1, 8>}, {transform_indices = @transform_7, window_bounds = array<i64: 1, 8, 8, 8>}]} {
    %cst = arith.constant 0.000000e+00 : f32
    %0 = vector.broadcast %cst : f32 to vector<18x18x4xf32>
    %c0 = arith.constant 0 : index
    %c0_0 = arith.constant 0 : index
    %c0_1 = arith.constant 0 : index
    %1 = vector.load %arg9[%c0, %c0_0, %c0_1] : memref<18x18x4xf32, #tpu.memory_space<vmem>>, vector<18x18x4xf32>
    tpu.vector_store %arg9[%c0, %c0_0, %c0_1], %0 {strides = array<i32>} : memref<18x18x4xf32, #tpu.memory_space<vmem>>, vector<18x18x4xf32>,
    %c0_2 = arith.constant 0 : index
    %c0_3 = arith.constant 0 : index
    %c0_4 = arith.constant 0 : index
    %c0_5 = arith.constant 0 : index
    %2 = vector.load %arg1[%c0_2, %c0_3, %c0_4, %c0_5] : memref<1x16x16x4xf32, #tpu.memory_space<vmem>>, vector<1x16x16x4xf32>
    %3 = vector.shape_cast %2 : vector<1x16x16x4xf32> to vector<16x16x4xf32>
    %c1 = arith.constant 1 : index
    %c1_6 = arith.constant 1 : index
    %c0_7 = arith.constant 0 : index
    %4 = vector.load %arg9[%c1, %c1_6, %c0_7] : memref<18x18x4xf32, #tpu.memory_space<vmem>>, vector<16x16x4xf32>
    tpu.vector_store %arg9[%c1, %c1_6, %c0_7], %3 {strides = array<i32>} : memref<18x18x4xf32, #tpu.memory_space<vmem>>, vector<16x16x4xf32>,
    %c0_8 = arith.constant 0 : index
    %c0_9 = arith.constant 0 : index
    %c0_10 = arith.constant 0 : index
    %5 = vector.load %arg9[%c0_8, %c0_9, %c0_10] : memref<18x18x4xf32, #tpu.memory_space<vmem>>, vector<16x16x4xf32>
    %6 = vector.shape_cast %5 : vector<16x16x4xf32> to vector<256x4xf32>
    %c0_11 = arith.constant 0 : index
    %c0_12 = arith.constant 0 : index
    %7 = vector.load %arg10[%c0_11, %c0_12] : memref<256x36xf32, #tpu.memory_space<vmem>>, vector<256x4xf32>
    tpu.vector_store %arg10[%c0_11, %c0_12], %6 {strides = array<i32>} : memref<256x36xf32, #tpu.memory_space<vmem>>, vector<256x4xf32>,
    %c0_13 = arith.constant 0 : index
    %c1_14 = arith.constant 1 : index
    %c0_15 = arith.constant 0 : index
    %8 = vector.load %arg9[%c0_13, %c1_14, %c0_15] : memref<18x18x4xf32, #tpu.memory_space<vmem>>, vector<16x16x4xf32>
    %9 = vector.shape_cast %8 : vector<16x16x4xf32> to vector<256x4xf32>
    %c0_16 = arith.constant 0 : index
    %c4 = arith.constant 4 : index
    %10 = vector.load %arg10[%c0_16, %c4] : memref<256x36xf32, #tpu.memory_space<vmem>>, vector<256x4xf32>
    tpu.vector_store %arg10[%c0_16, %c4], %9 {strides = array<i32>} : memref<256x36xf32, #tpu.memory_space<vmem>>, vector<256x4xf32>,
    %c0_17 = arith.constant 0 : index
    %c2 = arith.constant 2 : index
    %c0_18 = arith.constant 0 : index
    %11 = vector.load %arg9[%c0_17, %c2, %c0_18] : memref<18x18x4xf32, #tpu.memory_space<vmem>>, vector<16x16x4xf32>
    %12 = vector.shape_cast %11 : vector<16x16x4xf32> to vector<256x4xf32>
    %c0_19 = arith.constant 0 : index
    %c8 = arith.constant 8 : index
    %13 = vector.load %arg10[%c0_19, %c8] : memref<256x36xf32, #tpu.memory_space<vmem>>, vector<256x4xf32>
    tpu.vector_store %arg10[%c0_19, %c8], %12 {strides = array<i32>} : memref<256x36xf32, #tpu.memory_space<vmem>>, vector<256x4xf32>,
    %c1_20 = arith.constant 1 : index
    %c0_21 = arith.constant 0 : index
    %c0_22 = arith.constant 0 : index
    %14 = vector.load %arg9[%c1_20, %c0_21, %c0_22] : memref<18x18x4xf32, #tpu.memory_space<vmem>>, vector<16x16x4xf32>
    %15 = vector.shape_cast %14 : vector<16x16x4xf32> to vector<256x4xf32>
    %c0_23 = arith.constant 0 : index
    %c12 = arith.constant 12 : index
    %16 = vector.load %arg10[%c0_23, %c12] : memref<256x36xf32, #tpu.memory_space<vmem>>, vector<256x4xf32>
    tpu.vector_store %arg10[%c0_23, %c12], %15 {strides = array<i32>} : memref<256x36xf32, #tpu.memory_space<vmem>>, vector<256x4xf32>,
    %c1_24 = arith.constant 1 : index
    %c1_25 = arith.constant 1 : index
    %c0_26 = arith.constant 0 : index
    %17 = vector.load %arg9[%c1_24, %c1_25, %c0_26] : memref<18x18x4xf32, #tpu.memory_space<vmem>>, vector<16x16x4xf32>
    %18 = vector.shape_cast %17 : vector<16x16x4xf32> to vector<256x4xf32>
    %c0_27 = arith.constant 0 : index
    %c16 = arith.constant 16 : index
    %19 = vector.load %arg10[%c0_27, %c16] : memref<256x36xf32, #tpu.memory_space<vmem>>, vector<256x4xf32>
    tpu.vector_store %arg10[%c0_27, %c16], %18 {strides = array<i32>} : memref<256x36xf32, #tpu.memory_space<vmem>>, vector<256x4xf32>,
    %c1_28 = arith.constant 1 : index
    %c2_29 = arith.constant 2 : index
    %c0_30 = arith.constant 0 : index
    %20 = vector.load %arg9[%c1_28, %c2_29, %c0_30] : memref<18x18x4xf32, #tpu.memory_space<vmem>>, vector<16x16x4xf32>
    %21 = vector.shape_cast %20 : vector<16x16x4xf32> to vector<256x4xf32>
    %c0_31 = arith.constant 0 : index
    %c20 = arith.constant 20 : index
    %22 = vector.load %arg10[%c0_31, %c20] : memref<256x36xf32, #tpu.memory_space<vmem>>, vector<256x4xf32>
    tpu.vector_store %arg10[%c0_31, %c20], %21 {strides = array<i32>} : memref<256x36xf32, #tpu.memory_space<vmem>>, vector<256x4xf32>,
    %c2_32 = arith.constant 2 : index
    %c0_33 = arith.constant 0 : index
    %c0_34 = arith.constant 0 : index
    %23 = vector.load %arg9[%c2_32, %c0_33, %c0_34] : memref<18x18x4xf32, #tpu.memory_space<vmem>>, vector<16x16x4xf32>
    %24 = vector.shape_cast %23 : vector<16x16x4xf32> to vector<256x4xf32>
    %c0_35 = arith.constant 0 : index
    %c24 = arith.constant 24 : index
    %25 = vector.load %arg10[%c0_35, %c24] : memref<256x36xf32, #tpu.memory_space<vmem>>, vector<256x4xf32>
    tpu.vector_store %arg10[%c0_35, %c24], %24 {strides = array<i32>} : memref<256x36xf32, #tpu.memory_space<vmem>>, vector<256x4xf32>,
    %c2_36 = arith.constant 2 : index
    %c1_37 = arith.constant 1 : index
    %c0_38 = arith.constant 0 : index
    %26 = vector.load %arg9[%c2_36, %c1_37, %c0_38] : memref<18x18x4xf32, #tpu.memory_space<vmem>>, vector<16x16x4xf32>
    %27 = vector.shape_cast %26 : vector<16x16x4xf32> to vector<256x4xf32>
    %c0_39 = arith.constant 0 : index
    %c28 = arith.constant 28 : index
    %28 = vector.load %arg10[%c0_39, %c28] : memref<256x36xf32, #tpu.memory_space<vmem>>, vector<256x4xf32>
    tpu.vector_store %arg10[%c0_39, %c28], %27 {strides = array<i32>} : memref<256x36xf32, #tpu.memory_space<vmem>>, vector<256x4xf32>,
    %c2_40 = arith.constant 2 : index
    %c2_41 = arith.constant 2 : index
    %c0_42 = arith.constant 0 : index
    %29 = vector.load %arg9[%c2_40, %c2_41, %c0_42] : memref<18x18x4xf32, #tpu.memory_space<vmem>>, vector<16x16x4xf32>
    %30 = vector.shape_cast %29 : vector<16x16x4xf32> to vector<256x4xf32>
    %c0_43 = arith.constant 0 : index
    %c32 = arith.constant 32 : index
    %31 = vector.load %arg10[%c0_43, %c32] : memref<256x36xf32, #tpu.memory_space<vmem>>, vector<256x4xf32>
    tpu.vector_store %arg10[%c0_43, %c32], %30 {strides = array<i32>} : memref<256x36xf32, #tpu.memory_space<vmem>>, vector<256x4xf32>,
    %c0_44 = arith.constant 0 : index
    %c0_45 = arith.constant 0 : index
    %32 = vector.load %arg10[%c0_44, %c0_45] : memref<256x36xf32, #tpu.memory_space<vmem>>, vector<256x36xf32>
    %c0_46 = arith.constant 0 : index
    %c0_47 = arith.constant 0 : index
    %33 = vector.load %arg2[%c0_46, %c0_47] : memref<36x8xf32, #tpu.memory_space<vmem>>, vector<36x8xf32>
    %cst_48 = arith.constant dense<0.000000e+00> : vector<256x8xf32>
    %34 = tpu.matmul %32, %33, %cst_48 {dimension_numbers = #tpu.dot_dimension_numbers<[1], [0], [0], [1], [0, 0, 1, 1], [], []>} : vector<256x36xf32>, vector<36x8xf32>, vector<256x8xf32> -> vector<256x8xf32>
    %c0_49 = arith.constant 0 : index
    %c0_50 = arith.constant 0 : index
    %35 = vector.load %arg3[%c0_49, %c0_50] : memref<1x8xf32, #tpu.memory_space<vmem>>, vector<1x8xf32>
    %36 = vector.broadcast %35 : vector<1x8xf32> to vector<256x8xf32>
    %37 = arith.mulf %34, %36 : vector<256x8xf32>
    %c0_51 = arith.constant 0 : index
    %c0_52 = arith.constant 0 : index
    %38 = vector.load %arg4[%c0_51, %c0_52] : memref<1x8xf32, #tpu.memory_space<vmem>>, vector<1x8xf32>
    %39 = vector.broadcast %38 : vector<1x8xf32> to vector<256x8xf32>
    %40 = arith.addf %37, %39 : vector<256x8xf32>
    %cst_53 = arith.constant 0.000000e+00 : f32
    %41 = vector.broadcast %cst_53 : f32 to vector<256x8xf32>
    %42 = arith.maximumf %40, %41 : vector<256x8xf32>
    %cst_54 = arith.constant 0.000000e+00 : f32
    %43 = vector.broadcast %cst_54 : f32 to vector<18x18x8xf32>
    %c0_55 = arith.constant 0 : index
    %c0_56 = arith.constant 0 : index
    %c0_57 = arith.constant 0 : index
    %44 = vector.load %arg11[%c0_55, %c0_56, %c0_57] : memref<18x18x8xf32, #tpu.memory_space<vmem>>, vector<18x18x8xf32>
    tpu.vector_store %arg11[%c0_55, %c0_56, %c0_57], %43 {strides = array<i32>} : memref<18x18x8xf32, #tpu.memory_space<vmem>>, vector<18x18x8xf32>,
    %45 = vector.shape_cast %42 : vector<256x8xf32> to vector<16x16x8xf32>
    %c1_58 = arith.constant 1 : index
    %c1_59 = arith.constant 1 : index
    %c0_60 = arith.constant 0 : index
    %46 = vector.load %arg11[%c1_58, %c1_59, %c0_60] : memref<18x18x8xf32, #tpu.memory_space<vmem>>, vector<16x16x8xf32>
    tpu.vector_store %arg11[%c1_58, %c1_59, %c0_60], %45 {strides = array<i32>} : memref<18x18x8xf32, #tpu.memory_space<vmem>>, vector<16x16x8xf32>,
    %c0_61 = arith.constant 0 : index
    %c0_62 = arith.constant 0 : index
    %c0_63 = arith.constant 0 : index
    %47 = vector.load %arg11[%c0_61, %c0_62, %c0_63] : memref<18x18x8xf32, #tpu.memory_space<vmem>>, vector<16x16x8xf32>
    %48 = vector.shape_cast %47 : vector<16x16x8xf32> to vector<256x8xf32>
    %c0_64 = arith.constant 0 : index
    %c0_65 = arith.constant 0 : index
    %49 = vector.load %arg12[%c0_64, %c0_65] : memref<256x72xf32, #tpu.memory_space<vmem>>, vector<256x8xf32>
    tpu.vector_store %arg12[%c0_64, %c0_65], %48 {strides = array<i32>} : memref<256x72xf32, #tpu.memory_space<vmem>>, vector<256x8xf32>,
    %c0_66 = arith.constant 0 : index
    %c1_67 = arith.constant 1 : index
    %c0_68 = arith.constant 0 : index
    %50 = vector.load %arg11[%c0_66, %c1_67, %c0_68] : memref<18x18x8xf32, #tpu.memory_space<vmem>>, vector<16x16x8xf32>
    %51 = vector.shape_cast %50 : vector<16x16x8xf32> to vector<256x8xf32>
    %c0_69 = arith.constant 0 : index
    %c8_70 = arith.constant 8 : index
    %52 = vector.load %arg12[%c0_69, %c8_70] : memref<256x72xf32, #tpu.memory_space<vmem>>, vector<256x8xf32>
    tpu.vector_store %arg12[%c0_69, %c8_70], %51 {strides = array<i32>} : memref<256x72xf32, #tpu.memory_space<vmem>>, vector<256x8xf32>,
    %c0_71 = arith.constant 0 : index
    %c2_72 = arith.constant 2 : index
    %c0_73 = arith.constant 0 : index
    %53 = vector.load %arg11[%c0_71, %c2_72, %c0_73] : memref<18x18x8xf32, #tpu.memory_space<vmem>>, vector<16x16x8xf32>
    %54 = vector.shape_cast %53 : vector<16x16x8xf32> to vector<256x8xf32>
    %c0_74 = arith.constant 0 : index
    %c16_75 = arith.constant 16 : index
    %55 = vector.load %arg12[%c0_74, %c16_75] : memref<256x72xf32, #tpu.memory_space<vmem>>, vector<256x8xf32>
    tpu.vector_store %arg12[%c0_74, %c16_75], %54 {strides = array<i32>} : memref<256x72xf32, #tpu.memory_space<vmem>>, vector<256x8xf32>,
    %c1_76 = arith.constant 1 : index
    %c0_77 = arith.constant 0 : index
    %c0_78 = arith.constant 0 : index
    %56 = vector.load %arg11[%c1_76, %c0_77, %c0_78] : memref<18x18x8xf32, #tpu.memory_space<vmem>>, vector<16x16x8xf32>
    %57 = vector.shape_cast %56 : vector<16x16x8xf32> to vector<256x8xf32>
    %c0_79 = arith.constant 0 : index
    %c24_80 = arith.constant 24 : index
    %58 = vector.load %arg12[%c0_79, %c24_80] : memref<256x72xf32, #tpu.memory_space<vmem>>, vector<256x8xf32>
    tpu.vector_store %arg12[%c0_79, %c24_80], %57 {strides = array<i32>} : memref<256x72xf32, #tpu.memory_space<vmem>>, vector<256x8xf32>,
    %c1_81 = arith.constant 1 : index
    %c1_82 = arith.constant 1 : index
    %c0_83 = arith.constant 0 : index
    %59 = vector.load %arg11[%c1_81, %c1_82, %c0_83] : memref<18x18x8xf32, #tpu.memory_space<vmem>>, vector<16x16x8xf32>
    %60 = vector.shape_cast %59 : vector<16x16x8xf32> to vector<256x8xf32>
    %c0_84 = arith.constant 0 : index
    %c32_85 = arith.constant 32 : index
    %61 = vector.load %arg12[%c0_84, %c32_85] : memref<256x72xf32, #tpu.memory_space<vmem>>, vector<256x8xf32>
    tpu.vector_store %arg12[%c0_84, %c32_85], %60 {strides = array<i32>} : memref<256x72xf32, #tpu.memory_space<vmem>>, vector<256x8xf32>,
    %c1_86 = arith.constant 1 : index
    %c2_87 = arith.constant 2 : index
    %c0_88 = arith.constant 0 : index
    %62 = vector.load %arg11[%c1_86, %c2_87, %c0_88] : memref<18x18x8xf32, #tpu.memory_space<vmem>>, vector<16x16x8xf32>
    %63 = vector.shape_cast %62 : vector<16x16x8xf32> to vector<256x8xf32>
    %c0_89 = arith.constant 0 : index
    %c40 = arith.constant 40 : index
    %64 = vector.load %arg12[%c0_89, %c40] : memref<256x72xf32, #tpu.memory_space<vmem>>, vector<256x8xf32>
    tpu.vector_store %arg12[%c0_89, %c40], %63 {strides = array<i32>} : memref<256x72xf32, #tpu.memory_space<vmem>>, vector<256x8xf32>,
    %c2_90 = arith.constant 2 : index
    %c0_91 = arith.constant 0 : index
    %c0_92 = arith.constant 0 : index
    %65 = vector.load %arg11[%c2_90, %c0_91, %c0_92] : memref<18x18x8xf32, #tpu.memory_space<vmem>>, vector<16x16x8xf32>
    %66 = vector.shape_cast %65 : vector<16x16x8xf32> to vector<256x8xf32>
    %c0_93 = arith.constant 0 : index
    %c48 = arith.constant 48 : index
    %67 = vector.load %arg12[%c0_93, %c48] : memref<256x72xf32, #tpu.memory_space<vmem>>, vector<256x8xf32>
    tpu.vector_store %arg12[%c0_93, %c48], %66 {strides = array<i32>} : memref<256x72xf32, #tpu.memory_space<vmem>>, vector<256x8xf32>,
    %c2_94 = arith.constant 2 : index
    %c1_95 = arith.constant 1 : index
    %c0_96 = arith.constant 0 : index
    %68 = vector.load %arg11[%c2_94, %c1_95, %c0_96] : memref<18x18x8xf32, #tpu.memory_space<vmem>>, vector<16x16x8xf32>
    %69 = vector.shape_cast %68 : vector<16x16x8xf32> to vector<256x8xf32>
    %c0_97 = arith.constant 0 : index
    %c56 = arith.constant 56 : index
    %70 = vector.load %arg12[%c0_97, %c56] : memref<256x72xf32, #tpu.memory_space<vmem>>, vector<256x8xf32>
    tpu.vector_store %arg12[%c0_97, %c56], %69 {strides = array<i32>} : memref<256x72xf32, #tpu.memory_space<vmem>>, vector<256x8xf32>,
    %c2_98 = arith.constant 2 : index
    %c2_99 = arith.constant 2 : index
    %c0_100 = arith.constant 0 : index
    %71 = vector.load %arg11[%c2_98, %c2_99, %c0_100] : memref<18x18x8xf32, #tpu.memory_space<vmem>>, vector<16x16x8xf32>
    %72 = vector.shape_cast %71 : vector<16x16x8xf32> to vector<256x8xf32>
    %c0_101 = arith.constant 0 : index
    %c64 = arith.constant 64 : index
    %73 = vector.load %arg12[%c0_101, %c64] : memref<256x72xf32, #tpu.memory_space<vmem>>, vector<256x8xf32>
    tpu.vector_store %arg12[%c0_101, %c64], %72 {strides = array<i32>} : memref<256x72xf32, #tpu.memory_space<vmem>>, vector<256x8xf32>,
    %c0_102 = arith.constant 0 : index
    %c0_103 = arith.constant 0 : index
    %74 = vector.load %arg12[%c0_102, %c0_103] : memref<256x72xf32, #tpu.memory_space<vmem>>, vector<256x72xf32>
    %c0_104 = arith.constant 0 : index
    %c0_105 = arith.constant 0 : index
    %75 = vector.load %arg5[%c0_104, %c0_105] : memref<72x8xf32, #tpu.memory_space<vmem>>, vector<72x8xf32>
    %cst_106 = arith.constant dense<0.000000e+00> : vector<256x8xf32>
    %76 = tpu.matmul %74, %75, %cst_106 {dimension_numbers = #tpu.dot_dimension_numbers<[1], [0], [0], [1], [0, 0, 1, 1], [], []>} : vector<256x72xf32>, vector<72x8xf32>, vector<256x8xf32> -> vector<256x8xf32>
    %c0_107 = arith.constant 0 : index
    %c0_108 = arith.constant 0 : index
    %77 = vector.load %arg6[%c0_107, %c0_108] : memref<1x8xf32, #tpu.memory_space<vmem>>, vector<1x8xf32>
    %78 = vector.broadcast %77 : vector<1x8xf32> to vector<256x8xf32>
    %79 = arith.mulf %76, %78 : vector<256x8xf32>
    %c0_109 = arith.constant 0 : index
    %c0_110 = arith.constant 0 : index
    %80 = vector.load %arg7[%c0_109, %c0_110] : memref<1x8xf32, #tpu.memory_space<vmem>>, vector<1x8xf32>
    %81 = vector.broadcast %80 : vector<1x8xf32> to vector<256x8xf32>
    %82 = arith.addf %79, %81 : vector<256x8xf32>
    %cst_111 = arith.constant 0.000000e+00 : f32
    %83 = vector.broadcast %cst_111 : f32 to vector<256x8xf32>
    %84 = arith.maximumf %82, %83 : vector<256x8xf32>
    %cst_112 = arith.constant 0.000000e+00 : f32
    %85 = vector.broadcast %cst_112 : f32 to vector<18x18x8xf32>
    %c0_113 = arith.constant 0 : index
    %c0_114 = arith.constant 0 : index
    %c0_115 = arith.constant 0 : index
    %86 = vector.load %arg13[%c0_113, %c0_114, %c0_115] : memref<18x18x8xf32, #tpu.memory_space<vmem>>, vector<18x18x8xf32>
    tpu.vector_store %arg13[%c0_113, %c0_114, %c0_115], %85 {strides = array<i32>} : memref<18x18x8xf32, #tpu.memory_space<vmem>>, vector<18x18x8xf32>,
    %87 = vector.shape_cast %84 : vector<256x8xf32> to vector<16x16x8xf32>
    %c1_116 = arith.constant 1 : index
    %c1_117 = arith.constant 1 : index
    %c0_118 = arith.constant 0 : index
    %88 = vector.load %arg13[%c1_116, %c1_117, %c0_118] : memref<18x18x8xf32, #tpu.memory_space<vmem>>, vector<16x16x8xf32>
    tpu.vector_store %arg13[%c1_116, %c1_117, %c0_118], %87 {strides = array<i32>} : memref<18x18x8xf32, #tpu.memory_space<vmem>>, vector<16x16x8xf32>,
    %c0_119 = arith.constant 0 : index
    %c0_120 = arith.constant 0 : index
    %c0_121 = arith.constant 0 : index
    %89 = vector.load %arg13[%c0_119, %c0_120, %c0_121] : memref<18x18x8xf32, #tpu.memory_space<vmem>>, vector<16x18x8xf32>
    %c1_122 = arith.constant 1 : index
    %c0_123 = arith.constant 0 : index
    %c0_124 = arith.constant 0 : index
    %90 = vector.load %arg13[%c1_122, %c0_123, %c0_124] : memref<18x18x8xf32, #tpu.memory_space<vmem>>, vector<16x18x8xf32>
    %91 = arith.maximumf %89, %90 : vector<16x18x8xf32>
    %c2_125 = arith.constant 2 : index
    %c0_126 = arith.constant 0 : index
    %c0_127 = arith.constant 0 : index
    %92 = vector.load %arg13[%c2_125, %c0_126, %c0_127] : memref<18x18x8xf32, #tpu.memory_space<vmem>>, vector<16x18x8xf32>
    %93 = arith.maximumf %91, %92 : vector<16x18x8xf32>
    %94 = vector.shape_cast %93 : vector<16x18x8xf32> to vector<8x2x18x8xf32>
    %95 = vector.extract_strided_slice %94 {offsets = [0, 0, 0, 0], sizes = [8, 1, 18, 8], strides = [1, 1, 1, 1]} : vector<8x2x18x8xf32> to vector<8x1x18x8xf32>
    %96 = vector.shape_cast %95 : vector<8x1x18x8xf32> to vector<8x18x8xf32>
    %97 = vector.extract_strided_slice %96 {offsets = [0, 0, 0], sizes = [8, 16, 8], strides = [1, 1, 1]} : vector<8x18x8xf32> to vector<8x16x8xf32>
    %98 = vector.extract_strided_slice %96 {offsets = [0, 1, 0], sizes = [8, 16, 8], strides = [1, 1, 1]} : vector<8x18x8xf32> to vector<8x16x8xf32>
    %99 = arith.maximumf %97, %98 : vector<8x16x8xf32>
    %100 = vector.extract_strided_slice %96 {offsets = [0, 2, 0], sizes = [8, 16, 8], strides = [1, 1, 1]} : vector<8x18x8xf32> to vector<8x16x8xf32>
    %101 = arith.maximumf %99, %100 : vector<8x16x8xf32>
    %102 = vector.extract_strided_slice %101 {offsets = [0, 0, 0], sizes = [8, 1, 8], strides = [1, 1, 1]} : vector<8x16x8xf32> to vector<8x1x8xf32>
    %103 = vector.shape_cast %102 : vector<8x1x8xf32> to vector<8x8xf32>
    %c0_128 = arith.constant 0 : index
    %c0_129 = arith.constant 0 : index
    %c0_130 = arith.constant 0 : index
    %c0_131 = arith.constant 0 : index
    %104 = vector.load %arg8[%c0_128, %c0_129, %c0_130, %c0_131] : memref<1x8x8x8xf32, #tpu.memory_space<vmem>>, vector<1x8x1x8xf32>
    %105 = vector.shape_cast %104 : vector<1x8x1x8xf32> to vector<8x8xf32>
    %106 = vector.shape_cast %103 : vector<8x8xf32> to vector<1x8x1x8xf32>
    tpu.vector_store %arg8[%c0_128, %c0_129, %c0_130, %c0_131], %106 {strides = array<i32>} : memref<1x8x8x8xf32, #tpu.memory_space<vmem>>, vector<1x8x1x8xf32>,
    %107 = vector.extract_strided_slice %101 {offsets = [0, 2, 0], sizes = [8, 1, 8], strides = [1, 1, 1]} : vector<8x16x8xf32> to vector<8x1x8xf32>
    %108 = vector.shape_cast %107 : vector<8x1x8xf32> to vector<8x8xf32>
    %c0_132 = arith.constant 0 : index
    %c0_133 = arith.constant 0 : index
    %c1_134 = arith.constant 1 : index
    %c0_135 = arith.constant 0 : index
    %109 = vector.load %arg8[%c0_132, %c0_133, %c1_134, %c0_135] : memref<1x8x8x8xf32, #tpu.memory_space<vmem>>, vector<1x8x1x8xf32>
    %110 = vector.shape_cast %109 : vector<1x8x1x8xf32> to vector<8x8xf32>
    %111 = vector.shape_cast %108 : vector<8x8xf32> to vector<1x8x1x8xf32>
    tpu.vector_store %arg8[%c0_132, %c0_133, %c1_134, %c0_135], %111 {strides = array<i32>} : memref<1x8x8x8xf32, #tpu.memory_space<vmem>>, vector<1x8x1x8xf32>,
    %112 = vector.extract_strided_slice %101 {offsets = [0, 4, 0], sizes = [8, 1, 8], strides = [1, 1, 1]} : vector<8x16x8xf32> to vector<8x1x8xf32>
    %113 = vector.shape_cast %112 : vector<8x1x8xf32> to vector<8x8xf32>
    %c0_136 = arith.constant 0 : index
    %c0_137 = arith.constant 0 : index
    %c2_138 = arith.constant 2 : index
    %c0_139 = arith.constant 0 : index
    %114 = vector.load %arg8[%c0_136, %c0_137, %c2_138, %c0_139] : memref<1x8x8x8xf32, #tpu.memory_space<vmem>>, vector<1x8x1x8xf32>
    %115 = vector.shape_cast %114 : vector<1x8x1x8xf32> to vector<8x8xf32>
    %116 = vector.shape_cast %113 : vector<8x8xf32> to vector<1x8x1x8xf32>
    tpu.vector_store %arg8[%c0_136, %c0_137, %c2_138, %c0_139], %116 {strides = array<i32>} : memref<1x8x8x8xf32, #tpu.memory_space<vmem>>, vector<1x8x1x8xf32>,
    %117 = vector.extract_strided_slice %101 {offsets = [0, 6, 0], sizes = [8, 1, 8], strides = [1, 1, 1]} : vector<8x16x8xf32> to vector<8x1x8xf32>
    %118 = vector.shape_cast %117 : vector<8x1x8xf32> to vector<8x8xf32>
    %c0_140 = arith.constant 0 : index
    %c0_141 = arith.constant 0 : index
    %c3 = arith.constant 3 : index
    %c0_142 = arith.constant 0 : index
    %119 = vector.load %arg8[%c0_140, %c0_141, %c3, %c0_142] : memref<1x8x8x8xf32, #tpu.memory_space<vmem>>, vector<1x8x1x8xf32>
    %120 = vector.shape_cast %119 : vector<1x8x1x8xf32> to vector<8x8xf32>
    %121 = vector.shape_cast %118 : vector<8x8xf32> to vector<1x8x1x8xf32>
    tpu.vector_store %arg8[%c0_140, %c0_141, %c3, %c0_142], %121 {strides = array<i32>} : memref<1x8x8x8xf32, #tpu.memory_space<vmem>>, vector<1x8x1x8xf32>,
    %122 = vector.extract_strided_slice %101 {offsets = [0, 8, 0], sizes = [8, 1, 8], strides = [1, 1, 1]} : vector<8x16x8xf32> to vector<8x1x8xf32>
    %123 = vector.shape_cast %122 : vector<8x1x8xf32> to vector<8x8xf32>
    %c0_143 = arith.constant 0 : index
    %c0_144 = arith.constant 0 : index
    %c4_145 = arith.constant 4 : index
    %c0_146 = arith.constant 0 : index
    %124 = vector.load %arg8[%c0_143, %c0_144, %c4_145, %c0_146] : memref<1x8x8x8xf32, #tpu.memory_space<vmem>>, vector<1x8x1x8xf32>
    %125 = vector.shape_cast %124 : vector<1x8x1x8xf32> to vector<8x8xf32>
    %126 = vector.shape_cast %123 : vector<8x8xf32> to vector<1x8x1x8xf32>
    tpu.vector_store %arg8[%c0_143, %c0_144, %c4_145, %c0_146], %126 {strides = array<i32>} : memref<1x8x8x8xf32, #tpu.memory_space<vmem>>, vector<1x8x1x8xf32>,
    %127 = vector.extract_strided_slice %101 {offsets = [0, 10, 0], sizes = [8, 1, 8], strides = [1, 1, 1]} : vector<8x16x8xf32> to vector<8x1x8xf32>
    %128 = vector.shape_cast %127 : vector<8x1x8xf32> to vector<8x8xf32>
    %c0_147 = arith.constant 0 : index
    %c0_148 = arith.constant 0 : index
    %c5 = arith.constant 5 : index
    %c0_149 = arith.constant 0 : index
    %129 = vector.load %arg8[%c0_147, %c0_148, %c5, %c0_149] : memref<1x8x8x8xf32, #tpu.memory_space<vmem>>, vector<1x8x1x8xf32>
    %130 = vector.shape_cast %129 : vector<1x8x1x8xf32> to vector<8x8xf32>
    %131 = vector.shape_cast %128 : vector<8x8xf32> to vector<1x8x1x8xf32>
    tpu.vector_store %arg8[%c0_147, %c0_148, %c5, %c0_149], %131 {strides = array<i32>} : memref<1x8x8x8xf32, #tpu.memory_space<vmem>>, vector<1x8x1x8xf32>,
    %132 = vector.extract_strided_slice %101 {offsets = [0, 12, 0], sizes = [8, 1, 8], strides = [1, 1, 1]} : vector<8x16x8xf32> to vector<8x1x8xf32>
    %133 = vector.shape_cast %132 : vector<8x1x8xf32> to vector<8x8xf32>
    %c0_150 = arith.constant 0 : index
    %c0_151 = arith.constant 0 : index
    %c6 = arith.constant 6 : index
    %c0_152 = arith.constant 0 : index
    %134 = vector.load %arg8[%c0_150, %c0_151, %c6, %c0_152] : memref<1x8x8x8xf32, #tpu.memory_space<vmem>>, vector<1x8x1x8xf32>
    %135 = vector.shape_cast %134 : vector<1x8x1x8xf32> to vector<8x8xf32>
    %136 = vector.shape_cast %133 : vector<8x8xf32> to vector<1x8x1x8xf32>
    tpu.vector_store %arg8[%c0_150, %c0_151, %c6, %c0_152], %136 {strides = array<i32>} : memref<1x8x8x8xf32, #tpu.memory_space<vmem>>, vector<1x8x1x8xf32>,
    %137 = vector.extract_strided_slice %101 {offsets = [0, 14, 0], sizes = [8, 1, 8], strides = [1, 1, 1]} : vector<8x16x8xf32> to vector<8x1x8xf32>
    %138 = vector.shape_cast %137 : vector<8x1x8xf32> to vector<8x8xf32>
    %c0_153 = arith.constant 0 : index
    %c0_154 = arith.constant 0 : index
    %c7 = arith.constant 7 : index
    %c0_155 = arith.constant 0 : index
    %139 = vector.load %arg8[%c0_153, %c0_154, %c7, %c0_155] : memref<1x8x8x8xf32, #tpu.memory_space<vmem>>, vector<1x8x1x8xf32>
    %140 = vector.shape_cast %139 : vector<1x8x1x8xf32> to vector<8x8xf32>
    %141 = vector.shape_cast %138 : vector<8x8xf32> to vector<1x8x1x8xf32>
    tpu.vector_store %arg8[%c0_153, %c0_154, %c7, %c0_155], %141 {strides = array<i32>} : memref<1x8x8x8xf32, #tpu.memory_space<vmem>>, vector<1x8x1x8xf32>,
    return
  }
  func.func @transform_0(%arg0: i32) -> (i32, i32, i32, i32) {
    %c0_i32 = arith.constant 0 : i32
    %c0_i32_0 = arith.constant 0 : i32
    %c0_i32_1 = arith.constant 0 : i32
    %c0_i32_2 = arith.constant 0 : i32
    return %arg0, %c0_i32, %c0_i32_0, %c0_i32_1 : i32, i32, i32, i32
  }
  func.func @transform_1(%arg0: i32) -> (i32, i32) {
    %c0_i32 = arith.constant 0 : i32
    %c0_i32_0 = arith.constant 0 : i32
    %c0_i32_1 = arith.constant 0 : i32
    return %c0_i32, %c0_i32_0 : i32, i32
  }
  func.func @transform_2(%arg0: i32) -> (i32, i32) {
    %c0_i32 = arith.constant 0 : i32
    %c0_i32_0 = arith.constant 0 : i32
    %c0_i32_1 = arith.constant 0 : i32
    return %c0_i32, %c0_i32_0 : i32, i32
  }
  func.func @transform_3(%arg0: i32) -> (i32, i32) {
    %c0_i32 = arith.constant 0 : i32
    %c0_i32_0 = arith.constant 0 : i32
    %c0_i32_1 = arith.constant 0 : i32
    return %c0_i32, %c0_i32_0 : i32, i32
  }
  func.func @transform_4(%arg0: i32) -> (i32, i32) {
    %c0_i32 = arith.constant 0 : i32
    %c0_i32_0 = arith.constant 0 : i32
    %c0_i32_1 = arith.constant 0 : i32
    return %c0_i32, %c0_i32_0 : i32, i32
  }
  func.func @transform_5(%arg0: i32) -> (i32, i32) {
    %c0_i32 = arith.constant 0 : i32
    %c0_i32_0 = arith.constant 0 : i32
    %c0_i32_1 = arith.constant 0 : i32
    return %c0_i32, %c0_i32_0 : i32, i32
  }
  func.func @transform_6(%arg0: i32) -> (i32, i32) {
    %c0_i32 = arith.constant 0 : i32
    %c0_i32_0 = arith.constant 0 : i32
    %c0_i32_1 = arith.constant 0 : i32
    return %c0_i32, %c0_i32_0 : i32, i32
  }
  func.func @transform_7(%arg0: i32) -> (i32, i32, i32, i32) {
    %c0_i32 = arith.constant 0 : i32
    %c0_i32_0 = arith.constant 0 : i32
    %c0_i32_1 = arith.constant 0 : i32
    %c0_i32_2 = arith.constant 0 : i32
    return %arg0, %c0_i32, %c0_i32_0, %c0_i32_1 : i32, i32, i32, i32
  }
}

</mosaic_0001>

<bundles_post_ra>
// kernel: tpu_custom_call.1
= control target key start
LH: loop header
LB: loop body
LE: loop exit
PB: predicated region body
PF: predicated region fallthrough
CT: control target
= control target key end

     0   :  { %12 = vsyncpa [#allocation8], 0  ;;  %s8401_s0 = inlined_call_operand.vmem [shape: f32[2,16,16,4], index: 0, kind: input, shape index: {}]   ;;  %s8402_s1 = inlined_call_operand.vmem [shape: f32[36,8], index: 1, kind: input, shape index: {}]   ;;  %s8403_s2 = inlined_call_operand.vmem [shape: f32[1,8], index: 2, kind: input, shape index: {}]   ;;  %s8404_s3 = inlined_call_operand.vmem [shape: f32[1,8], index: 3, kind: input, shape index: {}]   ;;  %s8405_s4 = inlined_call_operand.vmem [shape: f32[72,8], index: 4, kind: input, shape index: {}]   ;;  %s8406_s5 = inlined_call_operand.vmem [shape: f32[1,8], index: 5, kind: input, shape index: {}]   ;;  %s8407_s6 = inlined_call_operand.vmem [shape: f32[1,8], index: 6, kind: input, shape index: {}]   ;;  %s8408_s7 = inlined_call_operand.hbm [shape: f32[2,8,8,8], index: 7, kind: output, shape index: {}]  }
   0x1   :  { %14 = vsyncpa [#allocation8 + $0x1], 0  ;;  %s5648_s24 = smov 0   ;;  %s5650_s25 = smov 0  }
   0x2   :  { %s5652_s26 = smov 0   ;;  %s5654_s27 = smov 0  }
   0x3 LB: > { %s5669_s28 = sadd.s32 4294967295, %s5591_s27   ;;  %s5173_s29 = sadd.s32 4294967294, %s5591_s27   ;;  %s5591_s27 = sphi %s5654_s27, %s8507_s27   ;;  %s5587_s26 = sphi %s5652_s26, %s8506_s26   ;;  %s5583_s25 = sphi %s5650_s25, %s8505_s25   ;;  %s5579_s24 = sphi %s5648_s24, %s8504_s24  }
   0x4   : > { %s5673_s30 = sadd.s32 1, %s5591_s27   ;;  %s179_s8 = sadd.s32 1, %s5587_s26 }
   0x5   : > { %s176_s9 = ssub.s32 %s5591_s27, %s5673_s30  ;;  %p189_p0 = scmp.ne.s32.totalorder %s5587_s26, %s5583_s25 }
   0x6   : > { %p177_p1 = scmp.eq.s32.totalorder %s176_s9, 0  ;;  %p190_p2 = scmp.eq.s32.totalorder %s5669_s28, 1 }
   0x7   : > { %p195_p3 = scmp.ne.s32.totalorder %s5583_s25, %s5579_s24  ;;  %p196_p4 = scmp.eq.s32.totalorder %s5173_s29, 1 }
   0x8   : > { %s5684_s10 = scalar_select %p177_p1, %s5587_s26, %s179_s8  }
   0x9   : > { %p5686_p5 = por %p190_p2, %p189_p0  ;;  %p5690_p6 = por %p196_p4, %p195_p3 }
   0xa   : > { %p5176_p7 = scmp.ge.s32.totalorder %s5591_s27, 1  ;;  %p240_p8 = scmp.lt.s32.totalorder %s5591_s27, 3 }
   0xc   : > { %p241_p9 = pnand %p5176_p7, %p240_p8 }
   0xe   : > { %244 = sbr.rel (%p241_p9) target bundleno = 1695 (0x69f), region = 48 }
  0x13   : > { %vm277_vm0 = vcmask 31744   ;;  %p272_p10 = scmp.lt.s32.totalorder %s5669_s28, 1  ;;  %vm280_vm1 = vcmask 25600   ;;  %v8409_v0 = vmov 0.0   ;;  %s5594_s18 = smov 4   ;;  %vm622_vm2 = vcmask 64544  }
  0x14   : > { %278 = vst.msk [vmem:[#allocation2] sm:$0xff] %vm277_vm0, %v8409_v0  ;;  %279 = vst.msk [vmem:[#allocation2 + $0x8] sm:$0xff] %vm277_vm0, %v8409_v0  ;;  %s5595_s19 = smov 8   ;;  %s5596_s20 = smov 12   ;;  %vm815_vm3 = vcmask 97344   ;;  %vm1008_vm4 = vcmask 130144  }
  0x15   : > { %282 = vst.msk [vmem:[#allocation2 + $0x18] sm:$0xff] %vm277_vm0, %v8409_v0  ;;  %283 = vst.msk [vmem:[#allocation2 + $0x20] sm:$0xff] %vm277_vm0, %v8409_v0  ;;  %s273_s13 = scalar_select %p272_p10, %s5669_s28, 1  ;;  %vm1201_vm5 = vcmask 162944   ;;  %vm1394_vm6 = vcmask 195744   ;;  %vm2141_vm7 = vcmask 1043456  }
  0x16   : > { %285 = vst.msk [vmem:[#allocation2 + $0x30] sm:$0xff] %vm277_vm0, %v8409_v0  ;;  %286 = vst.msk [vmem:[#allocation2 + $0x38] sm:$0xff] %vm277_vm0, %v8409_v0  ;;  %s5597_s21 = smov 16   ;;  %s5598_s22 = smov 20   ;;  %vm1588_vm8 = vcmask 228544   ;;  %vm1781_vm9 = vcmask 261344  }
  0x17   : > { %288 = vst.msk [vmem:[#allocation2 + $0x48] sm:$0xff] %vm277_vm0, %v8409_v0  ;;  %289 = vst.msk [vmem:[#allocation2 + $0x50] sm:$0xff] %vm277_vm0, %v8409_v0  ;;  %s5254_s14 = sshll.u32 %s273_s13, 8  ;;  %s5599_s23 = smov 24   ;;  %vm1974_vm10 = vcmask 294144   ;;  %vm2044_vm11 = vcmask 293888  }
  0x18   : > { %291 = vst.msk [vmem:[#allocation2 + $0x60] sm:$0xff] %vm277_vm0, %v8409_v0  ;;  %292 = vst.msk [vmem:[#allocation2 + $0x68] sm:$0xff] %vm277_vm0, %v8409_v0  ;;  %s5811_s17 = scalar_lea.vmem %s8401_s0, %s5254_s14  ;;  %s5600_s29 = smov 28   ;;  %vm2480_vm12 = vcmask 64512   ;;  %vm2483_vm13 = vcmask 58368   ;;  %vm2793_vm14 = vcmask 130112  }
  0x19   : > { %294 = vst.msk [vmem:[#allocation2 + $0x78] sm:$0xff] %vm277_vm0, %v8409_v0  ;;  %295 = vst.msk [vmem:[#allocation2 + $0x80] sm:$0xff] %vm277_vm0, %v8409_v0  ;;  %v333_v1 = vld [vmem:[%s5811_s17] sm:$0xff]  ;;  %v334_v2 = vld [vmem:[%s5811_s17 + $0x8] sm:$0xff]  ;;  %s5601_s8 = smov 32   ;;  %s5603_s13 = smov 48  }
  0x1a   : > { %297 = vst.msk [vmem:[#allocation2 + $0x90] sm:$0xff] %vm277_vm0, %v8409_v0  ;;  %298 = vst.msk [vmem:[#allocation2 + $0x98] sm:$0xff] %vm277_vm0, %v8409_v0  ;;  %v335_v3 = vld [vmem:[%s5811_s17 + $0x10] sm:$0xff]  ;;  %v336_v4 = vld [vmem:[%s5811_s17 + $0x18] sm:$0xff]  ;;  %vm2986_vm15 = vcmask 195712   ;;  %s5605_s15 = smov 64  }
  0x1b   : > { %300 = vst.msk [vmem:[#allocation2 + $0xa8] sm:$0xff] %vm277_vm0, %v8409_v0  ;;  %301 = vst.msk [vmem:[#allocation2 + $0xb0] sm:$0xff] %vm277_vm0, %v8409_v0  ;;  %v337_v5 = vld [vmem:[%s5811_s17 + $0x20] sm:$0xff]  ;;  %v338_v6 = vld [vmem:[%s5811_s17 + $0x28] sm:$0xff] }
  0x1c   : > { %303 = vst.msk [vmem:[#allocation2 + $0xc0] sm:$0xff] %vm277_vm0, %v8409_v0  ;;  %304 = vst.msk [vmem:[#allocation2 + $0xc8] sm:$0xff] %vm277_vm0, %v8409_v0  ;;  %v462_v7 = vld [vmem:[#allocation2 + $0x1] sm:$0xff]  ;;  %v339_v9 = vld [vmem:[%s5811_s17 + $0x30] sm:$0xff] }
  0x1d   : > { %306 = vst.msk [vmem:[#allocation2 + $0xd8] sm:$0xff] %vm277_vm0, %v8409_v0  ;;  %307 = vst.msk [vmem:[#allocation2 + $0xe0] sm:$0xff] %vm277_vm0, %v8409_v0  ;;  %526 = vrot.lane.b32.xlu0 %v462_v7, %s5594_s18  ;;  %v340_v10 = vld [vmem:[%s5811_s17 + $0x38] sm:$0xff]  ;;  %v341_v11 = vld [vmem:[%s5811_s17 + $0x40] sm:$0xff] }
  0x1e   : > { %309 = vst.msk [vmem:[#allocation2 + $0xf0] sm:$0xff] %vm277_vm0, %v8409_v0  ;;  %310 = vst.msk [vmem:[#allocation2 + $0xf8] sm:$0xff] %vm277_vm0, %v8409_v0  ;;  %v342_v12 = vld [vmem:[%s5811_s17 + $0x48] sm:$0xff]  ;;  %v343_v13 = vld [vmem:[%s5811_s17 + $0x50] sm:$0xff] }
  0x1f   : > { %312 = vst.msk [vmem:[#allocation2 + $0x108] sm:$0xff] %vm277_vm0, %v8409_v0  ;;  %313 = vst.msk [vmem:[#allocation2 + $0x110] sm:$0xff] %vm277_vm0, %v8409_v0  ;;  %v344_v14 = vld [vmem:[%s5811_s17 + $0x58] sm:$0xff]  ;;  %v345_v15 = vld [vmem:[%s5811_s17 + $0x60] sm:$0xff] }
  0x20   : > { %315 = vst.msk [vmem:[#allocation2 + $0x120] sm:$0xff] %vm277_vm0, %v8409_v0  ;;  %316 = vst.msk [vmem:[#allocation2 + $0x128] sm:$0xff] %vm277_vm0, %v8409_v0  ;;  %v346_v16 = vld [vmem:[%s5811_s17 + $0x68] sm:$0xff]  ;;  %v347_v17 = vld [vmem:[%s5811_s17 + $0x70] sm:$0xff] }
  0x21   : > { %318 = vst.msk [vmem:[#allocation2 + $0x138] sm:$0xff] %vm277_vm0, %v8409_v0  ;;  %319 = vst.msk [vmem:[#allocation2 + $0x140] sm:$0xff] %vm277_vm0, %v8409_v0  ;;  %v348_v18 = vld [vmem:[%s5811_s17 + $0x78] sm:$0xff]  ;;  %v349_v19 = vld [vmem:[%s5811_s17 + $0x80] sm:$0xff] }
  0x22   : > { %321 = vst.msk [vmem:[#allocation2 + $0x150] sm:$0xff] %vm277_vm0, %v8409_v0  ;;  %322 = vst.msk [vmem:[#allocation2 + $0x158] sm:$0xff] %vm277_vm0, %v8409_v0  ;;  %v350_v20 = vld [vmem:[%s5811_s17 + $0x88] sm:$0xff]  ;;  %v351_v21 = vld [vmem:[%s5811_s17 + $0x90] sm:$0xff] }
  0x23   : > { %324 = vst.msk [vmem:[#allocation2 + $0x168] sm:$0xff] %vm277_vm0, %v8409_v0  ;;  %325 = vst.msk [vmem:[#allocation2 + $0x170] sm:$0xff] %vm277_vm0, %v8409_v0  ;;  %v352_v22 = vld [vmem:[%s5811_s17 + $0x98] sm:$0xff]  ;;  %v353_v23 = vld [vmem:[%s5811_s17 + $0xa0] sm:$0xff] }
  0x24   : > { %327 = vst.msk [vmem:[#allocation2 + $0x180] sm:$0xff] %vm277_vm0, %v8409_v0  ;;  %328 = vst.msk [vmem:[#allocation2 + $0x188] sm:$0xff] %vm277_vm0, %v8409_v0  ;;  %v354_v24 = vld [vmem:[%s5811_s17 + $0xa8] sm:$0xff]  ;;  %v355_v28 = vld [vmem:[%s5811_s17 + $0xb0] sm:$0xff] }
  0x25   : > { %330 = vst.msk [vmem:[#allocation2 + $0x198] sm:$0xff] %vm277_vm0, %v8409_v0  ;;  %331 = vst.msk [vmem:[#allocation2 + $0x1a0] sm:$0xff] %vm277_vm0, %v8409_v0  ;;  %v356_v29 = vld [vmem:[%s5811_s17 + $0xb8] sm:$0xff]  ;;  %v357_v33 = vld [vmem:[%s5811_s17 + $0xc0] sm:$0xff] }
  0x26   : > { %281 = vst.msk [vmem:[#allocation2 + $0x10] sm:$0x3] %vm280_vm1, %v8409_v0  ;;  %284 = vst.msk [vmem:[#allocation2 + $0x28] sm:$0x3] %vm280_vm1, %v8409_v0  ;;  %v358_v34 = vld [vmem:[%s5811_s17 + $0xc8] sm:$0xff]  ;;  %v359_v35 = vld [vmem:[%s5811_s17 + $0xd0] sm:$0xff] }
  0x27   : > { %287 = vst.msk [vmem:[#allocation2 + $0x40] sm:$0x3] %vm280_vm1, %v8409_v0  ;;  %290 = vst.msk [vmem:[#allocation2 + $0x58] sm:$0x3] %vm280_vm1, %v8409_v0  ;;  %v360_v36 = vld [vmem:[%s5811_s17 + $0xd8] sm:$0xff]  ;;  %v361_v37 = vld [vmem:[%s5811_s17 + $0xe0] sm:$0xff] }
  0x28   : > { %293 = vst.msk [vmem:[#allocation2 + $0x70] sm:$0x3] %vm280_vm1, %v8409_v0  ;;  %296 = vst.msk [vmem:[#allocation2 + $0x88] sm:$0x3] %vm280_vm1, %v8409_v0  ;;  %v362_v38 = vld [vmem:[%s5811_s17 + $0xe8] sm:$0xff]  ;;  %v398_v45 = vld [vmem:[#allocation2] sm:$0xff] }
  0x29   : > { %299 = vst.msk [vmem:[#allocation2 + $0xa0] sm:$0x3] %vm280_vm1, %v8409_v0  ;;  %302 = vst.msk [vmem:[#allocation2 + $0xb8] sm:$0x3] %vm280_vm1, %v8409_v0  ;;  %v399_v48 = vld [vmem:[#allocation2 + $0x8] sm:$0xff] }
  0x2a   : > { %305 = vst.msk [vmem:[#allocation2 + $0xd0] sm:$0x3] %vm280_vm1, %v8409_v0  ;;  %308 = vst.msk [vmem:[#allocation2 + $0xe8] sm:$0x3] %vm280_vm1, %v8409_v0 }
  0x2b   : > { %311 = vst.msk [vmem:[#allocation2 + $0x100] sm:$0x3] %vm280_vm1, %v8409_v0  ;;  %314 = vst.msk [vmem:[#allocation2 + $0x118] sm:$0x3] %vm280_vm1, %v8409_v0 }
  0x2c   : > { %317 = vst.msk [vmem:[#allocation2 + $0x130] sm:$0x3] %vm280_vm1, %v8409_v0  ;;  %320 = vst.msk [vmem:[#allocation2 + $0x148] sm:$0x3] %vm280_vm1, %v8409_v0 }
  0x2d   : > { %323 = vst.msk [vmem:[#allocation2 + $0x160] sm:$0x3] %vm280_vm1, %v8409_v0  ;;  %326 = vst.msk [vmem:[#allocation2 + $0x178] sm:$0x3] %vm280_vm1, %v8409_v0  ;;  %v463_v8 = vld [vmem:[#allocation2 + $0x9] sm:$0xff] }
  0x2e   : > { %329 = vst.msk [vmem:[#allocation2 + $0x190] sm:$0x3] %vm280_vm1, %v8409_v0  ;;  %332 = vst.msk [vmem:[#allocation2 + $0x1a8] sm:$0x3] %vm280_vm1, %v8409_v0  ;;  %528 = vrot.lane.b32.xlu0 %v463_v8, %s5594_s18  ;;  %vm3372_vm1 = vcmask 326912  }
  0x2f   : > { %366 = vst.msk [vmem:[#allocation2 + $0x19] sm:$0xff] %vm277_vm0, %v333_v1  ;;  %367 = vst.msk [vmem:[#allocation2 + $0x21] sm:$0xff] %vm277_vm0, %v334_v2 }
  0x30   : > { %368 = vst.msk [vmem:[#allocation2 + $0x31] sm:$0xff] %vm277_vm0, %v335_v3  ;;  %369 = vst.msk [vmem:[#allocation2 + $0x39] sm:$0xff] %vm277_vm0, %v336_v4 }
  0x31   : > { %370 = vst.msk [vmem:[#allocation2 + $0x49] sm:$0xff] %vm277_vm0, %v337_v5  ;;  %371 = vst.msk [vmem:[#allocation2 + $0x51] sm:$0xff] %vm277_vm0, %v338_v6 }
  0x32   : > { %372 = vst.msk [vmem:[#allocation2 + $0x61] sm:$0xff] %vm277_vm0, %v339_v9  ;;  %373 = vst.msk [vmem:[#allocation2 + $0x69] sm:$0xff] %vm277_vm0, %v340_v10 }
  0x33   : > { %374 = vst.msk [vmem:[#allocation2 + $0x79] sm:$0xff] %vm277_vm0, %v341_v11  ;;  %375 = vst.msk [vmem:[#allocation2 + $0x81] sm:$0xff] %vm277_vm0, %v342_v12 }
  0x34   : > { %376 = vst.msk [vmem:[#allocation2 + $0x91] sm:$0xff] %vm277_vm0, %v343_v13  ;;  %377 = vst.msk [vmem:[#allocation2 + $0x99] sm:$0xff] %vm277_vm0, %v344_v14 }
  0x35   : > { %378 = vst.msk [vmem:[#allocation2 + $0xa9] sm:$0xff] %vm277_vm0, %v345_v15  ;;  %379 = vst.msk [vmem:[#allocation2 + $0xb1] sm:$0xff] %vm277_vm0, %v346_v16 }
  0x36   : > { %380 = vst.msk [vmem:[#allocation2 + $0xc1] sm:$0xff] %vm277_vm0, %v347_v17  ;;  %381 = vst.msk [vmem:[#allocation2 + $0xc9] sm:$0xff] %vm277_vm0, %v348_v18  ;;  %v5856_v25 = vld [vmem:[#allocation2 + $0x19] sm:$0xff]  ;;  %v5865_v27 = vld [vmem:[#allocation2 + $0x21] sm:$0xff] }
  0x37   : > { %382 = vst.msk [vmem:[#allocation2 + $0xd9] sm:$0xff] %vm277_vm0, %v349_v19  ;;  %383 = vst.msk [vmem:[#allocation2 + $0xe1] sm:$0xff] %vm277_vm0, %v350_v20  ;;  %v5858_v26 = vld [vmem:[#allocation2 + $0x31] sm:$0xff]  ;;  %530 = vrot.lane.b32.xlu1 %v5856_v25, %s5594_s18  ;;  %v5877_v31 = vld [vmem:[#allocation2 + $0x39] sm:$0xff] }
  0x38   : > { %384 = vst.msk [vmem:[#allocation2 + $0xf1] sm:$0xff] %vm277_vm0, %v351_v21  ;;  %385 = vst.msk [vmem:[#allocation2 + $0xf9] sm:$0xff] %vm277_vm0, %v352_v22  ;;  %534 = vrot.lane.b32.xlu0 %v5858_v26, %s5594_s18  ;;  %v5873_v30 = vld [vmem:[#allocation2 + $0x49] sm:$0xff]  ;;  %v5894_v39 = vld [vmem:[#allocation2 + $0x51] sm:$0xff] }
  0x39   : > { %386 = vst.msk [vmem:[#allocation2 + $0x109] sm:$0xff] %vm277_vm0, %v353_v23  ;;  %387 = vst.msk [vmem:[#allocation2 + $0x111] sm:$0xff] %vm277_vm0, %v354_v24  ;;  %v5881_v32 = vld [vmem:[#allocation2 + $0x61] sm:$0xff]  ;;  %v5905_v41 = vld [vmem:[#allocation2 + $0x69] sm:$0xff] }
  0x3a   : > { %388 = vst.msk [vmem:[#allocation2 + $0x121] sm:$0xff] %vm277_vm0, %v355_v28  ;;  %389 = vst.msk [vmem:[#allocation2 + $0x129] sm:$0xff] %vm277_vm0, %v356_v29  ;;  %v5901_v40 = vld [vmem:[#allocation2 + $0x79] sm:$0xff]  ;;  %v5913_v43 = vld [vmem:[#allocation2 + $0x81] sm:$0xff] }
  0x3b   : > { %532 = vrot.lane.b32.xlu1 %v5865_v27, %s5594_s18  ;;  %390 = vst.msk [vmem:[#allocation2 + $0x139] sm:$0xff] %vm277_vm0, %v357_v33  ;;  %391 = vst.msk [vmem:[#allocation2 + $0x141] sm:$0xff] %vm277_vm0, %v358_v34  ;;  %v5909_v42 = vld [vmem:[#allocation2 + $0x91] sm:$0xff]  ;;  %v5923_v47 = vld [vmem:[#allocation2 + $0x99] sm:$0xff] }
  0x3c   : > { %538 = vrot.lane.b32.xlu0 %v5873_v30, %s5594_s18  ;;  %392 = vst.msk [vmem:[#allocation2 + $0x151] sm:$0xff] %vm277_vm0, %v359_v35  ;;  %393 = vst.msk [vmem:[#allocation2 + $0x159] sm:$0xff] %vm277_vm0, %v360_v36  ;;  %v5917_v44 = vld [vmem:[#allocation2 + $0xa9] sm:$0xff]  ;;  %v5921_v46 = vld [vmem:[#allocation2 + $0x18] sm:$0xff] }
  0x3d   : > { %394 = vst.msk [vmem:[#allocation2 + $0x169] sm:$0xff] %vm277_vm0, %v361_v37  ;;  %395 = vst.msk [vmem:[#allocation2 + $0x171] sm:$0xff] %vm277_vm0, %v362_v38  ;;  %v5931_v49 = vld [vmem:[#allocation2 + $0x20] sm:$0xff]  ;;  %v5937_v51 = vld [vmem:[#allocation2 + $0x30] sm:$0xff] }
  0x3e   : > { %430 = vst.msk [vmem:[#allocation3] sm:$0xff] %vm277_vm0, %v398_v45  ;;  %432 = vst.msk [vmem:[#allocation3 + $0x10] sm:$0xff] %vm277_vm0, %v5921_v46  ;;  %v5933_v50 = vld [vmem:[#allocation2 + $0xc1] sm:$0xff]  ;;  %v5939_v52 = vld [vmem:[#allocation2 + $0x38] sm:$0xff] }
  0x3f   : > { %536 = vrot.lane.b32.xlu1 %v5877_v31, %s5594_s18  ;;  %431 = vst.msk [vmem:[#allocation3 + $0x8] sm:$0xff] %vm277_vm0, %v399_v48  ;;  %433 = vst.msk [vmem:[#allocation3 + $0x18] sm:$0xff] %vm277_vm0, %v5931_v49  ;;  %v5943_v53 = vld [vmem:[#allocation2 + $0xb1] sm:$0xff]  ;;  %v5949_v54 = vld [vmem:[#allocation2 + $0x48] sm:$0xff] }
  0x40   : > { %542 = vrot.lane.b32.xlu0 %v5881_v32, %s5594_s18  ;;  %434 = vst.msk [vmem:[#allocation3 + $0x20] sm:$0xff] %vm277_vm0, %v5937_v51  ;;  %435 = vst.msk [vmem:[#allocation3 + $0x28] sm:$0xff] %vm277_vm0, %v5939_v52  ;;  %v5951_v55 = vld [vmem:[#allocation2 + $0x50] sm:$0xff]  ;;  %v5953_v56 = vld [vmem:[#allocation2 + $0xd9] sm:$0xff] }
  0x41   : > { %436 = vst.msk [vmem:[#allocation3 + $0x30] sm:$0xff] %vm277_vm0, %v5949_v54  ;;  %437 = vst.msk [vmem:[#allocation3 + $0x38] sm:$0xff] %vm277_vm0, %v5951_v55  ;;  %v5959_v57 = vld [vmem:[#allocation2 + $0x60] sm:$0xff]  ;;  %v5961_v58 = vld [vmem:[#allocation2 + $0x68] sm:$0xff] }
  0x42   : > { %v5963_v59 = vld [vmem:[#allocation2 + $0x78] sm:$0xff]  ;;  %438 = vst.msk [vmem:[#allocation3 + $0x40] sm:$0xff] %vm277_vm0, %v5959_v57  ;;  %439 = vst.msk [vmem:[#allocation3 + $0x48] sm:$0xff] %vm277_vm0, %v5961_v58  ;;  %v5973_v60 = vld [vmem:[#allocation2 + $0x80] sm:$0xff] }
  0x43   : > { %540 = vrot.lane.b32.xlu1 %v5894_v39, %s5594_s18  ;;  %440 = vst.msk [vmem:[#allocation3 + $0x50] sm:$0xff] %vm277_vm0, %v5963_v59  ;;  %v5975_v61 = vld [vmem:[#allocation2 + $0x90] sm:$0xff]  ;;  %v5977_v62 = vld [vmem:[#allocation2 + $0x98] sm:$0xff]  ;;  %441 = vst.msk [vmem:[#allocation3 + $0x58] sm:$0xff] %vm277_vm0, %v5973_v60 }
  0x44   : > { %546 = vrot.lane.b32.xlu0 %v5901_v40, %s5594_s18  ;;  %v5979_v63 = vld [vmem:[#allocation2 + $0xc9] sm:$0xff]  ;;  %442 = vst.msk [vmem:[#allocation3 + $0x60] sm:$0xff] %vm277_vm0, %v5975_v61  ;;  %443 = vst.msk [vmem:[#allocation3 + $0x68] sm:$0xff] %vm277_vm0, %v5977_v62  ;;  %v5991_v3 = vld [vmem:[#allocation2 + $0xc0] sm:$0xff] }
  0x45   : > { %v5987_v1 = vld [vmem:[#allocation2 + $0xa8] sm:$0xff]  ;;  %v5989_v2 = vld [vmem:[#allocation2 + $0xb0] sm:$0xff]  ;;  %446 = vst.msk [vmem:[#allocation3 + $0x80] sm:$0xff] %vm277_vm0, %v5991_v3  ;;  %v6003_v5 = vld [vmem:[#allocation2 + $0xd8] sm:$0xff] }
  0x46   : > { %444 = vst.msk [vmem:[#allocation3 + $0x70] sm:$0xff] %vm277_vm0, %v5987_v1  ;;  %445 = vst.msk [vmem:[#allocation3 + $0x78] sm:$0xff] %vm277_vm0, %v5989_v2  ;;  %v6001_v4 = vld [vmem:[#allocation2 + $0xc8] sm:$0xff]  ;;  %v6005_v6 = vld [vmem:[#allocation2 + $0xe0] sm:$0xff] }
  0x47   : > { %544 = vrot.lane.b32.xlu1 %v5905_v41, %s5594_s18  ;;  %447 = vst.msk [vmem:[#allocation3 + $0x88] sm:$0xff] %vm277_vm0, %v6001_v4  ;;  %448 = vst.msk [vmem:[#allocation3 + $0x90] sm:$0xff] %vm277_vm0, %v6003_v5  ;;  %v6013_v7 = vld [vmem:[#allocation2 + $0xf0] sm:$0xff]  ;;  %v6015_v8 = vld [vmem:[#allocation2 + $0xf8] sm:$0xff] }
  0x48   : > { %550 = vrot.lane.b32.xlu0 %v5909_v42, %s5594_s18  ;;  %449 = vst.msk [vmem:[#allocation3 + $0x98] sm:$0xff] %vm277_vm0, %v6005_v6  ;;  %v6017_v9 = vld [vmem:[#allocation2 + $0x108] sm:$0xff]  ;;  %450 = vst.msk [vmem:[#allocation3 + $0xa0] sm:$0xff] %vm277_vm0, %v6013_v7  ;;  %v6027_v10 = vld [vmem:[#allocation2 + $0x110] sm:$0xff] }
  0x49   : > { %451 = vst.msk [vmem:[#allocation3 + $0xa8] sm:$0xff] %vm277_vm0, %v6015_v8  ;;  %452 = vst.msk [vmem:[#allocation3 + $0xb0] sm:$0xff] %vm277_vm0, %v6017_v9  ;;  %v6029_v11 = vld [vmem:[#allocation2 + $0xf1] sm:$0xff]  ;;  %v6035_v12 = vld [vmem:[#allocation2 + $0x120] sm:$0xff] }
  0x4a   : > { %453 = vst.msk [vmem:[#allocation3 + $0xb8] sm:$0xff] %vm277_vm0, %v6027_v10  ;;  %v6037_v13 = vld [vmem:[#allocation2 + $0x128] sm:$0xff]  ;;  %454 = vst.msk [vmem:[#allocation3 + $0xc0] sm:$0xff] %vm277_vm0, %v6035_v12  ;;  %v6051_v16 = vld [vmem:[#allocation2 + $0x138] sm:$0xff] }
  0x4b   : > { %548 = vrot.lane.b32.xlu1 %v5913_v43, %s5594_s18  ;;  %v6039_v14 = vld [vmem:[#allocation2 + $0xe1] sm:$0xff]  ;;  %455 = vst.msk [vmem:[#allocation3 + $0xc8] sm:$0xff] %vm277_vm0, %v6037_v13  ;;  %v6047_v15 = vld [vmem:[#allocation2 + $0x109] sm:$0xff]  ;;  %v6055_v18 = vld [vmem:[#allocation2 + $0xf9] sm:$0xff] }
  0x4c   : > { %554 = vrot.lane.b32.xlu0 %v5917_v44, %s5594_s18  ;;  %v6053_v17 = vld [vmem:[#allocation2 + $0x140] sm:$0xff]  ;;  %456 = vst.msk [vmem:[#allocation3 + $0xd0] sm:$0xff] %vm277_vm0, %v6051_v16  ;;  %v6067_v20 = vld [vmem:[#allocation2 + $0x150] sm:$0xff]  ;;  %v6069_v21 = vld [vmem:[#allocation2 + $0x158] sm:$0xff] }
  0x4d   : > { %457 = vst.msk [vmem:[#allocation3 + $0xd8] sm:$0xff] %vm277_vm0, %v6053_v17  ;;  %v6063_v19 = vld [vmem:[#allocation2 + $0x121] sm:$0xff]  ;;  %v6071_v22 = vld [vmem:[#allocation2 + $0x111] sm:$0xff]  ;;  %458 = vst.msk [vmem:[#allocation3 + $0xe0] sm:$0xff] %vm277_vm0, %v6067_v20 }
  0x4e   : > { %459 = vst.msk [vmem:[#allocation3 + $0xe8] sm:$0xff] %vm277_vm0, %v6069_v21  ;;  %v6079_v23 = vld [vmem:[#allocation2 + $0x139] sm:$0xff]  ;;  %v6083_v24 = vld [vmem:[#allocation2 + $0x168] sm:$0xff]  ;;  %v6085_v28 = vld [vmem:[#allocation2 + $0x170] sm:$0xff] }
  0x4f   : > { %552 = vrot.lane.b32.xlu1 %v5923_v47, %s5594_s18  ;;  %v6087_v29 = vld [vmem:[#allocation2 + $0x129] sm:$0xff]  ;;  %460 = vst.msk [vmem:[#allocation3 + $0xf0] sm:$0xff] %vm277_vm0, %v6083_v24  ;;  %461 = vst.msk [vmem:[#allocation3 + $0xf8] sm:$0xff] %vm277_vm0, %v6085_v28  ;;  %v6095_v33 = vld [vmem:[#allocation2 + $0x151] sm:$0xff] }
  0x50   : > { %558 = vrot.lane.b32.xlu0 %v5933_v50, %s5594_s18  ;;  %v6099_v34 = vld [vmem:[#allocation2 + $0x141] sm:$0xff]  ;;  %v363_v35 = vld [vmem:[%s5811_s17 + $0xf0] sm:$0xff]  ;;  %v364_v37 = vld [vmem:[%s5811_s17 + $0xf8] sm:$0xff]  ;;  %s5604_s17 = smov 56  }
  0x51   : > { %8443 = vst [vmem:[#allocation10_spill] sm:$0xff] %v6099_v34  ;;  %v6104_v36 = vld [vmem:[#allocation2 + $0x169] sm:$0xff]  ;;  %396 = vst.msk [vmem:[#allocation2 + $0x181] sm:$0xff] %vm277_vm0, %v363_v35  ;;  %v6111_v38 = vld [vmem:[#allocation2 + $0x159] sm:$0xff] }
  0x52   : > { %8444 = vst [vmem:[#allocation11_spill] sm:$0xff] %v6104_v36  ;;  %397 = vst.msk [vmem:[#allocation2 + $0x189] sm:$0xff] %vm277_vm0, %v364_v37  ;;  %v655_v45 = vld [vmem:[#allocation2 + $0x2] sm:$0xff]  ;;  %v6117_v48 = vld [vmem:[#allocation2 + $0x171] sm:$0xff]  ;;  %vm3179_vm0 = vcmask 261312  }
  0x53   : > { %556 = vrot.lane.b32.xlu1 %v5943_v53, %s5594_s18  ;;  %8445 = vst [vmem:[#allocation12_spill] sm:$0xff] %v6111_v38  ;;  %8446 = vst [vmem:[#allocation13_spill] sm:$0xff] %v6117_v48  ;;  %v6120_v35 = vld [vmem:[#allocation2 + $0x1a] sm:$0xff]  ;;  %v656_v37 = vld [vmem:[#allocation2 + $0xa] sm:$0xff] }
  0x54   : > { %562 = vrot.lane.b32.xlu0 %v5953_v56, %s5594_s18  ;;  %8447 = vst [vmem:[#allocation14_spill] sm:$0xff] %v6120_v35  ;;  %v6126_v0 = vld [vmem:[#allocation2 + $0x32] sm:$0xff] }
  0x55   : > { %8448 = vst [vmem:[#allocation15_spill] sm:$0xff] %v6126_v0 }
  0x57   : > { %560 = vrot.lane.b32.xlu1 %v5979_v63, %s5594_s18 }
  0x58   : > { %566 = vrot.lane.b32.xlu0 %v6029_v11, %s5594_s18 }
  0x5b   : > { %564 = vrot.lane.b32.xlu1 %v6039_v14, %s5594_s18 }
  0x5c   : > { %570 = vrot.lane.b32.xlu0 %v6047_v15, %s5594_s18 }
  0x5f   : > { %568 = vrot.lane.b32.xlu1 %v6055_v18, %s5594_s18 }
  0x60   : > { %574 = vrot.lane.b32.xlu0 %v6063_v19, %s5594_s18 }
  0x63   : > { %572 = vrot.lane.b32.xlu1 %v6071_v22, %s5594_s18 }
  0x64   : > { %578 = vrot.lane.b32.xlu0 %v6079_v23, %s5594_s18 }
  0x67   : > { %576 = vrot.lane.b32.xlu1 %v6087_v29, %s5594_s18 }
  0x68   : > { %582 = vrot.lane.b32.xlu0 %v6095_v33, %s5594_s18 }
  0x6b   : > { %580 = vrot.lane.b32.xlu1 %v6099_v34, %s5594_s18 }
  0x6c   : > { %586 = vrot.lane.b32.xlu0 %v6104_v36, %s5594_s18  ;;  %v6129_v36 = vld [vmem:[#allocation2 + $0x22] sm:$0xff] }
  0x6d   : > { %8449 = vst [vmem:[#allocation16_spill] sm:$0xff] %v6129_v36 }
  0x6f   : > { %584 = vrot.lane.b32.xlu1 %v6111_v38, %s5594_s18  ;;  %v6133_v38 = vld [vmem:[#allocation2 + $0x4a] sm:$0xff] }
  0x70   : > { %719 = vrot.lane.b32.xlu0 %v655_v45, %s5595_s19  ;;  %8450 = vst [vmem:[#allocation17_spill] sm:$0xff] %v6133_v38  ;;  %v6137_v45 = vld [vmem:[#allocation2 + $0x3a] sm:$0xff] }
  0x71   : > { %8451 = vst [vmem:[#allocation18_spill] sm:$0xff] %v6137_v45 }
  0x73   : > { %588 = vrot.lane.b32.xlu1 %v6117_v48, %s5594_s18  ;;  %v6217_v48 = vld [vmem:[#allocation2 + $0x12a] sm:$0xff]  ;;  %s5602_s18 = smov 40  }
  0x74   : > { %723 = vrot.lane.b32.xlu0 %v6120_v35, %s5595_s19  ;;  %v6141_v35 = vld [vmem:[#allocation2 + $0x62] sm:$0xff]  ;;  %8471 = vst [vmem:[#allocation38_spill] sm:$0xff] %v6217_v48 }
  0x75   : > { %8452 = vst [vmem:[#allocation19_spill] sm:$0xff] %v6141_v35 }
  0x77   : > { %721 = vrot.lane.b32.xlu1 %v656_v37, %s5595_s19  ;;  %v6145_v37 = vld [vmem:[#allocation2 + $0x52] sm:$0xff] }
  0x78   : > { %727 = vrot.lane.b32.xlu0 %v6126_v0, %s5595_s19  ;;  %8453 = vst [vmem:[#allocation20_spill] sm:$0xff] %v6145_v37  ;;  %v6149_v0 = vld [vmem:[#allocation2 + $0x7a] sm:$0xff] }
  0x79   : > { %8454 = vst [vmem:[#allocation21_spill] sm:$0xff] %v6149_v0 }
  0x7b   : > { %725 = vrot.lane.b32.xlu1 %v6129_v36, %s5595_s19  ;;  %v6153_v36 = vld [vmem:[#allocation2 + $0x6a] sm:$0xff] }
  0x7c   : > { %731 = vrot.lane.b32.xlu0 %v6133_v38, %s5595_s19  ;;  %8455 = vst [vmem:[#allocation22_spill] sm:$0xff] %v6153_v36  ;;  %v6157_v38 = vld [vmem:[#allocation2 + $0x92] sm:$0xff] }
  0x7d   : > { %8456 = vst [vmem:[#allocation23_spill] sm:$0xff] %v6157_v38 }
  0x7f   : > { %729 = vrot.lane.b32.xlu1 %v6137_v45, %s5595_s19  ;;  %v6161_v45 = vld [vmem:[#allocation2 + $0x82] sm:$0xff] }
  0x80   : > { %735 = vrot.lane.b32.xlu0 %v6141_v35, %s5595_s19  ;;  %8457 = vst [vmem:[#allocation24_spill] sm:$0xff] %v6161_v45  ;;  %v6165_v35 = vld [vmem:[#allocation2 + $0xaa] sm:$0xff] }
  0x81   : > { %8458 = vst [vmem:[#allocation25_spill] sm:$0xff] %v6165_v35 }
  0x83   : > { %733 = vrot.lane.b32.xlu1 %v6145_v37, %s5595_s19  ;;  %v6169_v37 = vld [vmem:[#allocation2 + $0x9a] sm:$0xff] }
  0x84   : > { %739 = vrot.lane.b32.xlu0 %v6149_v0, %s5595_s19  ;;  %8459 = vst [vmem:[#allocation26_spill] sm:$0xff] %v6169_v37  ;;  %v6173_v0 = vld [vmem:[#allocation2 + $0xc2] sm:$0xff] }
  0x85   : > { %8460 = vst [vmem:[#allocation27_spill] sm:$0xff] %v6173_v0 }
  0x87   : > { %737 = vrot.lane.b32.xlu1 %v6153_v36, %s5595_s19  ;;  %v6177_v36 = vld [vmem:[#allocation2 + $0xb2] sm:$0xff] }
  0x88   : > { %743 = vrot.lane.b32.xlu0 %v6157_v38, %s5595_s19  ;;  %8461 = vst [vmem:[#allocation28_spill] sm:$0xff] %v6177_v36  ;;  %v6181_v38 = vld [vmem:[#allocation2 + $0xda] sm:$0xff] }
  0x89   : > { %8462 = vst [vmem:[#allocation29_spill] sm:$0xff] %v6181_v38 }
  0x8b   : > { %741 = vrot.lane.b32.xlu1 %v6161_v45, %s5595_s19  ;;  %v6185_v45 = vld [vmem:[#allocation2 + $0xca] sm:$0xff] }
  0x8c   : > { %747 = vrot.lane.b32.xlu0 %v6165_v35, %s5595_s19  ;;  %8463 = vst [vmem:[#allocation30_spill] sm:$0xff] %v6185_v45  ;;  %v6189_v35 = vld [vmem:[#allocation2 + $0xf2] sm:$0xff] }
  0x8d   : > { %8464 = vst [vmem:[#allocation31_spill] sm:$0xff] %v6189_v35 }
  0x8f   : > { %745 = vrot.lane.b32.xlu1 %v6169_v37, %s5595_s19  ;;  %v6193_v37 = vld [vmem:[#allocation2 + $0xe2] sm:$0xff] }
  0x90   : > { %751 = vrot.lane.b32.xlu0 %v6173_v0, %s5595_s19  ;;  %8465 = vst [vmem:[#allocation32_spill] sm:$0xff] %v6193_v37  ;;  %v6197_v0 = vld [vmem:[#allocation2 + $0x10a] sm:$0xff] }
  0x91   : > { %8466 = vst [vmem:[#allocation33_spill] sm:$0xff] %v6197_v0 }
  0x93   : > { %749 = vrot.lane.b32.xlu1 %v6177_v36, %s5595_s19  ;;  %v6201_v36 = vld [vmem:[#allocation2 + $0xfa] sm:$0xff] }
  0x94   : > { %755 = vrot.lane.b32.xlu0 %v6181_v38, %s5595_s19  ;;  %8467 = vst [vmem:[#allocation34_spill] sm:$0xff] %v6201_v36  ;;  %v6205_v38 = vld [vmem:[#allocation2 + $0x122] sm:$0xff] }
  0x95   : > { %8468 = vst [vmem:[#allocation35_spill] sm:$0xff] %v6205_v38 }
  0x97   : > { %753 = vrot.lane.b32.xlu1 %v6185_v45, %s5595_s19  ;;  %v6209_v45 = vld [vmem:[#allocation2 + $0x112] sm:$0xff] }
  0x98   : > { %759 = vrot.lane.b32.xlu0 %v6189_v35, %s5595_s19  ;;  %8469 = vst [vmem:[#allocation36_spill] sm:$0xff] %v6209_v45  ;;  %v6213_v35 = vld [vmem:[#allocation2 + $0x13a] sm:$0xff] }
  0x99   : > { %8470 = vst [vmem:[#allocation37_spill] sm:$0xff] %v6213_v35 }
  0x9b   : > { %757 = vrot.lane.b32.xlu1 %v6193_v37, %s5595_s19  ;;  %v527_v37 = vpop.permute.xlu0 %526 }
  0x9c   : > { %763 = vrot.lane.b32.xlu0 %v6197_v0, %s5595_s19  ;;  %623 = vst.msk [vmem:[#allocation3] sm:$0xff] %vm622_vm2, %v527_v37  ;;  %v6226_v0 = vld [vmem:[#allocation2 + $0x142] sm:$0xff]  ;;  %v6232_v37 = vld [vmem:[#allocation2 + $0x16a] sm:$0xff] }
  0x9d   : > { %8472 = vst [vmem:[#allocation39_spill] sm:$0xff] %v6226_v0 }
  0x9f   : > { %761 = vrot.lane.b32.xlu1 %v6201_v36, %s5595_s19  ;;  %v6222_v36 = vld [vmem:[#allocation2 + $0x152] sm:$0xff] }
  0xa0   : > { %767 = vrot.lane.b32.xlu0 %v6205_v38, %s5595_s19  ;;  %v529_v38 = vpop.permute.xlu0 %528 }
  0xa1   : > { %624 = vst.msk [vmem:[#allocation3 + $0x8] sm:$0xff] %vm622_vm2, %v529_v38  ;;  %v6244_v38 = vld [vmem:[#allocation2 + $0x172] sm:$0xff] }
  0xa3   : > { %765 = vrot.lane.b32.xlu1 %v6209_v45, %s5595_s19  ;;  %v6236_v45 = vld [vmem:[#allocation2 + $0x15a] sm:$0xff] }
  0xa4   : > { %771 = vrot.lane.b32.xlu0 %v6213_v35, %s5595_s19 }
  0xa7   : > { %769 = vrot.lane.b32.xlu1 %v6217_v48, %s5595_s19 }
  0xa8   : > { %775 = vrot.lane.b32.xlu0 %v6222_v36, %s5595_s19 }
  0xa9   : > { %v531_v34 = vpop.permute.xlu1 %530 }
  0xaa   : > { %625 = vst.msk [vmem:[#allocation3 + $0x10] sm:$0xff] %vm622_vm2, %v531_v34  ;;  %v535_v35 = vpop.permute.xlu0 %534 }
  0xab   : > { %773 = vrot.lane.b32.xlu1 %v6226_v0, %s5595_s19  ;;  %627 = vst.msk [vmem:[#allocation3 + $0x20] sm:$0xff] %vm622_vm2, %v535_v35 }
  0xac   : > { %779 = vrot.lane.b32.xlu0 %v6232_v37, %s5595_s19 }
  0xad   : > { %v533_v48 = vpop.permute.xlu1 %532 }
  0xae   : > { %626 = vst.msk [vmem:[#allocation3 + $0x18] sm:$0xff] %vm622_vm2, %v533_v48  ;;  %v539_v34 = vpop.permute.xlu0 %538 }
  0xaf   : > { %777 = vrot.lane.b32.xlu1 %v6236_v45, %s5595_s19  ;;  %629 = vst.msk [vmem:[#allocation3 + $0x30] sm:$0xff] %vm622_vm2, %v539_v34 }
  0xb0   : > { %912 = vrot.lane.b32.xlu0 %v5921_v46, %s5596_s20 }
  0xb1   : > { %v537_v0 = vpop.permute.xlu1 %536 }
  0xb2   : > { %628 = vst.msk [vmem:[#allocation3 + $0x28] sm:$0xff] %vm622_vm2, %v537_v0  ;;  %v543_v35 = vpop.permute.xlu0 %542 }
  0xb3   : > { %781 = vrot.lane.b32.xlu1 %v6244_v38, %s5595_s19  ;;  %631 = vst.msk [vmem:[#allocation3 + $0x40] sm:$0xff] %vm622_vm2, %v543_v35 }
  0xb4   : > { %916 = vrot.lane.b32.xlu0 %v5937_v51, %s5596_s20 }
  0xb5   : > { %v541_v48 = vpop.permute.xlu1 %540 }
  0xb6   : > { %630 = vst.msk [vmem:[#allocation3 + $0x38] sm:$0xff] %vm622_vm2, %v541_v48  ;;  %v547_v34 = vpop.permute.xlu0 %546 }
  0xb7   : > { %914 = vrot.lane.b32.xlu1 %v5931_v49, %s5596_s20  ;;  %633 = vst.msk [vmem:[#allocation3 + $0x50] sm:$0xff] %vm622_vm2, %v547_v34 }
  0xb8   : > { %920 = vrot.lane.b32.xlu0 %v5949_v54, %s5596_s20 }
  0xb9   : > { %v545_v46 = vpop.permute.xlu1 %544 }
  0xba   : > { %632 = vst.msk [vmem:[#allocation3 + $0x48] sm:$0xff] %vm622_vm2, %v545_v46  ;;  %v551_v0 = vpop.permute.xlu0 %550 }
  0xbb   : > { %918 = vrot.lane.b32.xlu1 %v5939_v52, %s5596_s20  ;;  %635 = vst.msk [vmem:[#allocation3 + $0x60] sm:$0xff] %vm622_vm2, %v551_v0 }
  0xbc   : > { %924 = vrot.lane.b32.xlu0 %v5959_v57, %s5596_s20 }
  0xbd   : > { %v549_v35 = vpop.permute.xlu1 %548 }
  0xbe   : > { %634 = vst.msk [vmem:[#allocation3 + $0x58] sm:$0xff] %vm622_vm2, %v549_v35  ;;  %v555_v49 = vpop.permute.xlu0 %554 }
  0xbf   : > { %922 = vrot.lane.b32.xlu1 %v5951_v55, %s5596_s20  ;;  %637 = vst.msk [vmem:[#allocation3 + $0x70] sm:$0xff] %vm622_vm2, %v555_v49 }
  0xc0   : > { %928 = vrot.lane.b32.xlu0 %v5963_v59, %s5596_s20 }
  0xc1   : > { %v553_v48 = vpop.permute.xlu1 %552 }
  0xc2   : > { %636 = vst.msk [vmem:[#allocation3 + $0x68] sm:$0xff] %vm622_vm2, %v553_v48  ;;  %v559_v34 = vpop.permute.xlu0 %558 }
  0xc3   : > { %926 = vrot.lane.b32.xlu1 %v5961_v58, %s5596_s20  ;;  %639 = vst.msk [vmem:[#allocation3 + $0x80] sm:$0xff] %vm622_vm2, %v559_v34 }
  0xc4   : > { %932 = vrot.lane.b32.xlu0 %v5975_v61, %s5596_s20 }
  0xc5   : > { %v557_v46 = vpop.permute.xlu1 %556 }
  0xc6   : > { %638 = vst.msk [vmem:[#allocation3 + $0x78] sm:$0xff] %vm622_vm2, %v557_v46  ;;  %v563_v0 = vpop.permute.xlu0 %562 }
  0xc7   : > { %930 = vrot.lane.b32.xlu1 %v5973_v60, %s5596_s20  ;;  %641 = vst.msk [vmem:[#allocation3 + $0x90] sm:$0xff] %vm622_vm2, %v563_v0 }
  0xc8   : > { %936 = vrot.lane.b32.xlu0 %v5987_v1, %s5596_s20 }
  0xc9   : > { %v561_v35 = vpop.permute.xlu1 %560 }
  0xca   : > { %640 = vst.msk [vmem:[#allocation3 + $0x88] sm:$0xff] %vm622_vm2, %v561_v35  ;;  %v567_v49 = vpop.permute.xlu0 %566 }
  0xcb   : > { %934 = vrot.lane.b32.xlu1 %v5977_v62, %s5596_s20  ;;  %643 = vst.msk [vmem:[#allocation3 + $0xa0] sm:$0xff] %vm622_vm2, %v567_v49 }
  0xcc   : > { %940 = vrot.lane.b32.xlu0 %v5991_v3, %s5596_s20 }
  0xcd   : > { %v565_v48 = vpop.permute.xlu1 %564 }
  0xce   : > { %642 = vst.msk [vmem:[#allocation3 + $0x98] sm:$0xff] %vm622_vm2, %v565_v48  ;;  %v571_v34 = vpop.permute.xlu0 %570 }
  0xcf   : > { %938 = vrot.lane.b32.xlu1 %v5989_v2, %s5596_s20  ;;  %645 = vst.msk [vmem:[#allocation3 + $0xb0] sm:$0xff] %vm622_vm2, %v571_v34 }
  0xd0   : > { %944 = vrot.lane.b32.xlu0 %v6003_v5, %s5596_s20 }
  0xd1   : > { %v569_v46 = vpop.permute.xlu1 %568 }
  0xd2   : > { %644 = vst.msk [vmem:[#allocation3 + $0xa8] sm:$0xff] %vm622_vm2, %v569_v46  ;;  %v575_v0 = vpop.permute.xlu0 %574 }
  0xd3   : > { %942 = vrot.lane.b32.xlu1 %v6001_v4, %s5596_s20  ;;  %647 = vst.msk [vmem:[#allocation3 + $0xc0] sm:$0xff] %vm622_vm2, %v575_v0 }
  0xd4   : > { %948 = vrot.lane.b32.xlu0 %v6013_v7, %s5596_s20 }
  0xd5   : > { %v573_v35 = vpop.permute.xlu1 %572 }
  0xd6   : > { %646 = vst.msk [vmem:[#allocation3 + $0xb8] sm:$0xff] %vm622_vm2, %v573_v35  ;;  %v579_v49 = vpop.permute.xlu0 %578 }
  0xd7   : > { %946 = vrot.lane.b32.xlu1 %v6005_v6, %s5596_s20  ;;  %649 = vst.msk [vmem:[#allocation3 + $0xd0] sm:$0xff] %vm622_vm2, %v579_v49 }
  0xd8   : > { %952 = vrot.lane.b32.xlu0 %v6017_v9, %s5596_s20 }
  0xd9   : > { %v577_v48 = vpop.permute.xlu1 %576 }
  0xda   : > { %648 = vst.msk [vmem:[#allocation3 + $0xc8] sm:$0xff] %vm622_vm2, %v577_v48  ;;  %v583_v34 = vpop.permute.xlu0 %582 }
  0xdb   : > { %950 = vrot.lane.b32.xlu1 %v6015_v8, %s5596_s20  ;;  %651 = vst.msk [vmem:[#allocation3 + $0xe0] sm:$0xff] %vm622_vm2, %v583_v34 }
  0xdc   : > { %956 = vrot.lane.b32.xlu0 %v6035_v12, %s5596_s20 }
  0xdd   : > { %v581_v46 = vpop.permute.xlu1 %580 }
  0xde   : > { %650 = vst.msk [vmem:[#allocation3 + $0xd8] sm:$0xff] %vm622_vm2, %v581_v46  ;;  %v587_v0 = vpop.permute.xlu0 %586 }
  0xdf   : > { %954 = vrot.lane.b32.xlu1 %v6027_v10, %s5596_s20  ;;  %653 = vst.msk [vmem:[#allocation3 + $0xf0] sm:$0xff] %vm622_vm2, %v587_v0  ;;  %v6334_v0 = vld [vmem:[#allocation2 + $0x180] sm:$0xff] }
  0xe0   : > { %960 = vrot.lane.b32.xlu0 %v6051_v16, %s5596_s20 }
  0xe1   : > { %v585_v35 = vpop.permute.xlu1 %584 }
  0xe2   : > { %652 = vst.msk [vmem:[#allocation3 + $0xe8] sm:$0xff] %vm622_vm2, %v585_v35  ;;  %v720_v49 = vpop.permute.xlu0 %719 }
  0xe3   : > { %958 = vrot.lane.b32.xlu1 %v6037_v13, %s5596_s20  ;;  %816 = vst.msk [vmem:[#allocation3] sm:$0xff] %vm815_vm3, %v720_v49 }
  0xe4   : > { %964 = vrot.lane.b32.xlu0 %v6067_v20, %s5596_s20 }
  0xe5   : > { %v589_v48 = vpop.permute.xlu1 %588 }
  0xe6   : > { %654 = vst.msk [vmem:[#allocation3 + $0xf8] sm:$0xff] %vm622_vm2, %v589_v48  ;;  %v724_v34 = vpop.permute.xlu0 %723  ;;  %vm3565_vm2 = vcmask 392512  }
  0xe7   : > { %962 = vrot.lane.b32.xlu1 %v6053_v17, %s5596_s20  ;;  %818 = vst.msk [vmem:[#allocation3 + $0x10] sm:$0xff] %vm815_vm3, %v724_v34  ;;  %v6344_v34 = vld [vmem:[#allocation2 + $0x188] sm:$0xff] }
  0xe8   : > { %968 = vrot.lane.b32.xlu0 %v6083_v24, %s5596_s20 }
  0xe9   : > { %v722_v46 = vpop.permute.xlu1 %721 }
  0xea   : > { %817 = vst.msk [vmem:[#allocation3 + $0x8] sm:$0xff] %vm815_vm3, %v722_v46  ;;  %v728_v35 = vpop.permute.xlu0 %727 }
  0xeb   : > { %966 = vrot.lane.b32.xlu1 %v6069_v21, %s5596_s20  ;;  %820 = vst.msk [vmem:[#allocation3 + $0x20] sm:$0xff] %vm815_vm3, %v728_v35 }
  0xec   : > { %972 = vrot.lane.b32.xlu0 %v6334_v0, %s5596_s20 }
  0xed   : > { %v726_v49 = vpop.permute.xlu1 %725 }
  0xee   : > { %819 = vst.msk [vmem:[#allocation3 + $0x18] sm:$0xff] %vm815_vm3, %v726_v49  ;;  %v732_v48 = vpop.permute.xlu0 %731 }
  0xef   : > { %970 = vrot.lane.b32.xlu1 %v6085_v28, %s5596_s20  ;;  %822 = vst.msk [vmem:[#allocation3 + $0x30] sm:$0xff] %vm815_vm3, %v732_v48 }
  0xf0   : > { %1105 = vrot.lane.b32.xlu0 %v5856_v25, %s5597_s21 }
  0xf1   : > { %v730_v46 = vpop.permute.xlu1 %729 }
  0xf2   : > { %821 = vst.msk [vmem:[#allocation3 + $0x28] sm:$0xff] %vm815_vm3, %v730_v46  ;;  %v736_v35 = vpop.permute.xlu0 %735 }
  0xf3   : > { %974 = vrot.lane.b32.xlu1 %v6344_v34, %s5596_s20  ;;  %824 = vst.msk [vmem:[#allocation3 + $0x40] sm:$0xff] %vm815_vm3, %v736_v35 }
  0xf4   : > { %1109 = vrot.lane.b32.xlu0 %v5858_v26, %s5597_s21 }
  0xf5   : > { %v734_v49 = vpop.permute.xlu1 %733 }
  0xf6   : > { %823 = vst.msk [vmem:[#allocation3 + $0x38] sm:$0xff] %vm815_vm3, %v734_v49  ;;  %v740_v48 = vpop.permute.xlu0 %739  ;;  %v8474_v49 = vld [vmem:[#allocation11_spill] sm:$0xff] }
  0xf7   : > { %1107 = vrot.lane.b32.xlu1 %v5865_v27, %s5597_s21  ;;  %826 = vst.msk [vmem:[#allocation3 + $0x50] sm:$0xff] %vm815_vm3, %v740_v48  ;;  %v8475_v48 = vld [vmem:[#allocation12_spill] sm:$0xff] }
  0xf8   : > { %1113 = vrot.lane.b32.xlu0 %v5873_v30, %s5597_s21 }
  0xf9   : > { %v738_v25 = vpop.permute.xlu1 %737 }
  0xfa   : > { %825 = vst.msk [vmem:[#allocation3 + $0x48] sm:$0xff] %vm815_vm3, %v738_v25  ;;  %v744_v46 = vpop.permute.xlu0 %743 }
  0xfb   : > { %1111 = vrot.lane.b32.xlu1 %v5877_v31, %s5597_s21  ;;  %828 = vst.msk [vmem:[#allocation3 + $0x60] sm:$0xff] %vm815_vm3, %v744_v46  ;;  %v8476_v46 = vld [vmem:[#allocation13_spill] sm:$0xff] }
  0xfc   : > { %1117 = vrot.lane.b32.xlu0 %v5881_v32, %s5597_s21 }
  0xfd   : > { %v742_v26 = vpop.permute.xlu1 %741 }
  0xfe   : > { %827 = vst.msk [vmem:[#allocation3 + $0x58] sm:$0xff] %vm815_vm3, %v742_v26  ;;  %v748_v27 = vpop.permute.xlu0 %747 }
  0xff   : > { %1115 = vrot.lane.b32.xlu1 %v5894_v39, %s5597_s21  ;;  %830 = vst.msk [vmem:[#allocation3 + $0x70] sm:$0xff] %vm815_vm3, %v748_v27  ;;  %v6444_v27 = vld [vmem:[#allocation2 + $0x189] sm:$0xff] }
 0x100   : > { %1121 = vrot.lane.b32.xlu0 %v5901_v40, %s5597_s21 }
 0x101   : > { %v746_v30 = vpop.permute.xlu1 %745 }
 0x102   : > { %829 = vst.msk [vmem:[#allocation3 + $0x68] sm:$0xff] %vm815_vm3, %v746_v30  ;;  %v752_v31 = vpop.permute.xlu0 %751 }
 0x103   : > { %1119 = vrot.lane.b32.xlu1 %v5905_v41, %s5597_s21  ;;  %832 = vst.msk [vmem:[#allocation3 + $0x80] sm:$0xff] %vm815_vm3, %v752_v31  ;;  %v8477_v31 = vld [vmem:[#allocation14_spill] sm:$0xff] }
 0x104   : > { %1125 = vrot.lane.b32.xlu0 %v5909_v42, %s5597_s21 }
 0x105   : > { %v750_v32 = vpop.permute.xlu1 %749 }
 0x106   : > { %831 = vst.msk [vmem:[#allocation3 + $0x78] sm:$0xff] %vm815_vm3, %v750_v32  ;;  %v756_v39 = vpop.permute.xlu0 %755 }
 0x107   : > { %1123 = vrot.lane.b32.xlu1 %v5913_v43, %s5597_s21  ;;  %834 = vst.msk [vmem:[#allocation3 + $0x90] sm:$0xff] %vm815_vm3, %v756_v39 }
 0x108   : > { %1129 = vrot.lane.b32.xlu0 %v5917_v44, %s5597_s21 }
 0x109   : > { %v754_v40 = vpop.permute.xlu1 %753 }
 0x10a   : > { %833 = vst.msk [vmem:[#allocation3 + $0x88] sm:$0xff] %vm815_vm3, %v754_v40  ;;  %v760_v41 = vpop.permute.xlu0 %759  ;;  %v8478_v40 = vld [vmem:[#allocation15_spill] sm:$0xff] }
 0x10b   : > { %1127 = vrot.lane.b32.xlu1 %v5923_v47, %s5597_s21  ;;  %836 = vst.msk [vmem:[#allocation3 + $0xa0] sm:$0xff] %vm815_vm3, %v760_v41  ;;  %v8479_v41 = vld [vmem:[#allocation16_spill] sm:$0xff] }
 0x10c   : > { %1133 = vrot.lane.b32.xlu0 %v5933_v50, %s5597_s21 }
 0x10d   : > { %v758_v42 = vpop.permute.xlu1 %757 }
 0x10e   : > { %835 = vst.msk [vmem:[#allocation3 + $0x98] sm:$0xff] %vm815_vm3, %v758_v42  ;;  %v764_v43 = vpop.permute.xlu0 %763 }
 0x10f   : > { %1131 = vrot.lane.b32.xlu1 %v5943_v53, %s5597_s21  ;;  %838 = vst.msk [vmem:[#allocation3 + $0xb0] sm:$0xff] %vm815_vm3, %v764_v43 }
 0x110   : > { %1137 = vrot.lane.b32.xlu0 %v5953_v56, %s5597_s21 }
 0x111   : > { %v762_v44 = vpop.permute.xlu1 %761 }
 0x112   : > { %837 = vst.msk [vmem:[#allocation3 + $0xa8] sm:$0xff] %vm815_vm3, %v762_v44  ;;  %v768_v47 = vpop.permute.xlu0 %767  ;;  %v8480_v44 = vld [vmem:[#allocation17_spill] sm:$0xff] }
 0x113   : > { %1135 = vrot.lane.b32.xlu1 %v5979_v63, %s5597_s21  ;;  %840 = vst.msk [vmem:[#allocation3 + $0xc0] sm:$0xff] %vm815_vm3, %v768_v47  ;;  %v8481_v47 = vld [vmem:[#allocation18_spill] sm:$0xff] }
 0x114   : > { %1141 = vrot.lane.b32.xlu0 %v6029_v11, %s5597_s21 }
 0x115   : > { %v766_v50 = vpop.permute.xlu1 %765 }
 0x116   : > { %839 = vst.msk [vmem:[#allocation3 + $0xb8] sm:$0xff] %vm815_vm3, %v766_v50  ;;  %v772_v53 = vpop.permute.xlu0 %771 }
 0x117   : > { %1139 = vrot.lane.b32.xlu1 %v6039_v14, %s5597_s21  ;;  %842 = vst.msk [vmem:[#allocation3 + $0xd0] sm:$0xff] %vm815_vm3, %v772_v53 }
 0x118   : > { %1145 = vrot.lane.b32.xlu0 %v6047_v15, %s5597_s21 }
 0x119   : > { %v770_v56 = vpop.permute.xlu1 %769 }
 0x11a   : > { %841 = vst.msk [vmem:[#allocation3 + $0xc8] sm:$0xff] %vm815_vm3, %v770_v56  ;;  %v776_v63 = vpop.permute.xlu0 %775  ;;  %v8482_v56 = vld [vmem:[#allocation19_spill] sm:$0xff] }
 0x11b   : > { %1143 = vrot.lane.b32.xlu1 %v6055_v18, %s5597_s21  ;;  %844 = vst.msk [vmem:[#allocation3 + $0xe0] sm:$0xff] %vm815_vm3, %v776_v63  ;;  %v8483_v63 = vld [vmem:[#allocation20_spill] sm:$0xff] }
 0x11c   : > { %1149 = vrot.lane.b32.xlu0 %v6063_v19, %s5597_s21 }
 0x11d   : > { %v774_v11 = vpop.permute.xlu1 %773 }
 0x11e   : > { %843 = vst.msk [vmem:[#allocation3 + $0xd8] sm:$0xff] %vm815_vm3, %v774_v11  ;;  %v780_v14 = vpop.permute.xlu0 %779 }
 0x11f   : > { %1147 = vrot.lane.b32.xlu1 %v6071_v22, %s5597_s21  ;;  %846 = vst.msk [vmem:[#allocation3 + $0xf0] sm:$0xff] %vm815_vm3, %v780_v14  ;;  %v8473_v22 = vld [vmem:[#allocation10_spill] sm:$0xff] }
 0x120   : > { %1153 = vrot.lane.b32.xlu0 %v6079_v23, %s5597_s21 }
 0x121   : > { %v778_v15 = vpop.permute.xlu1 %777 }
 0x122   : > { %845 = vst.msk [vmem:[#allocation3 + $0xe8] sm:$0xff] %vm815_vm3, %v778_v15  ;;  %v913_v18 = vpop.permute.xlu0 %912  ;;  %v8484_v15 = vld [vmem:[#allocation21_spill] sm:$0xff] }
 0x123   : > { %1151 = vrot.lane.b32.xlu1 %v6087_v29, %s5597_s21  ;;  %1009 = vst.msk [vmem:[#allocation3] sm:$0xff] %vm1008_vm4, %v913_v18  ;;  %v6434_v29 = vld [vmem:[#allocation2 + $0x181] sm:$0xff]  ;;  %v8485_v18 = vld [vmem:[#allocation22_spill] sm:$0xff] }
 0x124   : > { %1157 = vrot.lane.b32.xlu0 %v6095_v33, %s5597_s21 }
 0x125   : > { %v782_v19 = vpop.permute.xlu1 %781 }
 0x126   : > { %847 = vst.msk [vmem:[#allocation3 + $0xf8] sm:$0xff] %vm815_vm3, %v782_v19  ;;  %v917_v35 = vpop.permute.xlu0 %916  ;;  %vm3759_vm3 = vcmask 458112  }
 0x127   : > { %1155 = vrot.lane.b32.xlu1 %v8473_v22, %s5597_s21  ;;  %1011 = vst.msk [vmem:[#allocation3 + $0x10] sm:$0xff] %vm1008_vm4, %v917_v35  ;;  %v8486_v35 = vld [vmem:[#allocation23_spill] sm:$0xff] }
 0x128   : > { %1161 = vrot.lane.b32.xlu0 %v8474_v49, %s5597_s21 }
 0x129   : > { %v915_v23 = vpop.permute.xlu1 %914 }
 0x12a   : > { %1010 = vst.msk [vmem:[#allocation3 + $0x8] sm:$0xff] %vm1008_vm4, %v915_v23  ;;  %v921_v33 = vpop.permute.xlu0 %920  ;;  %v8487_v23 = vld [vmem:[#allocation24_spill] sm:$0xff] }
 0x12b   : > { %1159 = vrot.lane.b32.xlu1 %v8475_v48, %s5597_s21  ;;  %1013 = vst.msk [vmem:[#allocation3 + $0x20] sm:$0xff] %vm1008_vm4, %v921_v33  ;;  %v8488_v33 = vld [vmem:[#allocation25_spill] sm:$0xff] }
 0x12c   : > { %1165 = vrot.lane.b32.xlu0 %v6434_v29, %s5597_s21 }
 0x12d   : > { %v919_v25 = vpop.permute.xlu1 %918 }
 0x12e   : > { %1012 = vst.msk [vmem:[#allocation3 + $0x18] sm:$0xff] %vm1008_vm4, %v919_v25  ;;  %v925_v26 = vpop.permute.xlu0 %924  ;;  %v8489_v25 = vld [vmem:[#allocation26_spill] sm:$0xff] }
 0x12f   : > { %1163 = vrot.lane.b32.xlu1 %v8476_v46, %s5597_s21  ;;  %1015 = vst.msk [vmem:[#allocation3 + $0x30] sm:$0xff] %vm1008_vm4, %v925_v26 }
 0x130   : > { %1298 = vrot.lane.b32.xlu0 %v8477_v31, %s5598_s22  ;;  %v8491_v31 = vld [vmem:[#allocation28_spill] sm:$0xff] }
 0x131   : > { %v923_v30 = vpop.permute.xlu1 %922 }
 0x132   : > { %1014 = vst.msk [vmem:[#allocation3 + $0x28] sm:$0xff] %vm1008_vm4, %v923_v30  ;;  %v929_v32 = vpop.permute.xlu0 %928  ;;  %v8490_v30 = vld [vmem:[#allocation27_spill] sm:$0xff] }
 0x133   : > { %1167 = vrot.lane.b32.xlu1 %v6444_v27, %s5597_s21  ;;  %1017 = vst.msk [vmem:[#allocation3 + $0x40] sm:$0xff] %vm1008_vm4, %v929_v32 }
 0x134   : > { %1302 = vrot.lane.b32.xlu0 %v8478_v40, %s5598_s22  ;;  %v8492_v40 = vld [vmem:[#allocation29_spill] sm:$0xff] }
 0x135   : > { %v927_v39 = vpop.permute.xlu1 %926 }
 0x136   : > { %1016 = vst.msk [vmem:[#allocation3 + $0x38] sm:$0xff] %vm1008_vm4, %v927_v39  ;;  %v933_v42 = vpop.permute.xlu0 %932 }
 0x137   : > { %1300 = vrot.lane.b32.xlu1 %v8479_v41, %s5598_s22  ;;  %1019 = vst.msk [vmem:[#allocation3 + $0x50] sm:$0xff] %vm1008_vm4, %v933_v42  ;;  %v8493_v41 = vld [vmem:[#allocation30_spill] sm:$0xff] }
 0x138   : > { %1306 = vrot.lane.b32.xlu0 %v8480_v44, %s5598_s22  ;;  %v8494_v44 = vld [vmem:[#allocation31_spill] sm:$0xff] }
 0x139   : > { %v931_v43 = vpop.permute.xlu1 %930 }
 0x13a   : > { %1018 = vst.msk [vmem:[#allocation3 + $0x48] sm:$0xff] %vm1008_vm4, %v931_v43  ;;  %v937_v50 = vpop.permute.xlu0 %936 }
 0x13b   : > { %1304 = vrot.lane.b32.xlu1 %v8481_v47, %s5598_s22  ;;  %1021 = vst.msk [vmem:[#allocation3 + $0x60] sm:$0xff] %vm1008_vm4, %v937_v50  ;;  %v8495_v47 = vld [vmem:[#allocation32_spill] sm:$0xff] }
 0x13c   : > { %1310 = vrot.lane.b32.xlu0 %v8482_v56, %s5598_s22  ;;  %v8496_v56 = vld [vmem:[#allocation33_spill] sm:$0xff] }
 0x13d   : > { %v935_v53 = vpop.permute.xlu1 %934 }
 0x13e   : > { %1020 = vst.msk [vmem:[#allocation3 + $0x58] sm:$0xff] %vm1008_vm4, %v935_v53  ;;  %v941_v11 = vpop.permute.xlu0 %940 }
 0x13f   : > { %1308 = vrot.lane.b32.xlu1 %v8483_v63, %s5598_s22  ;;  %1023 = vst.msk [vmem:[#allocation3 + $0x70] sm:$0xff] %vm1008_vm4, %v941_v11  ;;  %v8497_v63 = vld [vmem:[#allocation34_spill] sm:$0xff] }
 0x140   : > { %1314 = vrot.lane.b32.xlu0 %v8484_v15, %s5598_s22  ;;  %v8498_v15 = vld [vmem:[#allocation35_spill] sm:$0xff] }
 0x141   : > { %v939_v14 = vpop.permute.xlu1 %938 }
 0x142   : > { %1022 = vst.msk [vmem:[#allocation3 + $0x68] sm:$0xff] %vm1008_vm4, %v939_v14  ;;  %v945_v19 = vpop.permute.xlu0 %944 }
 0x143   : > { %1312 = vrot.lane.b32.xlu1 %v8485_v18, %s5598_s22  ;;  %1025 = vst.msk [vmem:[#allocation3 + $0x80] sm:$0xff] %vm1008_vm4, %v945_v19  ;;  %v8499_v18 = vld [vmem:[#allocation36_spill] sm:$0xff] }
 0x144   : > { %1318 = vrot.lane.b32.xlu0 %v8486_v35, %s5598_s22  ;;  %v8500_v35 = vld [vmem:[#allocation37_spill] sm:$0xff] }
 0x145   : > { %v943_v22 = vpop.permute.xlu1 %942 }
 0x146   : > { %1024 = vst.msk [vmem:[#allocation3 + $0x78] sm:$0xff] %vm1008_vm4, %v943_v22  ;;  %v949_v49 = vpop.permute.xlu0 %948 }
 0x147   : > { %1316 = vrot.lane.b32.xlu1 %v8487_v23, %s5598_s22  ;;  %1027 = vst.msk [vmem:[#allocation3 + $0x90] sm:$0xff] %vm1008_vm4, %v949_v49  ;;  %v8501_v23 = vld [vmem:[#allocation38_spill] sm:$0xff] }
 0x148   : > { %1322 = vrot.lane.b32.xlu0 %v8488_v33, %s5598_s22  ;;  %v8502_v33 = vld [vmem:[#allocation39_spill] sm:$0xff] }
 0x149   : > { %v947_v48 = vpop.permute.xlu1 %946 }
 0x14a   : > { %1026 = vst.msk [vmem:[#allocation3 + $0x88] sm:$0xff] %vm1008_vm4, %v947_v48  ;;  %v953_v46 = vpop.permute.xlu0 %952 }
 0x14b   : > { %1320 = vrot.lane.b32.xlu1 %v8489_v25, %s5598_s22  ;;  %1029 = vst.msk [vmem:[#allocation3 + $0xa0] sm:$0xff] %vm1008_vm4, %v953_v46 }
 0x14c   : > { %1326 = vrot.lane.b32.xlu0 %v8490_v30, %s5598_s22 }
 0x14d   : > { %v951_v26 = vpop.permute.xlu1 %950 }
 0x14e   : > { %1028 = vst.msk [vmem:[#allocation3 + $0x98] sm:$0xff] %vm1008_vm4, %v951_v26  ;;  %v957_v32 = vpop.permute.xlu0 %956  ;;  %v6534_v26 = vld [vmem:[#allocation2 + $0x182] sm:$0xff] }
 0x14f   : > { %1324 = vrot.lane.b32.xlu1 %v8491_v31, %s5598_s22  ;;  %1031 = vst.msk [vmem:[#allocation3 + $0xb0] sm:$0xff] %vm1008_vm4, %v957_v32  ;;  %v6544_v31 = vld [vmem:[#allocation2 + $0x18a] sm:$0xff] }
 0x150   : > { %1330 = vrot.lane.b32.xlu0 %v8492_v40, %s5598_s22 }
 0x151   : > { %v955_v39 = vpop.permute.xlu1 %954 }
 0x152   : > { %1030 = vst.msk [vmem:[#allocation3 + $0xa8] sm:$0xff] %vm1008_vm4, %v955_v39  ;;  %v961_v42 = vpop.permute.xlu0 %960 }
 0x153   : > { %1328 = vrot.lane.b32.xlu1 %v8493_v41, %s5598_s22  ;;  %1033 = vst.msk [vmem:[#allocation3 + $0xc0] sm:$0xff] %vm1008_vm4, %v961_v42 }
 0x154   : > { %1334 = vrot.lane.b32.xlu0 %v8494_v44, %s5598_s22  ;;  %v2043_v44 = vld [vmem:[%s8402_s1 + $0x20] sm:$0xf] }
 0x155   : > { %v959_v43 = vpop.permute.xlu1 %958  ;;  %5334 = vmatprep.subr.msk.mxu0 %vm2141_vm7, %v2043_v44 }
 0x156   : > { %1032 = vst.msk [vmem:[#allocation3 + $0xb8] sm:$0xff] %vm1008_vm4, %v959_v43  ;;  %v965_v50 = vpop.permute.xlu0 %964  ;;  %5335 = vmatpush3.msk.msra.mxu0 %vm2141_vm7, %v2043_v44  ;;  %v1828_v44 = vld [vmem:[#allocation2 + $0xda] sm:$0xff]  ;;  %vm4883_vm7 = vcmask 1046528  }
 0x157   : > { %1332 = vrot.lane.b32.xlu1 %v8495_v47, %s5598_s22  ;;  %1035 = vst.msk [vmem:[#allocation3 + $0xd0] sm:$0xff] %vm1008_vm4, %v965_v50 }
 0x158   : > { %1338 = vrot.lane.b32.xlu0 %v8496_v56, %s5598_s22  ;;  %v1625_v56 = vld [vmem:[#allocation2 + $0x61] sm:$0xff] }
 0x159   : > { %v963_v53 = vpop.permute.xlu1 %962 }
 0x15a   : > { %1034 = vst.msk [vmem:[#allocation3 + $0xc8] sm:$0xff] %vm1008_vm4, %v963_v53  ;;  %v969_v11 = vpop.permute.xlu0 %968  ;;  %v2042_v53 = vld [vmem:[%s8402_s1 + $0x18] sm:$0xff] }
 0x15b   : > { %1336 = vrot.lane.b32.xlu1 %v8497_v63, %s5598_s22  ;;  %1037 = vst.msk [vmem:[#allocation3 + $0xe0] sm:$0xff] %vm1008_vm4, %v969_v11  ;;  %5336 = vmatprep.subr.mxu0 %v2042_v53  ;;  %v2041_v63 = vld [vmem:[%s8402_s1 + $0x10] sm:$0xff] }
 0x15c   : > { %1342 = vrot.lane.b32.xlu0 %v8498_v15, %s5598_s22  ;;  %5337 = vmatpush3.msra.mxu0 %v2042_v53  ;;  %v1637_v53 = vld [vmem:[#allocation2 + $0xf1] sm:$0xff] }
 0x15d   : > { %v967_v14 = vpop.permute.xlu1 %966  ;;  %5338 = vmatprep.subr.mxu0 %v2041_v63 }
 0x15e   : > { %1036 = vst.msk [vmem:[#allocation3 + $0xd8] sm:$0xff] %vm1008_vm4, %v967_v14  ;;  %v973_v19 = vpop.permute.xlu0 %972  ;;  %v1624_v14 = vld [vmem:[#allocation2 + $0x51] sm:$0xff]  ;;  %5339 = vmatpush3.msra.mxu0 %v2041_v63  ;;  %v1829_v63 = vld [vmem:[#allocation2 + $0xe2] sm:$0xff] }
 0x15f   : > { %1340 = vrot.lane.b32.xlu1 %v8499_v18, %s5598_s22  ;;  %1039 = vst.msk [vmem:[#allocation3 + $0xf0] sm:$0xff] %vm1008_vm4, %v973_v19  ;;  %v2040_v18 = vld [vmem:[%s8402_s1 + $0x8] sm:$0xff]  ;;  %v1814_v19 = vld [vmem:[#allocation2 + $0x32] sm:$0xff] }
 0x160   : > { %1346 = vrot.lane.b32.xlu0 %v8500_v35, %s5598_s22  ;;  %5340 = vmatprep.subr.mxu0 %v2040_v18 }
 0x161   : > { %v971_v22 = vpop.permute.xlu1 %970  ;;  %5341 = vmatpush3.msra.mxu0 %v2040_v18  ;;  %v1638_v18 = vld [vmem:[#allocation2 + $0xf9] sm:$0xff] }
 0x162   : > { %1038 = vst.msk [vmem:[#allocation3 + $0xe8] sm:$0xff] %vm1008_vm4, %v971_v22  ;;  %v1106_v49 = vpop.permute.xlu0 %1105  ;;  %v2039_v22 = vld [vmem:[%s8402_s1] sm:$0xff] }
 0x163   : > { %1344 = vrot.lane.b32.xlu1 %v8501_v23, %s5598_s22  ;;  %1202 = vst.msk [vmem:[#allocation3] sm:$0xff] %vm1201_vm5, %v1106_v49  ;;  %v1626_v23 = vld [vmem:[#allocation2 + $0x69] sm:$0xff]  ;;  %5342 = vmatprep.subr.mxu0 %v2039_v22 }
 0x164   : > { %1350 = vrot.lane.b32.xlu0 %v6222_v36, %s5598_s22  ;;  %5343 = vmatpush3.msra.mxu0 %v2039_v22  ;;  %v1639_v22 = vld [vmem:[#allocation2 + $0x109] sm:$0xff] }
 0x165   : > { %v975_v48 = vpop.permute.xlu1 %974 }
 0x166   : > { %1040 = vst.msk [vmem:[#allocation3 + $0xf8] sm:$0xff] %vm1008_vm4, %v975_v48  ;;  %v1110_v25 = vpop.permute.xlu0 %1109  ;;  %v1816_v48 = vld [vmem:[#allocation2 + $0x4a] sm:$0xff]  ;;  %vm3952_vm4 = vcmask 523712  }
 0x167   : > { %1348 = vrot.lane.b32.xlu1 %v8502_v33, %s5598_s22  ;;  %1204 = vst.msk [vmem:[#allocation3 + $0x10] sm:$0xff] %vm1201_vm5, %v1110_v25  ;;  %v1815_v25 = vld [vmem:[#allocation2 + $0x3a] sm:$0xff] }
 0x168   : > { %1354 = vrot.lane.b32.xlu0 %v6232_v37, %s5598_s22 }
 0x169   : > { %v1108_v46 = vpop.permute.xlu1 %1107 }
 0x16a   : > { %1203 = vst.msk [vmem:[#allocation3 + $0x8] sm:$0xff] %vm1201_vm5, %v1108_v46  ;;  %v1114_v36 = vpop.permute.xlu0 %1113 }
 0x16b   : > { %1352 = vrot.lane.b32.xlu1 %v6236_v45, %s5598_s22  ;;  %1206 = vst.msk [vmem:[#allocation3 + $0x20] sm:$0xff] %vm1201_vm5, %v1114_v36  ;;  %v1818_v36 = vld [vmem:[#allocation2 + $0x62] sm:$0xff] }
 0x16c   : > { %1358 = vrot.lane.b32.xlu0 %v6534_v26, %s5598_s22 }
 0x16d   : > { %v1112_v30 = vpop.permute.xlu1 %1111 }
 0x16e   : > { %1205 = vst.msk [vmem:[#allocation3 + $0x18] sm:$0xff] %vm1201_vm5, %v1112_v30  ;;  %v1118_v37 = vpop.permute.xlu0 %1117 }
 0x16f   : > { %1356 = vrot.lane.b32.xlu1 %v6244_v38, %s5598_s22  ;;  %1208 = vst.msk [vmem:[#allocation3 + $0x30] sm:$0xff] %vm1201_vm5, %v1118_v37  ;;  %v1817_v37 = vld [vmem:[#allocation2 + $0x52] sm:$0xff] }
 0x170   : > { %1492 = vrot.lane.b32.xlu0 %v5937_v51, %s5599_s23 }
 0x171   : > { %v1116_v32 = vpop.permute.xlu1 %1115 }
 0x172   : > { %1207 = vst.msk [vmem:[#allocation3 + $0x28] sm:$0xff] %vm1201_vm5, %v1116_v32  ;;  %v1122_v45 = vpop.permute.xlu0 %1121 }
 0x173   : > { %1360 = vrot.lane.b32.xlu1 %v6544_v31, %s5598_s22  ;;  %1210 = vst.msk [vmem:[#allocation3 + $0x40] sm:$0xff] %vm1201_vm5, %v1122_v45  ;;  %v1627_v45 = vld [vmem:[#allocation2 + $0x79] sm:$0xff] }
 0x174   : > { %1496 = vrot.lane.b32.xlu0 %v5949_v54, %s5599_s23 }
 0x175   : > { %v1120_v39 = vpop.permute.xlu1 %1119 }
 0x176   : > { %1209 = vst.msk [vmem:[#allocation3 + $0x38] sm:$0xff] %vm1201_vm5, %v1120_v39  ;;  %v1126_v38 = vpop.permute.xlu0 %1125 }
 0x177   : > { %1494 = vrot.lane.b32.xlu1 %v5939_v52, %s5599_s23  ;;  %1212 = vst.msk [vmem:[#allocation3 + $0x50] sm:$0xff] %vm1201_vm5, %v1126_v38  ;;  %v1819_v38 = vld [vmem:[#allocation2 + $0x6a] sm:$0xff] }
 0x178   : > { %1500 = vrot.lane.b32.xlu0 %v5959_v57, %s5599_s23 }
 0x179   : > { %v1124_v51 = vpop.permute.xlu1 %1123 }
 0x17a   : > { %1211 = vst.msk [vmem:[#allocation3 + $0x48] sm:$0xff] %vm1201_vm5, %v1124_v51  ;;  %v1130_v40 = vpop.permute.xlu0 %1129 }
 0x17b   : > { %1498 = vrot.lane.b32.xlu1 %v5951_v55, %s5599_s23  ;;  %1214 = vst.msk [vmem:[#allocation3 + $0x60] sm:$0xff] %vm1201_vm5, %v1130_v40  ;;  %v1820_v40 = vld [vmem:[#allocation2 + $0x7a] sm:$0xff] }
 0x17c   : > { %1504 = vrot.lane.b32.xlu0 %v5963_v59, %s5599_s23 }
 0x17d   : > { %v1128_v54 = vpop.permute.xlu1 %1127 }
 0x17e   : > { %1213 = vst.msk [vmem:[#allocation3 + $0x58] sm:$0xff] %vm1201_vm5, %v1128_v54  ;;  %v1134_v52 = vpop.permute.xlu0 %1133 }
 0x17f   : > { %1502 = vrot.lane.b32.xlu1 %v5961_v58, %s5599_s23  ;;  %1216 = vst.msk [vmem:[#allocation3 + $0x70] sm:$0xff] %vm1201_vm5, %v1134_v52  ;;  %v1628_v52 = vld [vmem:[#allocation2 + $0x81] sm:$0xff] }
 0x180   : > { %1508 = vrot.lane.b32.xlu0 %v5975_v61, %s5599_s23 }
 0x181   : > { %v1132_v57 = vpop.permute.xlu1 %1131 }
 0x182   : > { %1215 = vst.msk [vmem:[#allocation3 + $0x68] sm:$0xff] %vm1201_vm5, %v1132_v57  ;;  %v1138_v55 = vpop.permute.xlu0 %1137 }
 0x183   : > { %1506 = vrot.lane.b32.xlu1 %v5973_v60, %s5599_s23  ;;  %1218 = vst.msk [vmem:[#allocation3 + $0x80] sm:$0xff] %vm1201_vm5, %v1138_v55  ;;  %v1629_v55 = vld [vmem:[#allocation2 + $0x91] sm:$0xff] }
 0x184   : > { %1512 = vrot.lane.b32.xlu0 %v5987_v1, %s5599_s23 }
 0x185   : > { %v1136_v59 = vpop.permute.xlu1 %1135 }
 0x186   : > { %1217 = vst.msk [vmem:[#allocation3 + $0x78] sm:$0xff] %vm1201_vm5, %v1136_v59  ;;  %v1142_v58 = vpop.permute.xlu0 %1141 }
 0x187   : > { %1510 = vrot.lane.b32.xlu1 %v5977_v62, %s5599_s23  ;;  %1220 = vst.msk [vmem:[#allocation3 + $0x90] sm:$0xff] %vm1201_vm5, %v1142_v58  ;;  %v1821_v58 = vld [vmem:[#allocation2 + $0x82] sm:$0xff] }
 0x188   : > { %1516 = vrot.lane.b32.xlu0 %v5991_v3, %s5599_s23 }
 0x189   : > { %v1140_v61 = vpop.permute.xlu1 %1139 }
 0x18a   : > { %1219 = vst.msk [vmem:[#allocation3 + $0x88] sm:$0xff] %vm1201_vm5, %v1140_v61  ;;  %v1146_v60 = vpop.permute.xlu0 %1145 }
 0x18b   : > { %1514 = vrot.lane.b32.xlu1 %v5989_v2, %s5599_s23  ;;  %1222 = vst.msk [vmem:[#allocation3 + $0xa0] sm:$0xff] %vm1201_vm5, %v1146_v60  ;;  %v1822_v60 = vld [vmem:[#allocation2 + $0x92] sm:$0xff] }
 0x18c   : > { %1520 = vrot.lane.b32.xlu0 %v6003_v5, %s5599_s23 }
 0x18d   : > { %v1144_v1 = vpop.permute.xlu1 %1143 }
 0x18e   : > { %1221 = vst.msk [vmem:[#allocation3 + $0x98] sm:$0xff] %vm1201_vm5, %v1144_v1  ;;  %v1150_v62 = vpop.permute.xlu0 %1149 }
 0x18f   : > { %1518 = vrot.lane.b32.xlu1 %v6001_v4, %s5599_s23  ;;  %1224 = vst.msk [vmem:[#allocation3 + $0xb0] sm:$0xff] %vm1201_vm5, %v1150_v62  ;;  %v1630_v62 = vld [vmem:[#allocation2 + $0x99] sm:$0xff] }
 0x190   : > { %1524 = vrot.lane.b32.xlu0 %v6013_v7, %s5599_s23 }
 0x191   : > { %v1148_v3 = vpop.permute.xlu1 %1147 }
 0x192   : > { %1223 = vst.msk [vmem:[#allocation3 + $0xa8] sm:$0xff] %vm1201_vm5, %v1148_v3  ;;  %v1154_v2 = vpop.permute.xlu0 %1153 }
 0x193   : > { %1522 = vrot.lane.b32.xlu1 %v6005_v6, %s5599_s23  ;;  %1226 = vst.msk [vmem:[#allocation3 + $0xc0] sm:$0xff] %vm1201_vm5, %v1154_v2  ;;  %v1631_v2 = vld [vmem:[#allocation2 + $0xa9] sm:$0xff] }
 0x194   : > { %1528 = vrot.lane.b32.xlu0 %v6017_v9, %s5599_s23 }
 0x195   : > { %v1152_v5 = vpop.permute.xlu1 %1151 }
 0x196   : > { %1225 = vst.msk [vmem:[#allocation3 + $0xb8] sm:$0xff] %vm1201_vm5, %v1152_v5  ;;  %v1158_v4 = vpop.permute.xlu0 %1157 }
 0x197   : > { %1526 = vrot.lane.b32.xlu1 %v6015_v8, %s5599_s23  ;;  %1228 = vst.msk [vmem:[#allocation3 + $0xd0] sm:$0xff] %vm1201_vm5, %v1158_v4  ;;  %v1823_v4 = vld [vmem:[#allocation2 + $0x9a] sm:$0xff] }
 0x198   : > { %1532 = vrot.lane.b32.xlu0 %v6035_v12, %s5599_s23 }
 0x199   : > { %v1156_v7 = vpop.permute.xlu1 %1155 }
 0x19a   : > { %1227 = vst.msk [vmem:[#allocation3 + $0xc8] sm:$0xff] %vm1201_vm5, %v1156_v7  ;;  %v1162_v6 = vpop.permute.xlu0 %1161 }
 0x19b   : > { %1530 = vrot.lane.b32.xlu1 %v6027_v10, %s5599_s23  ;;  %1230 = vst.msk [vmem:[#allocation3 + $0xe0] sm:$0xff] %vm1201_vm5, %v1162_v6  ;;  %v1824_v6 = vld [vmem:[#allocation2 + $0xaa] sm:$0xff] }
 0x19c   : > { %1536 = vrot.lane.b32.xlu0 %v6051_v16, %s5599_s23 }
 0x19d   : > { %v1160_v9 = vpop.permute.xlu1 %1159 }
 0x19e   : > { %1229 = vst.msk [vmem:[#allocation3 + $0xd8] sm:$0xff] %vm1201_vm5, %v1160_v9  ;;  %v1166_v8 = vpop.permute.xlu0 %1165 }
 0x19f   : > { %1534 = vrot.lane.b32.xlu1 %v6037_v13, %s5599_s23  ;;  %1232 = vst.msk [vmem:[#allocation3 + $0xf0] sm:$0xff] %vm1201_vm5, %v1166_v8  ;;  %v1632_v8 = vld [vmem:[#allocation2 + $0xb1] sm:$0xff] }
 0x1a0   : > { %1540 = vrot.lane.b32.xlu0 %v6067_v20, %s5599_s23 }
 0x1a1   : > { %v1164_v12 = vpop.permute.xlu1 %1163 }
 0x1a2   : > { %1231 = vst.msk [vmem:[#allocation3 + $0xe8] sm:$0xff] %vm1201_vm5, %v1164_v12  ;;  %v1299_v10 = vpop.permute.xlu0 %1298 }
 0x1a3   : > { %1538 = vrot.lane.b32.xlu1 %v6053_v17, %s5599_s23  ;;  %1395 = vst.msk [vmem:[#allocation3] sm:$0xff] %vm1394_vm6, %v1299_v10  ;;  %v1458_v17 = vld [vmem:[#allocation2 + $0x198] sm:$0xff]  ;;  %v1633_v10 = vld [vmem:[#allocation2 + $0xc1] sm:$0xff] }
 0x1a4   : > { %1544 = vrot.lane.b32.xlu0 %v6083_v24, %s5599_s23 }
 0x1a5   : > { %v1168_v16 = vpop.permute.xlu1 %1167 }
 0x1a6   : > { %1233 = vst.msk [vmem:[#allocation3 + $0xf8] sm:$0xff] %vm1201_vm5, %v1168_v16  ;;  %v1303_v13 = vpop.permute.xlu0 %1302  ;;  %vm4145_vm5 = vcmask 589312  }
 0x1a7   : > { %1542 = vrot.lane.b32.xlu1 %v6069_v21, %s5599_s23  ;;  %1397 = vst.msk [vmem:[#allocation3 + $0x10] sm:$0xff] %vm1394_vm6, %v1303_v13  ;;  %v1621_v21 = vld [vmem:[#allocation2 + $0x31] sm:$0xff] }
 0x1a8   : > { %1548 = vrot.lane.b32.xlu0 %v6334_v0, %s5599_s23  ;;  %v1459_v0 = vld [vmem:[#allocation2 + $0x1a0] sm:$0xff]  ;;  %v1825_v13 = vld [vmem:[#allocation2 + $0xb2] sm:$0xff] }
 0x1a9   : > { %v1301_v20 = vpop.permute.xlu1 %1300 }
 0x1aa   : > { %1396 = vst.msk [vmem:[#allocation3 + $0x8] sm:$0xff] %vm1394_vm6, %v1301_v20  ;;  %v1307_v41 = vpop.permute.xlu0 %1306 }
 0x1ab   : > { %1546 = vrot.lane.b32.xlu1 %v6085_v28, %s5599_s23  ;;  %1399 = vst.msk [vmem:[#allocation3 + $0x20] sm:$0xff] %vm1394_vm6, %v1307_v41  ;;  %v1623_v28 = vld [vmem:[#allocation2 + $0x49] sm:$0xff] }
 0x1ac   : > { %1552 = vrot.lane.b32.xlu0 %v1458_v17, %s5599_s23  ;;  %v1826_v17 = vld [vmem:[#allocation2 + $0xc2] sm:$0xff] }
 0x1ad   : > { %v1305_v24 = vpop.permute.xlu1 %1304 }
 0x1ae   : > { %1398 = vst.msk [vmem:[#allocation3 + $0x18] sm:$0xff] %vm1394_vm6, %v1305_v24  ;;  %v1311_v42 = vpop.permute.xlu0 %1310  ;;  %v1634_v24 = vld [vmem:[#allocation2 + $0xc9] sm:$0xff] }
 0x1af   : > { %1550 = vrot.lane.b32.xlu1 %v6344_v34, %s5599_s23  ;;  %1401 = vst.msk [vmem:[#allocation3 + $0x30] sm:$0xff] %vm1394_vm6, %v1311_v42  ;;  %v1622_v34 = vld [vmem:[#allocation2 + $0x39] sm:$0xff] }
 0x1b0   : > { %1685 = vrot.lane.b32.xlu0 %v1621_v21, %s5600_s29  ;;  %v1635_v42 = vld [vmem:[#allocation2 + $0xd9] sm:$0xff] }
 0x1b1   : > { %v1309_v43 = vpop.permute.xlu1 %1308 }
 0x1b2   : > { %1400 = vst.msk [vmem:[#allocation3 + $0x28] sm:$0xff] %vm1394_vm6, %v1309_v43  ;;  %v1315_v47 = vpop.permute.xlu0 %1314  ;;  %v1827_v43 = vld [vmem:[#allocation2 + $0xca] sm:$0xff] }
 0x1b3   : > { %1554 = vrot.lane.b32.xlu1 %v1459_v0, %s5599_s23  ;;  %1403 = vst.msk [vmem:[#allocation3 + $0x40] sm:$0xff] %vm1394_vm6, %v1315_v47 }
 0x1b4   : > { %1689 = vrot.lane.b32.xlu0 %v1623_v28, %s5600_s29 }
 0x1b5   : > { %v1313_v50 = vpop.permute.xlu1 %1312 }
 0x1b6   : > { %1402 = vst.msk [vmem:[#allocation3 + $0x38] sm:$0xff] %vm1394_vm6, %v1313_v50  ;;  %v1319_v11 = vpop.permute.xlu0 %1318 }
 0x1b7   : > { %1687 = vrot.lane.b32.xlu1 %v1622_v34, %s5600_s29  ;;  %1405 = vst.msk [vmem:[#allocation3 + $0x50] sm:$0xff] %vm1394_vm6, %v1319_v11  ;;  %v1636_v34 = vld [vmem:[#allocation2 + $0xe1] sm:$0xff] }
 0x1b8   : > { %1693 = vrot.lane.b32.xlu0 %v1625_v56, %s5600_s29 }
 0x1b9   : > { %v1317_v15 = vpop.permute.xlu1 %1316 }
 0x1ba   : > { %1404 = vst.msk [vmem:[#allocation3 + $0x48] sm:$0xff] %vm1394_vm6, %v1317_v15  ;;  %v1323_v35 = vpop.permute.xlu0 %1322 }
 0x1bb   : > { %1691 = vrot.lane.b32.xlu1 %v1624_v14, %s5600_s29  ;;  %1407 = vst.msk [vmem:[#allocation3 + $0x60] sm:$0xff] %vm1394_vm6, %v1323_v35  ;;  %v1830_v14 = vld [vmem:[#allocation2 + $0xf2] sm:$0xff] }
 0x1bc   : > { %1878 = vrot.lane.b32.xlu0 %v1814_v19, %s5601_s8 }
 0x1bd   : > { %v1321_v49 = vpop.permute.xlu1 %1320 }
 0x1be   : > { %1406 = vst.msk [vmem:[#allocation3 + $0x58] sm:$0xff] %vm1394_vm6, %v1321_v49  ;;  %v1327_v33 = vpop.permute.xlu0 %1326 }
 0x1bf   : > { %1695 = vrot.lane.b32.xlu1 %v1626_v23, %s5600_s29  ;;  %1409 = vst.msk [vmem:[#allocation3 + $0x70] sm:$0xff] %vm1394_vm6, %v1327_v33  ;;  %v1831_v23 = vld [vmem:[#allocation2 + $0xfa] sm:$0xff] }
 0x1c0   : > { %1882 = vrot.lane.b32.xlu0 %v1816_v48, %s5601_s8  ;;  %v1832_v48 = vld [vmem:[#allocation2 + $0x10a] sm:$0xff] }
 0x1c1   : > { %v1325_v46 = vpop.permute.xlu1 %1324 }
 0x1c2   : > { %1408 = vst.msk [vmem:[#allocation3 + $0x68] sm:$0xff] %vm1394_vm6, %v1325_v46  ;;  %v1331_v30 = vpop.permute.xlu0 %1330 }
 0x1c3   : > { %1880 = vrot.lane.b32.xlu1 %v1815_v25, %s5601_s8  ;;  %1411 = vst.msk [vmem:[#allocation3 + $0x80] sm:$0xff] %vm1394_vm6, %v1331_v30  ;;  %v1640_v25 = vld [vmem:[#allocation2 + $0x111] sm:$0xff] }
 0x1c4   : > { %1886 = vrot.lane.b32.xlu0 %v1818_v36, %s5601_s8  ;;  %v1641_v36 = vld [vmem:[#allocation2 + $0x121] sm:$0xff] }
 0x1c5   : > { %v1329_v32 = vpop.permute.xlu1 %1328 }
 0x1c6   : > { %1410 = vst.msk [vmem:[#allocation3 + $0x78] sm:$0xff] %vm1394_vm6, %v1329_v32  ;;  %v1335_v39 = vpop.permute.xlu0 %1334 }
 0x1c7   : > { %1884 = vrot.lane.b32.xlu1 %v1817_v37, %s5601_s8  ;;  %1413 = vst.msk [vmem:[#allocation3 + $0x90] sm:$0xff] %vm1394_vm6, %v1335_v39  ;;  %v1833_v37 = vld [vmem:[#allocation2 + $0x112] sm:$0xff] }
 0x1c8   : > { %1697 = vrot.lane.b32.xlu0 %v1627_v45, %s5600_s29  ;;  %v1834_v45 = vld [vmem:[#allocation2 + $0x122] sm:$0xff] }
 0x1c9   : > { %v1333_v51 = vpop.permute.xlu1 %1332 }
 0x1ca   : > { %1412 = vst.msk [vmem:[#allocation3 + $0x88] sm:$0xff] %vm1394_vm6, %v1333_v51  ;;  %v1339_v54 = vpop.permute.xlu0 %1338 }
 0x1cb   : > { %1888 = vrot.lane.b32.xlu1 %v1819_v38, %s5601_s8  ;;  %1415 = vst.msk [vmem:[#allocation3 + $0xa0] sm:$0xff] %vm1394_vm6, %v1339_v54  ;;  %v1642_v38 = vld [vmem:[#allocation2 + $0x129] sm:$0xff] }
 0x1cc   : > { %1890 = vrot.lane.b32.xlu0 %v1820_v40, %s5601_s8  ;;  %v1643_v40 = vld [vmem:[#allocation2 + $0x139] sm:$0xff] }
 0x1cd   : > { %v1337_v57 = vpop.permute.xlu1 %1336 }
 0x1ce   : > { %1414 = vst.msk [vmem:[#allocation3 + $0x98] sm:$0xff] %vm1394_vm6, %v1337_v57  ;;  %v1343_v59 = vpop.permute.xlu0 %1342 }
 0x1cf   : > { %1699 = vrot.lane.b32.xlu1 %v1628_v52, %s5600_s29  ;;  %1417 = vst.msk [vmem:[#allocation3 + $0xb0] sm:$0xff] %vm1394_vm6, %v1343_v59  ;;  %v1835_v52 = vld [vmem:[#allocation2 + $0x12a] sm:$0xff] }
 0x1d0   : > { %1701 = vrot.lane.b32.xlu0 %v1629_v55, %s5600_s29  ;;  %v1836_v55 = vld [vmem:[#allocation2 + $0x13a] sm:$0xff] }
 0x1d1   : > { %v1341_v61 = vpop.permute.xlu1 %1340 }
 0x1d2   : > { %1416 = vst.msk [vmem:[#allocation3 + $0xa8] sm:$0xff] %vm1394_vm6, %v1341_v61  ;;  %v1347_v1 = vpop.permute.xlu0 %1346 }
 0x1d3   : > { %1892 = vrot.lane.b32.xlu1 %v1821_v58, %s5601_s8  ;;  %1419 = vst.msk [vmem:[#allocation3 + $0xc0] sm:$0xff] %vm1394_vm6, %v1347_v1  ;;  %v1644_v58 = vld [vmem:[#allocation2 + $0x141] sm:$0xff] }
 0x1d4   : > { %1894 = vrot.lane.b32.xlu0 %v1822_v60, %s5601_s8  ;;  %v1645_v60 = vld [vmem:[#allocation2 + $0x151] sm:$0xff] }
 0x1d5   : > { %v1345_v3 = vpop.permute.xlu1 %1344 }
 0x1d6   : > { %1418 = vst.msk [vmem:[#allocation3 + $0xb8] sm:$0xff] %vm1394_vm6, %v1345_v3  ;;  %v1351_v5 = vpop.permute.xlu0 %1350 }
 0x1d7   : > { %1703 = vrot.lane.b32.xlu1 %v1630_v62, %s5600_s29  ;;  %1421 = vst.msk [vmem:[#allocation3 + $0xd0] sm:$0xff] %vm1394_vm6, %v1351_v5  ;;  %v1837_v62 = vld [vmem:[#allocation2 + $0x142] sm:$0xff] }
 0x1d8   : > { %1705 = vrot.lane.b32.xlu0 %v1631_v2, %s5600_s29  ;;  %v1838_v2 = vld [vmem:[#allocation2 + $0x152] sm:$0xff] }
 0x1d9   : > { %v1349_v7 = vpop.permute.xlu1 %1348 }
 0x1da   : > { %1420 = vst.msk [vmem:[#allocation3 + $0xc8] sm:$0xff] %vm1394_vm6, %v1349_v7  ;;  %v1355_v9 = vpop.permute.xlu0 %1354 }
 0x1db   : > { %1896 = vrot.lane.b32.xlu1 %v1823_v4, %s5601_s8  ;;  %1423 = vst.msk [vmem:[#allocation3 + $0xe0] sm:$0xff] %vm1394_vm6, %v1355_v9  ;;  %v1646_v4 = vld [vmem:[#allocation2 + $0x159] sm:$0xff] }
 0x1dc   : > { %1898 = vrot.lane.b32.xlu0 %v1824_v6, %s5601_s8  ;;  %v1647_v6 = vld [vmem:[#allocation2 + $0x169] sm:$0xff] }
 0x1dd   : > { %v1353_v12 = vpop.permute.xlu1 %1352 }
 0x1de   : > { %1422 = vst.msk [vmem:[#allocation3 + $0xd8] sm:$0xff] %vm1394_vm6, %v1353_v12  ;;  %v1359_v16 = vpop.permute.xlu0 %1358 }
 0x1df   : > { %1707 = vrot.lane.b32.xlu1 %v1632_v8, %s5600_s29  ;;  %1425 = vst.msk [vmem:[#allocation3 + $0xf0] sm:$0xff] %vm1394_vm6, %v1359_v16  ;;  %v1839_v8 = vld [vmem:[#allocation2 + $0x15a] sm:$0xff] }
 0x1e0   : > { %1709 = vrot.lane.b32.xlu0 %v1633_v10, %s5600_s29  ;;  %v1840_v10 = vld [vmem:[#allocation2 + $0x16a] sm:$0xff] }
 0x1e1   : > { %v1357_v20 = vpop.permute.xlu1 %1356 }
 0x1e2   : > { %1424 = vst.msk [vmem:[#allocation3 + $0xe8] sm:$0xff] %vm1394_vm6, %v1357_v20  ;;  %v1493_v41 = vpop.permute.xlu0 %1492 }
 0x1e3   : > { %1900 = vrot.lane.b32.xlu1 %v1825_v13, %s5601_s8  ;;  %1589 = vst.msk [vmem:[#allocation3] sm:$0xff] %vm1588_vm8, %v1493_v41  ;;  %v1648_v13 = vld [vmem:[#allocation2 + $0x171] sm:$0xff] }
 0x1e4   : > { %1902 = vrot.lane.b32.xlu0 %v1826_v17, %s5601_s8  ;;  %v1841_v41 = vld [vmem:[#allocation2 + $0x172] sm:$0xff] }
 0x1e5   : > { %v1361_v21 = vpop.permute.xlu1 %1360 }
 0x1e6   : > { %1426 = vst.msk [vmem:[#allocation3 + $0xf8] sm:$0xff] %vm1394_vm6, %v1361_v21  ;;  %v1497_v0 = vpop.permute.xlu0 %1496  ;;  %vm4219_vm6 = vcmask 588800  }
 0x1e7   : > { %1711 = vrot.lane.b32.xlu1 %v1634_v24, %s5600_s29  ;;  %1591 = vst.msk [vmem:[#allocation3 + $0x10] sm:$0xff] %vm1588_vm8, %v1497_v0 }
 0x1e8   : > { %1713 = vrot.lane.b32.xlu0 %v1635_v42, %s5600_s29 }
 0x1e9   : > { %v1495_v28 = vpop.permute.xlu1 %1494 }
 0x1ea   : > { %1590 = vst.msk [vmem:[#allocation3 + $0x8] sm:$0xff] %vm1588_vm8, %v1495_v28  ;;  %v1501_v47 = vpop.permute.xlu0 %1500 }
 0x1eb   : > { %1904 = vrot.lane.b32.xlu1 %v1827_v43, %s5601_s8  ;;  %1593 = vst.msk [vmem:[#allocation3 + $0x20] sm:$0xff] %vm1588_vm8, %v1501_v47 }
 0x1ec   : > { %1906 = vrot.lane.b32.xlu0 %v1828_v44, %s5601_s8 }
 0x1ed   : > { %v1499_v50 = vpop.permute.xlu1 %1498 }
 0x1ee   : > { %1592 = vst.msk [vmem:[#allocation3 + $0x18] sm:$0xff] %vm1588_vm8, %v1499_v50  ;;  %v1505_v56 = vpop.permute.xlu0 %1504 }
 0x1ef   : > { %1715 = vrot.lane.b32.xlu1 %v1636_v34, %s5600_s29  ;;  %1595 = vst.msk [vmem:[#allocation3 + $0x30] sm:$0xff] %vm1588_vm8, %v1505_v56 }
 0x1f0   : > { %1717 = vrot.lane.b32.xlu0 %v1637_v53, %s5600_s29 }
 0x1f1   : > { %v1503_v11 = vpop.permute.xlu1 %1502 }
 0x1f2   : > { %1594 = vst.msk [vmem:[#allocation3 + $0x28] sm:$0xff] %vm1588_vm8, %v1503_v11  ;;  %v1509_v15 = vpop.permute.xlu0 %1508 }
 0x1f3   : > { %1908 = vrot.lane.b32.xlu1 %v1829_v63, %s5601_s8  ;;  %1597 = vst.msk [vmem:[#allocation3 + $0x40] sm:$0xff] %vm1588_vm8, %v1509_v15 }
 0x1f4   : > { %1910 = vrot.lane.b32.xlu0 %v1830_v14, %s5601_s8 }
 0x1f5   : > { %v1507_v19 = vpop.permute.xlu1 %1506 }
 0x1f6   : > { %1596 = vst.msk [vmem:[#allocation3 + $0x38] sm:$0xff] %vm1588_vm8, %v1507_v19  ;;  %v1513_v35 = vpop.permute.xlu0 %1512 }
 0x1f7   : > { %1719 = vrot.lane.b32.xlu1 %v1638_v18, %s5600_s29  ;;  %1599 = vst.msk [vmem:[#allocation3 + $0x50] sm:$0xff] %vm1588_vm8, %v1513_v35 }
 0x1f8   : > { %1721 = vrot.lane.b32.xlu0 %v1639_v22, %s5600_s29 }
 0x1f9   : > { %v1511_v49 = vpop.permute.xlu1 %1510 }
 0x1fa   : > { %1598 = vst.msk [vmem:[#allocation3 + $0x48] sm:$0xff] %vm1588_vm8, %v1511_v49  ;;  %v1517_v33 = vpop.permute.xlu0 %1516 }
 0x1fb   : > { %1912 = vrot.lane.b32.xlu1 %v1831_v23, %s5601_s8  ;;  %1601 = vst.msk [vmem:[#allocation3 + $0x60] sm:$0xff] %vm1588_vm8, %v1517_v33 }
 0x1fc   : > { %1914 = vrot.lane.b32.xlu0 %v1832_v48, %s5601_s8 }
 0x1fd   : > { %v1515_v46 = vpop.permute.xlu1 %1514 }
 0x1fe   : > { %1600 = vst.msk [vmem:[#allocation3 + $0x58] sm:$0xff] %vm1588_vm8, %v1515_v46  ;;  %v1521_v30 = vpop.permute.xlu0 %1520 }
 0x1ff   : > { %1723 = vrot.lane.b32.xlu1 %v1640_v25, %s5600_s29  ;;  %1603 = vst.msk [vmem:[#allocation3 + $0x70] sm:$0xff] %vm1588_vm8, %v1521_v30 }
 0x200   : > { %1725 = vrot.lane.b32.xlu0 %v1641_v36, %s5600_s29 }
 0x201   : > { %v1519_v32 = vpop.permute.xlu1 %1518 }
 0x202   : > { %1602 = vst.msk [vmem:[#allocation3 + $0x68] sm:$0xff] %vm1588_vm8, %v1519_v32  ;;  %v1525_v39 = vpop.permute.xlu0 %1524 }
 0x203   : > { %1916 = vrot.lane.b32.xlu1 %v1833_v37, %s5601_s8  ;;  %1605 = vst.msk [vmem:[#allocation3 + $0x80] sm:$0xff] %vm1588_vm8, %v1525_v39 }
 0x204   : > { %1918 = vrot.lane.b32.xlu0 %v1834_v45, %s5601_s8 }
 0x205   : > { %v1523_v51 = vpop.permute.xlu1 %1522 }
 0x206   : > { %1604 = vst.msk [vmem:[#allocation3 + $0x78] sm:$0xff] %vm1588_vm8, %v1523_v51  ;;  %v1529_v54 = vpop.permute.xlu0 %1528 }
 0x207   : > { %1727 = vrot.lane.b32.xlu1 %v1642_v38, %s5600_s29  ;;  %1607 = vst.msk [vmem:[#allocation3 + $0x90] sm:$0xff] %vm1588_vm8, %v1529_v54 }
 0x208   : > { %1729 = vrot.lane.b32.xlu0 %v1643_v40, %s5600_s29 }
 0x209   : > { %v1527_v57 = vpop.permute.xlu1 %1526 }
 0x20a   : > { %1606 = vst.msk [vmem:[#allocation3 + $0x88] sm:$0xff] %vm1588_vm8, %v1527_v57  ;;  %v1533_v59 = vpop.permute.xlu0 %1532 }
 0x20b   : > { %1920 = vrot.lane.b32.xlu1 %v1835_v52, %s5601_s8  ;;  %1609 = vst.msk [vmem:[#allocation3 + $0xa0] sm:$0xff] %vm1588_vm8, %v1533_v59 }
 0x20c   : > { %1922 = vrot.lane.b32.xlu0 %v1836_v55, %s5601_s8 }
 0x20d   : > { %v1531_v61 = vpop.permute.xlu1 %1530 }
 0x20e   : > { %1608 = vst.msk [vmem:[#allocation3 + $0x98] sm:$0xff] %vm1588_vm8, %v1531_v61  ;;  %v1537_v1 = vpop.permute.xlu0 %1536 }
 0x20f   : > { %1731 = vrot.lane.b32.xlu1 %v1644_v58, %s5600_s29  ;;  %1611 = vst.msk [vmem:[#allocation3 + $0xb0] sm:$0xff] %vm1588_vm8, %v1537_v1 }
 0x210   : > { %1733 = vrot.lane.b32.xlu0 %v1645_v60, %s5600_s29 }
 0x211   : > { %v1535_v3 = vpop.permute.xlu1 %1534 }
 0x212   : > { %1610 = vst.msk [vmem:[#allocation3 + $0xa8] sm:$0xff] %vm1588_vm8, %v1535_v3  ;;  %v1541_v5 = vpop.permute.xlu0 %1540 }
 0x213   : > { %1924 = vrot.lane.b32.xlu1 %v1837_v62, %s5601_s8  ;;  %1613 = vst.msk [vmem:[#allocation3 + $0xc0] sm:$0xff] %vm1588_vm8, %v1541_v5 }
 0x214   : > { %1926 = vrot.lane.b32.xlu0 %v1838_v2, %s5601_s8 }
 0x215   : > { %v1539_v7 = vpop.permute.xlu1 %1538 }
 0x216   : > { %1612 = vst.msk [vmem:[#allocation3 + $0xb8] sm:$0xff] %vm1588_vm8, %v1539_v7  ;;  %v1545_v9 = vpop.permute.xlu0 %1544 }
 0x217   : > { %1735 = vrot.lane.b32.xlu1 %v1646_v4, %s5600_s29  ;;  %1615 = vst.msk [vmem:[#allocation3 + $0xd0] sm:$0xff] %vm1588_vm8, %v1545_v9 }
 0x218   : > { %1737 = vrot.lane.b32.xlu0 %v1647_v6, %s5600_s29 }
 0x219   : > { %v1543_v12 = vpop.permute.xlu1 %1542 }
 0x21a   : > { %1614 = vst.msk [vmem:[#allocation3 + $0xc8] sm:$0xff] %vm1588_vm8, %v1543_v12  ;;  %v1549_v16 = vpop.permute.xlu0 %1548 }
 0x21b   : > { %1928 = vrot.lane.b32.xlu1 %v1839_v8, %s5601_s8  ;;  %1617 = vst.msk [vmem:[#allocation3 + $0xe0] sm:$0xff] %vm1588_vm8, %v1549_v16 }
 0x21c   : > { %1930 = vrot.lane.b32.xlu0 %v1840_v10, %s5601_s8 }
 0x21d   : > { %v1547_v20 = vpop.permute.xlu1 %1546 }
 0x21e   : > { %1616 = vst.msk [vmem:[#allocation3 + $0xd8] sm:$0xff] %vm1588_vm8, %v1547_v20  ;;  %v1553_v17 = vpop.permute.xlu0 %1552 }
 0x21f   : > { %1739 = vrot.lane.b32.xlu1 %v1648_v13, %s5600_s29  ;;  %1619 = vst.msk [vmem:[#allocation3 + $0xf0] sm:$0xff] %vm1588_vm8, %v1553_v17 }
 0x220   : > { %1741 = vrot.lane.b32.xlu0 %v6434_v29, %s5600_s29 }
 0x221   : > { %v1551_v24 = vpop.permute.xlu1 %1550 }
 0x222   : > { %1618 = vst.msk [vmem:[#allocation3 + $0xe8] sm:$0xff] %vm1588_vm8, %v1551_v24  ;;  %v1686_v21 = vpop.permute.xlu0 %1685 }
 0x223   : > { %1932 = vrot.lane.b32.xlu1 %v1841_v41, %s5601_s8  ;;  %1782 = vst.msk [vmem:[#allocation3] sm:$0xff] %vm1781_vm9, %v1686_v21 }
 0x224   : > { %1934 = vrot.lane.b32.xlu0 %v6534_v26, %s5601_s8 }
 0x225   : > { %v1555_v42 = vpop.permute.xlu1 %1554 }
 0x226   : > { %1620 = vst.msk [vmem:[#allocation3 + $0xf8] sm:$0xff] %vm1588_vm8, %v1555_v42  ;;  %v1690_v0 = vpop.permute.xlu0 %1689  ;;  %vm4956_vm8 = vcmask 1045504  }
 0x227   : > { %1743 = vrot.lane.b32.xlu1 %v6444_v27, %s5600_s29  ;;  %1784 = vst.msk [vmem:[#allocation3 + $0x10] sm:$0xff] %vm1781_vm9, %v1690_v0 }
 0x229   : > { %v1688_v29 = vpop.permute.xlu1 %1687 }
 0x22a   : > { %1783 = vst.msk [vmem:[#allocation3 + $0x8] sm:$0xff] %vm1781_vm9, %v1688_v29  ;;  %v1694_v43 = vpop.permute.xlu0 %1693 }
 0x22b   : > { %1936 = vrot.lane.b32.xlu1 %v6544_v31, %s5601_s8  ;;  %1786 = vst.msk [vmem:[#allocation3 + $0x20] sm:$0xff] %vm1781_vm9, %v1694_v43  ;;  %v6847_v43 = vld [vmem:[#allocation2 + $0x1a1] sm:$0xff] }
 0x22d   : > { %v1692_v28 = vpop.permute.xlu1 %1691 }
 0x22e   : > { %1785 = vst.msk [vmem:[#allocation3 + $0x18] sm:$0xff] %vm1781_vm9, %v1692_v28  ;;  %v1879_v26 = vpop.permute.xlu0 %1878 }
 0x22f   : > { %1975 = vst.msk [vmem:[#allocation3] sm:$0xff] %vm1974_vm10, %v1879_v26  ;;  %v8503_v26 = vmov 0.0   ;;  %1747 = vrot.lane.b32.xlu1 %v6847_v43, %s5600_s29 }
 0x230   : > { %2486 = vst.msk [vmem:[#allocation4 + $0x20] sm:$0xff] %vm2480_vm12, %v8503_v26  ;;  %2481 = vst.msk [vmem:[#allocation4] sm:$0xff] %vm2480_vm12, %v8503_v26 }
 0x231   : > { %v1696_v27 = vpop.permute.xlu1 %1695  ;;  %2487 = vst.msk [vmem:[#allocation4 + $0x28] sm:$0x3] %vm2483_vm13, %v8503_v26  ;;  %2484 = vst.msk [vmem:[#allocation4 + $0x10] sm:$0x3] %vm2483_vm13, %v8503_v26 }
 0x232   : > { %1787 = vst.msk [vmem:[#allocation3 + $0x28] sm:$0xff] %vm1781_vm9, %v1696_v27  ;;  %v1883_v44 = vpop.permute.xlu0 %1882  ;;  %v1651_v27 = vld [vmem:[#allocation2 + $0x199] sm:$0xff] }
 0x233   : > { %1977 = vst.msk [vmem:[#allocation3 + $0x10] sm:$0xff] %vm1974_vm10, %v1883_v44  ;;  %1745 = vrot.lane.b32.xlu0 %v1651_v27, %s5600_s29 }
 0x234   : > { %2482 = vst.msk [vmem:[#allocation4 + $0x8] sm:$0xff] %vm2480_vm12, %v8503_v26  ;;  %2485 = vst.msk [vmem:[#allocation4 + $0x18] sm:$0xff] %vm2480_vm12, %v8503_v26 }
 0x235   : > { %v1881_v47 = vpop.permute.xlu1 %1880  ;;  %2488 = vst.msk [vmem:[#allocation4 + $0x30] sm:$0xff] %vm2480_vm12, %v8503_v26  ;;  %2489 = vst.msk [vmem:[#allocation4 + $0x38] sm:$0xff] %vm2480_vm12, %v8503_v26 }
 0x236   : > { %1976 = vst.msk [vmem:[#allocation3 + $0x8] sm:$0xff] %vm1974_vm10, %v1881_v47  ;;  %v1887_v31 = vpop.permute.xlu0 %1886  ;;  %v2007_v34 = vld [vmem:[#allocation3] sm:$0xff]  ;;  %v1845_v47 = vld [vmem:[#allocation2 + $0x1a2] sm:$0xff] }
 0x237   : > { %1979 = vst.msk [vmem:[#allocation3 + $0x20] sm:$0xff] %vm1974_vm10, %v1887_v31  ;;  %5344 = vmatprep.mubr.msk.f32.mxu0 %vm2044_vm11, %v2007_v34  ;;  %1940 = vrot.lane.b32.xlu1 %v1845_v47, %s5601_s8 }
 0x238   : > { %2490 = vst.msk [vmem:[#allocation4 + $0x40] sm:$0x3] %vm2483_vm13, %v8503_v26  ;;  %2493 = vst.msk [vmem:[#allocation4 + $0x58] sm:$0x3] %vm2483_vm13, %v8503_v26 }
 0x239   : > { %v1885_v50 = vpop.permute.xlu1 %1884  ;;  %2491 = vst.msk [vmem:[#allocation4 + $0x48] sm:$0xff] %vm2480_vm12, %v8503_v26  ;;  %2492 = vst.msk [vmem:[#allocation4 + $0x50] sm:$0xff] %vm2480_vm12, %v8503_v26 }
 0x23a   : > { %1978 = vst.msk [vmem:[#allocation3 + $0x18] sm:$0xff] %vm1974_vm10, %v1885_v50  ;;  %v1698_v53 = vpop.permute.xlu0 %1697  ;;  %v2009_v56 = vld [vmem:[#allocation3 + $0x10] sm:$0xff] }
 0x23b   : > { %1788 = vst.msk [vmem:[#allocation3 + $0x30] sm:$0xff] %vm1781_vm9, %v1698_v53  ;;  %v1844_v50 = vld [vmem:[#allocation2 + $0x19a] sm:$0xff] }
 0x23c   : > { %2494 = vst.msk [vmem:[#allocation4 + $0x60] sm:$0xff] %vm2480_vm12, %v8503_v26  ;;  %2495 = vst.msk [vmem:[#allocation4 + $0x68] sm:$0xff] %vm2480_vm12, %v8503_v26  ;;  %1938 = vrot.lane.b32.xlu0 %v1844_v50, %s5601_s8 }
 0x23d   : > { %v1889_v63 = vpop.permute.xlu1 %1888  ;;  %v2008_v11 = vld [vmem:[#allocation3 + $0x8] sm:$0xff]  ;;  %2496 = vst.msk [vmem:[#allocation4 + $0x70] sm:$0x3] %vm2483_vm13, %v8503_v26  ;;  %2499 = vst.msk [vmem:[#allocation4 + $0x88] sm:$0x3] %vm2483_vm13, %v8503_v26 }
 0x23e   : > { %1980 = vst.msk [vmem:[#allocation3 + $0x28] sm:$0xff] %vm1974_vm10, %v1889_v63  ;;  %5345 = vmatmul.mubr.msk.f32.vlgmr.msra.gmra.mxu0 %vm2044_vm11, %v2008_v11  ;;  %v1891_v14 = vpop.permute.xlu0 %1890  ;;  %v2011_v15 = vld [vmem:[#allocation3 + $0x20] sm:$0xff]  ;;  %v2634_v63 = vld [vmem:[#allocation4 + $0x9] sm:$0xff] }
 0x23f   : > { %5347 = vmatprep.mubr.msk.f32.mxu0 %vm2044_vm11, %v2009_v56  ;;  %1981 = vst.msk [vmem:[#allocation3 + $0x30] sm:$0xff] %vm1974_vm10, %v1891_v14  ;;  %2699 = vrot.lane.b32.xlu1 %v2634_v63, %s5595_s19  ;;  %v2633_v14 = vld [vmem:[#allocation4 + $0x1] sm:$0xff] }
 0x240   : > { %2497 = vst.msk [vmem:[#allocation4 + $0x78] sm:$0xff] %vm2480_vm12, %v8503_v26  ;;  %2498 = vst.msk [vmem:[#allocation4 + $0x80] sm:$0xff] %vm2480_vm12, %v8503_v26  ;;  %2697 = vrot.lane.b32.xlu0 %v2633_v14, %s5595_s19 }
 0x241   : > { %v1700_v18 = vpop.permute.xlu1 %1699  ;;  %v2010_v19 = vld [vmem:[#allocation3 + $0x18] sm:$0xff]  ;;  %2500 = vst.msk [vmem:[#allocation4 + $0x90] sm:$0xff] %vm2480_vm12, %v8503_v26  ;;  %2501 = vst.msk [vmem:[#allocation4 + $0x98] sm:$0xff] %vm2480_vm12, %v8503_v26 }
 0x242   : > { %1789 = vst.msk [vmem:[#allocation3 + $0x38] sm:$0xff] %vm1781_vm9, %v1700_v18  ;;  %5348 = vmatmul.mubr.msk.f32.gmra.mxu0 %vm2044_vm11, %v2010_v19  ;;  %v1702_v22 = vpop.permute.xlu0 %1701 }
 0x243   : > { %5350 = vmatprep.mubr.msk.f32.mxu0 %vm2044_vm11, %v2011_v15  ;;  %1790 = vst.msk [vmem:[#allocation3 + $0x40] sm:$0xff] %vm1781_vm9, %v1702_v22 }
 0x244   : > { %2502 = vst.msk [vmem:[#allocation4 + $0xa0] sm:$0x3] %vm2483_vm13, %v8503_v26  ;;  %2505 = vst.msk [vmem:[#allocation4 + $0xb8] sm:$0x3] %vm2483_vm13, %v8503_v26 }
 0x245   : > { %v1893_v35 = vpop.permute.xlu1 %1892  ;;  %v2012_v23 = vld [vmem:[#allocation3 + $0x28] sm:$0xff]  ;;  %2503 = vst.msk [vmem:[#allocation4 + $0xa8] sm:$0xff] %vm2480_vm12, %v8503_v26  ;;  %2504 = vst.msk [vmem:[#allocation4 + $0xb0] sm:$0xff] %vm2480_vm12, %v8503_v26 }
 0x246   : > { %1982 = vst.msk [vmem:[#allocation3 + $0x38] sm:$0xff] %vm1974_vm10, %v1893_v35  ;;  %5351 = vmatmul.mubr.msk.f32.gmra.mxu0 %vm2044_vm11, %v2012_v23  ;;  %v1895_v49 = vpop.permute.xlu0 %1894  ;;  %v2013_v48 = vld [vmem:[#allocation3 + $0x30] sm:$0xff] }
 0x247   : > { %1983 = vst.msk [vmem:[#allocation3 + $0x40] sm:$0xff] %vm1974_vm10, %v1895_v49  ;;  %5353 = vmatprep.mubr.msk.f32.mxu0 %vm2044_vm11, %v2013_v48 }
 0x248   : > { %2506 = vst.msk [vmem:[#allocation4 + $0xc0] sm:$0xff] %vm2480_vm12, %v8503_v26  ;;  %2507 = vst.msk [vmem:[#allocation4 + $0xc8] sm:$0xff] %vm2480_vm12, %v8503_v26 }
 0x249   : > { %v1704_v33 = vpop.permute.xlu1 %1703  ;;  %2508 = vst.msk [vmem:[#allocation4 + $0xd0] sm:$0x3] %vm2483_vm13, %v8503_v26  ;;  %2511 = vst.msk [vmem:[#allocation4 + $0xe8] sm:$0x3] %vm2483_vm13, %v8503_v26 }
 0x24a   : > { %1791 = vst.msk [vmem:[#allocation3 + $0x48] sm:$0xff] %vm1781_vm9, %v1704_v33  ;;  %v1706_v25 = vpop.permute.xlu0 %1705 }
 0x24b   : > { %1792 = vst.msk [vmem:[#allocation3 + $0x50] sm:$0xff] %vm1781_vm9, %v1706_v25 }
 0x24c   : > { %2509 = vst.msk [vmem:[#allocation4 + $0xd8] sm:$0xff] %vm2480_vm12, %v8503_v26  ;;  %2510 = vst.msk [vmem:[#allocation4 + $0xe0] sm:$0xff] %vm2480_vm12, %v8503_v26 }
 0x24d   : > { %v1897_v46 = vpop.permute.xlu1 %1896  ;;  %v2014_v36 = vld [vmem:[#allocation3 + $0x38] sm:$0xff]  ;;  %2512 = vst.msk [vmem:[#allocation4 + $0xf0] sm:$0xff] %vm2480_vm12, %v8503_v26  ;;  %2513 = vst.msk [vmem:[#allocation4 + $0xf8] sm:$0xff] %vm2480_vm12, %v8503_v26 }
 0x24e   : > { %1984 = vst.msk [vmem:[#allocation3 + $0x48] sm:$0xff] %vm1974_vm10, %v1897_v46  ;;  %5354 = vmatmul.mubr.msk.f32.gmra.mxu0 %vm2044_vm11, %v2014_v36  ;;  %v1899_v30 = vpop.permute.xlu0 %1898  ;;  %v2015_v37 = vld [vmem:[#allocation3 + $0x40] sm:$0xff] }
 0x24f   : > { %1985 = vst.msk [vmem:[#allocation3 + $0x50] sm:$0xff] %vm1974_vm10, %v1899_v30  ;;  %5356 = vmatprep.mubr.msk.f32.mxu0 %vm2044_vm11, %v2015_v37 }
 0x250   : > { %2514 = vst.msk [vmem:[#allocation4 + $0x100] sm:$0x3] %vm2483_vm13, %v8503_v26  ;;  %2517 = vst.msk [vmem:[#allocation4 + $0x118] sm:$0x3] %vm2483_vm13, %v8503_v26 }
 0x251   : > { %v1708_v32 = vpop.permute.xlu1 %1707  ;;  %2515 = vst.msk [vmem:[#allocation4 + $0x108] sm:$0xff] %vm2480_vm12, %v8503_v26  ;;  %2516 = vst.msk [vmem:[#allocation4 + $0x110] sm:$0xff] %vm2480_vm12, %v8503_v26 }
 0x252   : > { %1793 = vst.msk [vmem:[#allocation3 + $0x58] sm:$0xff] %vm1781_vm9, %v1708_v32  ;;  %v1710_v45 = vpop.permute.xlu0 %1709 }
 0x253   : > { %1794 = vst.msk [vmem:[#allocation3 + $0x60] sm:$0xff] %vm1781_vm9, %v1710_v45 }
 0x254   : > { %2518 = vst.msk [vmem:[#allocation4 + $0x120] sm:$0xff] %vm2480_vm12, %v8503_v26  ;;  %2519 = vst.msk [vmem:[#allocation4 + $0x128] sm:$0xff] %vm2480_vm12, %v8503_v26 }
 0x255   : > { %v1901_v39 = vpop.permute.xlu1 %1900  ;;  %v2016_v38 = vld [vmem:[#allocation3 + $0x48] sm:$0xff]  ;;  %2520 = vst.msk [vmem:[#allocation4 + $0x130] sm:$0x3] %vm2483_vm13, %v8503_v26  ;;  %2523 = vst.msk [vmem:[#allocation4 + $0x148] sm:$0x3] %vm2483_vm13, %v8503_v26 }
 0x256   : > { %1986 = vst.msk [vmem:[#allocation3 + $0x58] sm:$0xff] %vm1974_vm10, %v1901_v39  ;;  %5357 = vmatmul.mubr.msk.f32.gmra.mxu0 %vm2044_vm11, %v2016_v38  ;;  %v1903_v51 = vpop.permute.xlu0 %1902  ;;  %v2017_v40 = vld [vmem:[#allocation3 + $0x50] sm:$0xff] }
 0x257   : > { %1987 = vst.msk [vmem:[#allocation3 + $0x60] sm:$0xff] %vm1974_vm10, %v1903_v51  ;;  %5359 = vmatprep.mubr.msk.f32.mxu0 %vm2044_vm11, %v2017_v40 }
 0x258   : > { %2521 = vst.msk [vmem:[#allocation4 + $0x138] sm:$0xff] %vm2480_vm12, %v8503_v26  ;;  %2522 = vst.msk [vmem:[#allocation4 + $0x140] sm:$0xff] %vm2480_vm12, %v8503_v26 }
 0x259   : > { %v1712_v54 = vpop.permute.xlu1 %1711  ;;  %2524 = vst.msk [vmem:[#allocation4 + $0x150] sm:$0xff] %vm2480_vm12, %v8503_v26  ;;  %2525 = vst.msk [vmem:[#allocation4 + $0x158] sm:$0xff] %vm2480_vm12, %v8503_v26 }
 0x25a   : > { %1795 = vst.msk [vmem:[#allocation3 + $0x68] sm:$0xff] %vm1781_vm9, %v1712_v54  ;;  %v1714_v52 = vpop.permute.xlu0 %1713  ;;  %v2570_v54 = vld [vmem:[#allocation4 + $0x8] sm:$0xff] }
 0x25b   : > { %1796 = vst.msk [vmem:[#allocation3 + $0x70] sm:$0xff] %vm1781_vm9, %v1714_v52 }
 0x25c   : > { %2526 = vst.msk [vmem:[#allocation4 + $0x160] sm:$0x3] %vm2483_vm13, %v8503_v26  ;;  %2529 = vst.msk [vmem:[#allocation4 + $0x178] sm:$0x3] %vm2483_vm13, %v8503_v26 }
 0x25d   : > { %v1905_v57 = vpop.permute.xlu1 %1904  ;;  %v2018_v55 = vld [vmem:[#allocation3 + $0x58] sm:$0xff]  ;;  %2527 = vst.msk [vmem:[#allocation4 + $0x168] sm:$0xff] %vm2480_vm12, %v8503_v26  ;;  %2528 = vst.msk [vmem:[#allocation4 + $0x170] sm:$0xff] %vm2480_vm12, %v8503_v26 }
 0x25e   : > { %1988 = vst.msk [vmem:[#allocation3 + $0x68] sm:$0xff] %vm1974_vm10, %v1905_v57  ;;  %5360 = vmatmul.mubr.msk.f32.gmra.mxu0 %vm2044_vm11, %v2018_v55  ;;  %v1907_v59 = vpop.permute.xlu0 %1906  ;;  %v2019_v58 = vld [vmem:[#allocation3 + $0x60] sm:$0xff]  ;;  %v7100_v55 = vld [vmem:[%s8403_s2] ss:$0 sm:$0xff] }
 0x25f   : > { %1989 = vst.msk [vmem:[#allocation3 + $0x70] sm:$0xff] %vm1974_vm10, %v1907_v59  ;;  %5362 = vmatprep.mubr.msk.f32.mxu0 %vm2044_vm11, %v2019_v58  ;;  %v2569_v57 = vld [vmem:[#allocation4] sm:$0xff] }
 0x260   : > { %2530 = vst.msk [vmem:[#allocation4 + $0x180] sm:$0xff] %vm2480_vm12, %v8503_v26  ;;  %2531 = vst.msk [vmem:[#allocation4 + $0x188] sm:$0xff] %vm2480_vm12, %v8503_v26 }
 0x261   : > { %v1716_v61 = vpop.permute.xlu1 %1715  ;;  %2532 = vst.msk [vmem:[#allocation4 + $0x190] sm:$0x3] %vm2483_vm13, %v8503_v26  ;;  %2535 = vst.msk [vmem:[#allocation4 + $0x1a8] sm:$0x3] %vm2483_vm13, %v8503_v26 }
 0x262   : > { %1797 = vst.msk [vmem:[#allocation3 + $0x78] sm:$0xff] %vm1781_vm9, %v1716_v61  ;;  %v1718_v60 = vpop.permute.xlu0 %1717  ;;  %v7107_v61 = vld [vmem:[%s8404_s3] ss:$0 sm:$0xff] }
 0x263   : > { %1798 = vst.msk [vmem:[#allocation3 + $0x80] sm:$0xff] %vm1781_vm9, %v1718_v60 }
 0x264   : > { %2533 = vst.msk [vmem:[#allocation4 + $0x198] sm:$0xff] %vm2480_vm12, %v8503_v26  ;;  %2534 = vst.msk [vmem:[#allocation4 + $0x1a0] sm:$0xff] %vm2480_vm12, %v8503_v26 }
 0x265   : > { %v1909_v1 = vpop.permute.xlu1 %1908  ;;  %v2020_v62 = vld [vmem:[#allocation3 + $0x68] sm:$0xff]  ;;  %4651 = vst.msk [vmem:[#allocation6] sm:$0xff] %vm2480_vm12, %v8503_v26  ;;  %4652 = vst.msk [vmem:[#allocation6 + $0x8] sm:$0xff] %vm2480_vm12, %v8503_v26 }
 0x266   : > { %1990 = vst.msk [vmem:[#allocation3 + $0x78] sm:$0xff] %vm1974_vm10, %v1909_v1  ;;  %5363 = vmatmul.mubr.msk.f32.gmra.mxu0 %vm2044_vm11, %v2020_v62  ;;  %v1911_v3 = vpop.permute.xlu0 %1910  ;;  %v2021_v2 = vld [vmem:[#allocation3 + $0x70] sm:$0xff] }
 0x267   : > { %1991 = vst.msk [vmem:[#allocation3 + $0x80] sm:$0xff] %vm1974_vm10, %v1911_v3  ;;  %5365 = vmatprep.mubr.msk.f32.mxu0 %vm2044_vm11, %v2021_v2 }
 0x268   : > { %4653 = vst.msk [vmem:[#allocation6 + $0x10] sm:$0x3] %vm2483_vm13, %v8503_v26  ;;  %4656 = vst.msk [vmem:[#allocation6 + $0x28] sm:$0x3] %vm2483_vm13, %v8503_v26 }
 0x269   : > { %v1720_v5 = vpop.permute.xlu1 %1719  ;;  %4654 = vst.msk [vmem:[#allocation6 + $0x18] sm:$0xff] %vm2480_vm12, %v8503_v26  ;;  %4655 = vst.msk [vmem:[#allocation6 + $0x20] sm:$0xff] %vm2480_vm12, %v8503_v26 }
 0x26a   : > { %1799 = vst.msk [vmem:[#allocation3 + $0x88] sm:$0xff] %vm1781_vm9, %v1720_v5  ;;  %v1722_v4 = vpop.permute.xlu0 %1721 }
 0x26b   : > { %1800 = vst.msk [vmem:[#allocation3 + $0x90] sm:$0xff] %vm1781_vm9, %v1722_v4 }
 0x26c   : > { %4657 = vst.msk [vmem:[#allocation6 + $0x30] sm:$0xff] %vm2480_vm12, %v8503_v26  ;;  %4658 = vst.msk [vmem:[#allocation6 + $0x38] sm:$0xff] %vm2480_vm12, %v8503_v26 }
 0x26d   : > { %v1913_v7 = vpop.permute.xlu1 %1912  ;;  %v2022_v6 = vld [vmem:[#allocation3 + $0x78] sm:$0xff]  ;;  %4659 = vst.msk [vmem:[#allocation6 + $0x40] sm:$0x3] %vm2483_vm13, %v8503_v26  ;;  %4662 = vst.msk [vmem:[#allocation6 + $0x58] sm:$0x3] %vm2483_vm13, %v8503_v26 }
 0x26e   : > { %1992 = vst.msk [vmem:[#allocation3 + $0x88] sm:$0xff] %vm1974_vm10, %v1913_v7  ;;  %5366 = vmatmul.mubr.msk.f32.gmra.mxu0 %vm2044_vm11, %v2022_v6  ;;  %v1915_v9 = vpop.permute.xlu0 %1914  ;;  %v2023_v8 = vld [vmem:[#allocation3 + $0x80] sm:$0xff] }
 0x26f   : > { %1993 = vst.msk [vmem:[#allocation3 + $0x90] sm:$0xff] %vm1974_vm10, %v1915_v9  ;;  %5368 = vmatprep.mubr.msk.f32.mxu0 %vm2044_vm11, %v2023_v8 }
 0x270   : > { %4660 = vst.msk [vmem:[#allocation6 + $0x48] sm:$0xff] %vm2480_vm12, %v8503_v26  ;;  %4661 = vst.msk [vmem:[#allocation6 + $0x50] sm:$0xff] %vm2480_vm12, %v8503_v26 }
 0x271   : > { %v1724_v12 = vpop.permute.xlu1 %1723  ;;  %4663 = vst.msk [vmem:[#allocation6 + $0x60] sm:$0xff] %vm2480_vm12, %v8503_v26  ;;  %4664 = vst.msk [vmem:[#allocation6 + $0x68] sm:$0xff] %vm2480_vm12, %v8503_v26 }
 0x272   : > { %1801 = vst.msk [vmem:[#allocation3 + $0x98] sm:$0xff] %vm1781_vm9, %v1724_v12  ;;  %v1726_v10 = vpop.permute.xlu0 %1725 }
 0x273   : > { %1802 = vst.msk [vmem:[#allocation3 + $0xa0] sm:$0xff] %vm1781_vm9, %v1726_v10 }
 0x274   : > { %4665 = vst.msk [vmem:[#allocation6 + $0x70] sm:$0x3] %vm2483_vm13, %v8503_v26  ;;  %4668 = vst.msk [vmem:[#allocation6 + $0x88] sm:$0x3] %vm2483_vm13, %v8503_v26 }
 0x275   : > { %v1917_v16 = vpop.permute.xlu1 %1916  ;;  %v2024_v13 = vld [vmem:[#allocation3 + $0x88] sm:$0xff]  ;;  %4666 = vst.msk [vmem:[#allocation6 + $0x78] sm:$0xff] %vm2480_vm12, %v8503_v26  ;;  %4667 = vst.msk [vmem:[#allocation6 + $0x80] sm:$0xff] %vm2480_vm12, %v8503_v26 }
 0x276   : > { %1994 = vst.msk [vmem:[#allocation3 + $0x98] sm:$0xff] %vm1974_vm10, %v1917_v16  ;;  %5369 = vmatmul.mubr.msk.f32.gmra.mxu0 %vm2044_vm11, %v2024_v13  ;;  %v1919_v20 = vpop.permute.xlu0 %1918  ;;  %v2025_v17 = vld [vmem:[#allocation3 + $0x90] sm:$0xff] }
 0x277   : > { %1995 = vst.msk [vmem:[#allocation3 + $0xa0] sm:$0xff] %vm1974_vm10, %v1919_v20  ;;  %5371 = vmatprep.mubr.msk.f32.mxu0 %vm2044_vm11, %v2025_v17 }
 0x278   : > { %4669 = vst.msk [vmem:[#allocation6 + $0x90] sm:$0xff] %vm2480_vm12, %v8503_v26  ;;  %4670 = vst.msk [vmem:[#allocation6 + $0x98] sm:$0xff] %vm2480_vm12, %v8503_v26 }
 0x279   : > { %v1728_v41 = vpop.permute.xlu1 %1727  ;;  %4671 = vst.msk [vmem:[#allocation6 + $0xa0] sm:$0x3] %vm2483_vm13, %v8503_v26  ;;  %4674 = vst.msk [vmem:[#allocation6 + $0xb8] sm:$0x3] %vm2483_vm13, %v8503_v26 }
 0x27a   : > { %1803 = vst.msk [vmem:[#allocation3 + $0xa8] sm:$0xff] %vm1781_vm9, %v1728_v41  ;;  %v1730_v24 = vpop.permute.xlu0 %1729 }
 0x27b   : > { %1804 = vst.msk [vmem:[#allocation3 + $0xb0] sm:$0xff] %vm1781_vm9, %v1730_v24 }
 0x27c   : > { %4672 = vst.msk [vmem:[#allocation6 + $0xa8] sm:$0xff] %vm2480_vm12, %v8503_v26  ;;  %4673 = vst.msk [vmem:[#allocation6 + $0xb0] sm:$0xff] %vm2480_vm12, %v8503_v26 }
 0x27d   : > { %v1921_v21 = vpop.permute.xlu1 %1920  ;;  %v2026_v42 = vld [vmem:[#allocation3 + $0x98] sm:$0xff]  ;;  %4675 = vst.msk [vmem:[#allocation6 + $0xc0] sm:$0xff] %vm2480_vm12, %v8503_v26  ;;  %4676 = vst.msk [vmem:[#allocation6 + $0xc8] sm:$0xff] %vm2480_vm12, %v8503_v26 }
 0x27e   : > { %1996 = vst.msk [vmem:[#allocation3 + $0xa8] sm:$0xff] %vm1974_vm10, %v1921_v21  ;;  %5372 = vmatmul.mubr.msk.f32.gmra.mxu0 %vm2044_vm11, %v2026_v42  ;;  %v1923_v0 = vpop.permute.xlu0 %1922  ;;  %v2027_v29 = vld [vmem:[#allocation3 + $0xa0] sm:$0xff] }
 0x27f   : > { %1997 = vst.msk [vmem:[#allocation3 + $0xb0] sm:$0xff] %vm1974_vm10, %v1923_v0  ;;  %5374 = vmatprep.mubr.msk.f32.mxu0 %vm2044_vm11, %v2027_v29 }
 0x280   : > { %4677 = vst.msk [vmem:[#allocation6 + $0xd0] sm:$0x3] %vm2483_vm13, %v8503_v26  ;;  %4680 = vst.msk [vmem:[#allocation6 + $0xe8] sm:$0x3] %vm2483_vm13, %v8503_v26 }
 0x281   : > { %v6849_v28 = vpop.permute.xlu1 %1731  ;;  %4678 = vst.msk [vmem:[#allocation6 + $0xd8] sm:$0xff] %vm2480_vm12, %v8503_v26  ;;  %4679 = vst.msk [vmem:[#allocation6 + $0xe0] sm:$0xff] %vm2480_vm12, %v8503_v26 }
 0x282   : > { %4681 = vst.msk [vmem:[#allocation6 + $0xf0] sm:$0xff] %vm2480_vm12, %v8503_v26  ;;  %4682 = vst.msk [vmem:[#allocation6 + $0xf8] sm:$0xff] %vm2480_vm12, %v8503_v26  ;;  %v1734_v44 = vpop.permute.xlu0 %1733 }
 0x283   : > { %4683 = vst.msk [vmem:[#allocation6 + $0x100] sm:$0x3] %vm2483_vm13, %v8503_v26  ;;  %4686 = vst.msk [vmem:[#allocation6 + $0x118] sm:$0x3] %vm2483_vm13, %v8503_v26 }
 0x284   : > { %4684 = vst.msk [vmem:[#allocation6 + $0x108] sm:$0xff] %vm2480_vm12, %v8503_v26  ;;  %4685 = vst.msk [vmem:[#allocation6 + $0x110] sm:$0xff] %vm2480_vm12, %v8503_v26 }
 0x285   : > { %4687 = vst.msk [vmem:[#allocation6 + $0x120] sm:$0xff] %vm2480_vm12, %v8503_v26  ;;  %4688 = vst.msk [vmem:[#allocation6 + $0x128] sm:$0xff] %vm2480_vm12, %v8503_v26  ;;  %v1925_v31 = vpop.permute.xlu1 %1924  ;;  %v2028_v34 = vld [vmem:[#allocation3 + $0xa8] sm:$0xff] }
 0x286   : > { %4689 = vst.msk [vmem:[#allocation6 + $0x130] sm:$0x3] %vm2483_vm13, %v8503_v26  ;;  %4692 = vst.msk [vmem:[#allocation6 + $0x148] sm:$0x3] %vm2483_vm13, %v8503_v26  ;;  %5375 = vmatmul.mubr.msk.f32.gmra.mxu0 %vm2044_vm11, %v2028_v34  ;;  %v1927_v53 = vpop.permute.xlu0 %1926  ;;  %v2029_v56 = vld [vmem:[#allocation3 + $0xb0] sm:$0xff] }
 0x287   : > { %4690 = vst.msk [vmem:[#allocation6 + $0x138] sm:$0xff] %vm2480_vm12, %v8503_v26  ;;  %4691 = vst.msk [vmem:[#allocation6 + $0x140] sm:$0xff] %vm2480_vm12, %v8503_v26  ;;  %5377 = vmatprep.mubr.msk.f32.mxu0 %vm2044_vm11, %v2029_v56 }
 0x288   : > { %4693 = vst.msk [vmem:[#allocation6 + $0x150] sm:$0xff] %vm2480_vm12, %v8503_v26  ;;  %4694 = vst.msk [vmem:[#allocation6 + $0x158] sm:$0xff] %vm2480_vm12, %v8503_v26 }
 0x289   : > { %4695 = vst.msk [vmem:[#allocation6 + $0x160] sm:$0x3] %vm2483_vm13, %v8503_v26  ;;  %4698 = vst.msk [vmem:[#allocation6 + $0x178] sm:$0x3] %vm2483_vm13, %v8503_v26  ;;  %v1736_v11 = vpop.permute.xlu1 %1735 }
 0x28a   : > { %4696 = vst.msk [vmem:[#allocation6 + $0x168] sm:$0xff] %vm2480_vm12, %v8503_v26  ;;  %4697 = vst.msk [vmem:[#allocation6 + $0x170] sm:$0xff] %vm2480_vm12, %v8503_v26  ;;  %v1738_v15 = vpop.permute.xlu0 %1737 }
 0x28b   : > { %4699 = vst.msk [vmem:[#allocation6 + $0x180] sm:$0xff] %vm2480_vm12, %v8503_v26  ;;  %4700 = vst.msk [vmem:[#allocation6 + $0x188] sm:$0xff] %vm2480_vm12, %v8503_v26 }
 0x28c   : > { %4701 = vst.msk [vmem:[#allocation6 + $0x190] sm:$0x3] %vm2483_vm13, %v8503_v26  ;;  %vm5056_vm13 = vcmask 63494  }
 0x28d   : > { %1805 = vst.msk [vmem:[#allocation3 + $0xb8] sm:$0xff] %vm1781_vm9, %v6849_v28  ;;  %1806 = vst.msk [vmem:[#allocation3 + $0xc0] sm:$0xff] %vm1781_vm9, %v1734_v44  ;;  %v1929_v18 = vpop.permute.xlu1 %1928 }
 0x28e   : > { %1998 = vst.msk [vmem:[#allocation3 + $0xb8] sm:$0xff] %vm1974_vm10, %v1925_v31  ;;  %1999 = vst.msk [vmem:[#allocation3 + $0xc0] sm:$0xff] %vm1974_vm10, %v1927_v53  ;;  %v1931_v22 = vpop.permute.xlu0 %1930 }
 0x28f   : > { %1807 = vst.msk [vmem:[#allocation3 + $0xc8] sm:$0xff] %vm1781_vm9, %v1736_v11  ;;  %1808 = vst.msk [vmem:[#allocation3 + $0xd0] sm:$0xff] %vm1781_vm9, %v1738_v15 }
 0x290   : > { %2000 = vst.msk [vmem:[#allocation3 + $0xc8] sm:$0xff] %vm1974_vm10, %v1929_v18  ;;  %2001 = vst.msk [vmem:[#allocation3 + $0xd0] sm:$0xff] %vm1974_vm10, %v1931_v22 }
 0x291   : > { %v1740_v23 = vpop.permute.xlu1 %1739  ;;  %2602 = vst.msk [vmem:[#allocation5 + $0x8] sm:$0xff] %vm2480_vm12, %v2570_v54  ;;  %2601 = vst.msk [vmem:[#allocation5] sm:$0xff] %vm2480_vm12, %v2569_v57 }
 0x292   : > { %1809 = vst.msk [vmem:[#allocation3 + $0xd8] sm:$0xff] %vm1781_vm9, %v1740_v23  ;;  %v1742_v49 = vpop.permute.xlu0 %1741 }
 0x293   : > { %1810 = vst.msk [vmem:[#allocation3 + $0xe0] sm:$0xff] %vm1781_vm9, %v1742_v49 }
 0x295   : > { %v2030_v19 = vld [vmem:[#allocation3 + $0xb8] sm:$0xff]  ;;  %v2031_v35 = vld [vmem:[#allocation3 + $0xc0] sm:$0xff]  ;;  %v1933_v48 = vpop.permute.xlu1 %1932 }
 0x296   : > { %5378 = vmatmul.mubr.msk.f32.gmra.mxu0 %vm2044_vm11, %v2030_v19  ;;  %2002 = vst.msk [vmem:[#allocation3 + $0xd8] sm:$0xff] %vm1974_vm10, %v1933_v48  ;;  %v1935_v25 = vpop.permute.xlu0 %1934 }
 0x297   : > { %5380 = vmatprep.mubr.msk.f32.mxu0 %vm2044_vm11, %v2031_v35  ;;  %v2032_v33 = vld [vmem:[#allocation3 + $0xc8] sm:$0xff]  ;;  %v2033_v46 = vld [vmem:[#allocation3 + $0xd0] sm:$0xff]  ;;  %2003 = vst.msk [vmem:[#allocation3 + $0xe0] sm:$0xff] %vm1974_vm10, %v1935_v25 }
 0x299   : > { %v1744_v36 = vpop.permute.xlu1 %1743 }
 0x29a   : > { %5381 = vmatmul.mubr.msk.f32.gmra.mxu0 %vm2044_vm11, %v2032_v33  ;;  %1811 = vst.msk [vmem:[#allocation3 + $0xe8] sm:$0xff] %vm1781_vm9, %v1744_v36 }
 0x29b   : > { %5383 = vmatprep.mubr.msk.f32.mxu0 %vm2044_vm11, %v2033_v46 }
 0x29d   : > { %v1937_v30 = vpop.permute.xlu1 %1936  ;;  %v2034_v37 = vld [vmem:[#allocation3 + $0xd8] sm:$0xff] }
 0x29e   : > { %2004 = vst.msk [vmem:[#allocation3 + $0xe8] sm:$0xff] %vm1974_vm10, %v1937_v30  ;;  %5384 = vmatmul.mubr.msk.f32.gmra.mxu0 %vm2044_vm11, %v2034_v37  ;;  %v2035_v32 = vld [vmem:[#allocation3 + $0xe0] sm:$0xff] }
 0x29f   : > { %5386 = vmatprep.mubr.msk.f32.mxu0 %vm2044_vm11, %v2035_v32 }
 0x2a1   : > { %v1748_v39 = vpop.permute.xlu1 %1747 }
 0x2a2   : > { %1813 = vst.msk [vmem:[#allocation3 + $0xf8] sm:$0xff] %vm1781_vm9, %v1748_v39 }
 0x2a5   : > { %v2036_v45 = vld [vmem:[#allocation3 + $0xe8] sm:$0xff]  ;;  %v1746_v38 = vpop.permute.xlu0 %1745 }
 0x2a6   : > { %5387 = vmatmul.mubr.msk.f32.gmra.mxu0 %vm2044_vm11, %v2036_v45  ;;  %1812 = vst.msk [vmem:[#allocation3 + $0xf0] sm:$0xff] %vm1781_vm9, %v1746_v38  ;;  %vm5029_vm9 = vcmask 57344  }
 0x2a9   : > { %v1941_v51 = vpop.permute.xlu1 %1940 }
 0x2aa   : > { %2006 = vst.msk [vmem:[#allocation3 + $0xf8] sm:$0xff] %vm1974_vm10, %v1941_v51 }
 0x2ae   : > { %v1939_v40 = vpop.permute.xlu0 %1938 }
 0x2af   : > { %2005 = vst.msk [vmem:[#allocation3 + $0xf0] sm:$0xff] %vm1974_vm10, %v1939_v40  ;;  %vm5038_vm10 = vcmask 59394  }
 0x2b1   : > { %v2700_v52 = vpop.permute.xlu1 %2699 }
 0x2b2   : > { %2795 = vst.msk [vmem:[#allocation5 + $0x8] sm:$0xff] %vm2793_vm14, %v2700_v52  ;;  %v2698_v59 = vpop.permute.xlu0 %2697 }
 0x2b3   : > { %2794 = vst.msk [vmem:[#allocation5] sm:$0xff] %vm2793_vm14, %v2698_v59 }
 0x2fe   : > { %v5346_v58 = vpop.f32.mrf.mxu0 }
 0x2ff   : > { %v2378_v60 = vmul.f32 %v5346_v58, %v7100_v55 }
 0x300   : > { %v2211_v1 = vpop.f32.mrf.mxu0 }
 0x301   : > { %v2417_v62 = vadd.f32 %v7107_v61, %v2378_v60  ;;  %v2377_v3 = vmul.f32 %v7100_v55, %v2211_v1 }
 0x302   : > { %v5349_v2 = vpop.f32.mrf.mxu0 }
 0x303   : > { %v2449_v5 = vmax.f32 %v2417_v62, 0.0  ;;  %v2416_v4 = vadd.f32 %v7107_v61, %v2377_v3  ;;  %v2380_v7 = vmul.f32 %v5349_v2, %v7100_v55 }
 0x304   : > { %v2221_v6 = vpop.f32.mrf.mxu0 }
 0x305   : > { %2538 = vst.msk [vmem:[#allocation4 + $0x21] sm:$0xff] %vm2480_vm12, %v2449_v5  ;;  %v2448_v9 = vmax.f32 %v2416_v4, 0.0  ;;  %v2419_v8 = vadd.f32 %v7107_v61, %v2380_v7  ;;  %v2379_v12 = vmul.f32 %v7100_v55, %v2221_v6 }
 0x306   : > { %v5352_v10 = vpop.f32.mrf.mxu0 }
 0x307   : > { %2537 = vst.msk [vmem:[#allocation4 + $0x19] sm:$0xff] %vm2480_vm12, %v2448_v9  ;;  %v2451_v16 = vmax.f32 %v2419_v8, 0.0  ;;  %v2418_v13 = vadd.f32 %v7107_v61, %v2379_v12  ;;  %v2382_v20 = vmul.f32 %v5352_v10, %v7100_v55 }
 0x308   : > { %v2231_v17 = vpop.f32.mrf.mxu0 }
 0x309   : > { %2540 = vst.msk [vmem:[#allocation4 + $0x39] sm:$0xff] %vm2480_vm12, %v2451_v16  ;;  %v2450_v41 = vmax.f32 %v2418_v13, 0.0  ;;  %v2421_v24 = vadd.f32 %v7107_v61, %v2382_v20  ;;  %v2381_v21 = vmul.f32 %v7100_v55, %v2231_v17 }
 0x30b   : > { %2539 = vst.msk [vmem:[#allocation4 + $0x31] sm:$0xff] %vm2480_vm12, %v2450_v41  ;;  %v2453_v42 = vmax.f32 %v2421_v24, 0.0  ;;  %v2420_v0 = vadd.f32 %v7107_v61, %v2381_v21 }
 0x30c   : > { %v2636_v29 = vld [vmem:[#allocation4 + $0x21] sm:$0xff] }
 0x30d   : > { %2542 = vst.msk [vmem:[#allocation4 + $0x51] sm:$0xff] %vm2480_vm12, %v2453_v42  ;;  %v2452_v43 = vmax.f32 %v2420_v0, 0.0  ;;  %2703 = vrot.lane.b32.xlu1 %v2636_v29, %s5595_s19  ;;  %v2037_v42 = vld [vmem:[#allocation3 + $0xf0] sm:$0xff]  ;;  %v2038_v0 = vld [vmem:[#allocation3 + $0xf8] sm:$0xff] }
 0x30e   : > { %v5355_v28 = vpop.f32.mrf.mxu0  ;;  %v2635_v26 = vld [vmem:[#allocation4 + $0x19] sm:$0xff]  ;;  %5389 = vmatprep.mubr.msk.f32.mxu0 %vm2044_vm11, %v2037_v42 }
 0x30f   : > { %v7128_v27 = vld [vmem:[#allocation4 + $0x20] sm:$0xff]  ;;  %2541 = vst.msk [vmem:[#allocation4 + $0x49] sm:$0xff] %vm2480_vm12, %v2452_v43  ;;  %v2384_v44 = vmul.f32 %v5355_v28, %v7100_v55  ;;  %2701 = vrot.lane.b32.xlu0 %v2635_v26, %s5595_s19  ;;  %v7135_v47 = vld [vmem:[#allocation4 + $0x18] sm:$0xff]  ;;  %5390 = vmatmul.mubr.msk.f32.gmra.mxu0 %vm2044_vm11, %v2038_v0  ;;  %vm5047_vm11 = vcmask 61444  }
 0x310   : > { %2604 = vst.msk [vmem:[#allocation5 + $0x18] sm:$0xff] %vm2480_vm12, %v7128_v27  ;;  %v2241_v31 = vpop.f32.mrf.mxu0  ;;  %v7137_v34 = vld [vmem:[#allocation4 + $0x39] sm:$0xff]  ;;  %2603 = vst.msk [vmem:[#allocation5 + $0x10] sm:$0xff] %vm2480_vm12, %v7135_v47 }
 0x311   : > { %v2423_v50 = vadd.f32 %v7107_v61, %v2384_v44  ;;  %v2383_v53 = vmul.f32 %v7100_v55, %v2241_v31  ;;  %2707 = vrot.lane.b32.xlu1 %v7137_v34, %s5595_s19 }
 0x312   : > { %v7145_v56 = vld [vmem:[#allocation4 + $0x31] sm:$0xff] }
 0x313   : > { %v7147_v63 = vld [vmem:[#allocation4 + $0x38] sm:$0xff]  ;;  %v2455_v11 = vmax.f32 %v2423_v50, 0.0  ;;  %v2422_v14 = vadd.f32 %v7107_v61, %v2383_v53  ;;  %2705 = vrot.lane.b32.xlu0 %v7145_v56, %s5595_s19  ;;  %v7154_v15 = vld [vmem:[#allocation4 + $0x30] sm:$0xff] }
 0x314   : > { %2606 = vst.msk [vmem:[#allocation5 + $0x28] sm:$0xff] %vm2480_vm12, %v7147_v63  ;;  %v7156_v18 = vld [vmem:[#allocation4 + $0x51] sm:$0xff]  ;;  %2605 = vst.msk [vmem:[#allocation5 + $0x20] sm:$0xff] %vm2480_vm12, %v7154_v15 }
 0x315   : > { %2544 = vst.msk [vmem:[#allocation4 + $0x69] sm:$0xff] %vm2480_vm12, %v2455_v11  ;;  %v2454_v19 = vmax.f32 %v2422_v14, 0.0  ;;  %2711 = vrot.lane.b32.xlu1 %v7156_v18, %s5595_s19 }
 0x316   : > { %v5358_v22 = vpop.f32.mrf.mxu0  ;;  %v7163_v35 = vld [vmem:[#allocation4 + $0x49] sm:$0xff] }
 0x317   : > { %v7165_v23 = vld [vmem:[#allocation4 + $0x50] sm:$0xff]  ;;  %2543 = vst.msk [vmem:[#allocation4 + $0x61] sm:$0xff] %vm2480_vm12, %v2454_v19  ;;  %v2386_v49 = vmul.f32 %v5358_v22, %v7100_v55  ;;  %2709 = vrot.lane.b32.xlu0 %v7163_v35, %s5595_s19  ;;  %v7173_v48 = vld [vmem:[#allocation4 + $0x48] sm:$0xff] }
 0x318   : > { %2608 = vst.msk [vmem:[#allocation5 + $0x38] sm:$0xff] %vm2480_vm12, %v7165_v23  ;;  %v2251_v33 = vpop.f32.mrf.mxu0  ;;  %2607 = vst.msk [vmem:[#allocation5 + $0x30] sm:$0xff] %vm2480_vm12, %v7173_v48 }
 0x319   : > { %v2425_v25 = vadd.f32 %v7107_v61, %v2386_v49  ;;  %v2385_v46 = vmul.f32 %v7100_v55, %v2251_v33 }
 0x31b   : > { %v2457_v36 = vmax.f32 %v2425_v25, 0.0  ;;  %v2424_v30 = vadd.f32 %v7107_v61, %v2385_v46 }
 0x31c   : > { %v7180_v37 = vld [vmem:[#allocation4 + $0x69] sm:$0xff] }
 0x31d   : > { %2546 = vst.msk [vmem:[#allocation4 + $0x81] sm:$0xff] %vm2480_vm12, %v2457_v36  ;;  %v2456_v32 = vmax.f32 %v2424_v30, 0.0  ;;  %2715 = vrot.lane.b32.xlu1 %v7180_v37, %s5595_s19 }
 0x31e   : > { %v5361_v45 = vpop.f32.mrf.mxu0  ;;  %v7185_v39 = vld [vmem:[#allocation4 + $0x61] sm:$0xff] }
 0x31f   : > { %v7187_v38 = vld [vmem:[#allocation4 + $0x68] sm:$0xff]  ;;  %2545 = vst.msk [vmem:[#allocation4 + $0x79] sm:$0xff] %vm2480_vm12, %v2456_v32  ;;  %v2388_v51 = vmul.f32 %v5361_v45, %v7100_v55  ;;  %2713 = vrot.lane.b32.xlu0 %v7185_v39, %s5595_s19  ;;  %v7195_v40 = vld [vmem:[#allocation4 + $0x60] sm:$0xff] }
 0x320   : > { %2610 = vst.msk [vmem:[#allocation5 + $0x48] sm:$0xff] %vm2480_vm12, %v7187_v38  ;;  %v2261_v54 = vpop.f32.mrf.mxu0  ;;  %2609 = vst.msk [vmem:[#allocation5 + $0x40] sm:$0xff] %vm2480_vm12, %v7195_v40 }
 0x321   : > { %v2427_v52 = vadd.f32 %v7107_v61, %v2388_v51  ;;  %v2387_v57 = vmul.f32 %v7100_v55, %v2261_v54 }
 0x323   : > { %v2459_v59 = vmax.f32 %v2427_v52, 0.0  ;;  %v2426_v58 = vadd.f32 %v7107_v61, %v2387_v57 }
 0x324   : > { %v7202_v60 = vld [vmem:[#allocation4 + $0x81] sm:$0xff] }
 0x325   : > { %2548 = vst.msk [vmem:[#allocation4 + $0x99] sm:$0xff] %vm2480_vm12, %v2459_v59  ;;  %v2458_v1 = vmax.f32 %v2426_v58, 0.0  ;;  %2719 = vrot.lane.b32.xlu1 %v7202_v60, %s5595_s19 }
 0x326   : > { %v5364_v62 = vpop.f32.mrf.mxu0  ;;  %v7207_v3 = vld [vmem:[#allocation4 + $0x79] sm:$0xff] }
 0x327   : > { %v7209_v2 = vld [vmem:[#allocation4 + $0x80] sm:$0xff]  ;;  %2547 = vst.msk [vmem:[#allocation4 + $0x91] sm:$0xff] %vm2480_vm12, %v2458_v1  ;;  %v2390_v5 = vmul.f32 %v5364_v62, %v7100_v55  ;;  %2717 = vrot.lane.b32.xlu0 %v7207_v3, %s5595_s19  ;;  %v7217_v4 = vld [vmem:[#allocation4 + $0x78] sm:$0xff] }
 0x328   : > { %2612 = vst.msk [vmem:[#allocation5 + $0x58] sm:$0xff] %vm2480_vm12, %v7209_v2  ;;  %v2271_v7 = vpop.f32.mrf.mxu0  ;;  %2611 = vst.msk [vmem:[#allocation5 + $0x50] sm:$0xff] %vm2480_vm12, %v7217_v4 }
 0x329   : > { %v2429_v6 = vadd.f32 %v7107_v61, %v2390_v5  ;;  %v2389_v9 = vmul.f32 %v7100_v55, %v2271_v7 }
 0x32b   : > { %v2461_v8 = vmax.f32 %v2429_v6, 0.0  ;;  %v2428_v12 = vadd.f32 %v7107_v61, %v2389_v9 }
 0x32c   : > { %v7224_v10 = vld [vmem:[#allocation4 + $0x99] sm:$0xff] }
 0x32d   : > { %2550 = vst.msk [vmem:[#allocation4 + $0xb1] sm:$0xff] %vm2480_vm12, %v2461_v8  ;;  %v2460_v16 = vmax.f32 %v2428_v12, 0.0  ;;  %2723 = vrot.lane.b32.xlu1 %v7224_v10, %s5595_s19 }
 0x32e   : > { %v5367_v13 = vpop.f32.mrf.mxu0  ;;  %v7229_v20 = vld [vmem:[#allocation4 + $0x91] sm:$0xff] }
 0x32f   : > { %v7231_v17 = vld [vmem:[#allocation4 + $0x98] sm:$0xff]  ;;  %2549 = vst.msk [vmem:[#allocation4 + $0xa9] sm:$0xff] %vm2480_vm12, %v2460_v16  ;;  %v2392_v41 = vmul.f32 %v5367_v13, %v7100_v55  ;;  %2721 = vrot.lane.b32.xlu0 %v7229_v20, %s5595_s19  ;;  %v7239_v24 = vld [vmem:[#allocation4 + $0x90] sm:$0xff] }
 0x330   : > { %2614 = vst.msk [vmem:[#allocation5 + $0x68] sm:$0xff] %vm2480_vm12, %v7231_v17  ;;  %v2281_v21 = vpop.f32.mrf.mxu0  ;;  %2613 = vst.msk [vmem:[#allocation5 + $0x60] sm:$0xff] %vm2480_vm12, %v7239_v24 }
 0x331   : > { %v2431_v29 = vadd.f32 %v7107_v61, %v2392_v41  ;;  %v2391_v43 = vmul.f32 %v7100_v55, %v2281_v21 }
 0x333   : > { %v2463_v28 = vmax.f32 %v2431_v29, 0.0  ;;  %v2430_v26 = vadd.f32 %v7107_v61, %v2391_v43 }
 0x334   : > { %v2648_v44 = vld [vmem:[#allocation4 + $0xb1] sm:$0xff] }
 0x335   : > { %2552 = vst.msk [vmem:[#allocation4 + $0xc9] sm:$0xff] %vm2480_vm12, %v2463_v28  ;;  %v2462_v31 = vmax.f32 %v2430_v26, 0.0  ;;  %2727 = vrot.lane.b32.xlu1 %v2648_v44, %s5595_s19 }
 0x336   : > { %v5370_v50 = vpop.f32.mrf.mxu0  ;;  %v2647_v53 = vld [vmem:[#allocation4 + $0xa9] sm:$0xff] }
 0x337   : > { %v7250_v11 = vld [vmem:[#allocation4 + $0xb0] sm:$0xff]  ;;  %2551 = vst.msk [vmem:[#allocation4 + $0xc1] sm:$0xff] %vm2480_vm12, %v2462_v31  ;;  %v2394_v14 = vmul.f32 %v5370_v50, %v7100_v55  ;;  %2725 = vrot.lane.b32.xlu0 %v2647_v53, %s5595_s19  ;;  %v7257_v19 = vld [vmem:[#allocation4 + $0xa8] sm:$0xff] }
 0x338   : > { %2616 = vst.msk [vmem:[#allocation5 + $0x78] sm:$0xff] %vm2480_vm12, %v7250_v11  ;;  %v2291_v22 = vpop.f32.mrf.mxu0  ;;  %2615 = vst.msk [vmem:[#allocation5 + $0x70] sm:$0xff] %vm2480_vm12, %v7257_v19 }
 0x339   : > { %v2433_v49 = vadd.f32 %v7107_v61, %v2394_v14  ;;  %v2393_v33 = vmul.f32 %v7100_v55, %v2291_v22 }
 0x33b   : > { %v2465_v25 = vmax.f32 %v2433_v49, 0.0  ;;  %v2432_v46 = vadd.f32 %v7107_v61, %v2393_v33 }
 0x33c   : > { %v2650_v36 = vld [vmem:[#allocation4 + $0xc9] sm:$0xff] }
 0x33d   : > { %2554 = vst.msk [vmem:[#allocation4 + $0xe1] sm:$0xff] %vm2480_vm12, %v2465_v25  ;;  %v2464_v30 = vmax.f32 %v2432_v46, 0.0  ;;  %2731 = vrot.lane.b32.xlu1 %v2650_v36, %s5595_s19 }
 0x33e   : > { %v5373_v32 = vpop.f32.mrf.mxu0  ;;  %v2649_v45 = vld [vmem:[#allocation4 + $0xc1] sm:$0xff] }
 0x33f   : > { %v7266_v51 = vld [vmem:[#allocation4 + $0xc8] sm:$0xff]  ;;  %2553 = vst.msk [vmem:[#allocation4 + $0xd9] sm:$0xff] %vm2480_vm12, %v2464_v30  ;;  %v2396_v54 = vmul.f32 %v5373_v32, %v7100_v55  ;;  %2729 = vrot.lane.b32.xlu0 %v2649_v45, %s5595_s19  ;;  %v7273_v52 = vld [vmem:[#allocation4 + $0xc0] sm:$0xff] }
 0x340   : > { %2618 = vst.msk [vmem:[#allocation5 + $0x88] sm:$0xff] %vm2480_vm12, %v7266_v51  ;;  %v2301_v57 = vpop.f32.mrf.mxu0  ;;  %2617 = vst.msk [vmem:[#allocation5 + $0x80] sm:$0xff] %vm2480_vm12, %v7273_v52 }
 0x341   : > { %v2435_v59 = vadd.f32 %v7107_v61, %v2396_v54  ;;  %v2395_v58 = vmul.f32 %v7100_v55, %v2301_v57 }
 0x343   : > { %v2467_v1 = vmax.f32 %v2435_v59, 0.0  ;;  %v2434_v62 = vadd.f32 %v7107_v61, %v2395_v58 }
 0x344   : > { %v2652_v5 = vld [vmem:[#allocation4 + $0xe1] sm:$0xff] }
 0x345   : > { %2556 = vst.msk [vmem:[#allocation4 + $0xf9] sm:$0xff] %vm2480_vm12, %v2467_v1  ;;  %v2466_v7 = vmax.f32 %v2434_v62, 0.0  ;;  %2735 = vrot.lane.b32.xlu1 %v2652_v5, %s5595_s19 }
 0x346   : > { %v5376_v6 = vpop.f32.mrf.mxu0  ;;  %v2651_v9 = vld [vmem:[#allocation4 + $0xd9] sm:$0xff] }
 0x347   : > { %v7282_v8 = vld [vmem:[#allocation4 + $0xe0] sm:$0xff]  ;;  %2555 = vst.msk [vmem:[#allocation4 + $0xf1] sm:$0xff] %vm2480_vm12, %v2466_v7  ;;  %v2398_v12 = vmul.f32 %v5376_v6, %v7100_v55  ;;  %2733 = vrot.lane.b32.xlu0 %v2651_v9, %s5595_s19  ;;  %v7289_v16 = vld [vmem:[#allocation4 + $0xd8] sm:$0xff] }
 0x348   : > { %2620 = vst.msk [vmem:[#allocation5 + $0x98] sm:$0xff] %vm2480_vm12, %v7282_v8  ;;  %v2311_v13 = vpop.f32.mrf.mxu0  ;;  %2619 = vst.msk [vmem:[#allocation5 + $0x90] sm:$0xff] %vm2480_vm12, %v7289_v16 }
 0x349   : > { %v2437_v41 = vadd.f32 %v7107_v61, %v2398_v12  ;;  %v2397_v21 = vmul.f32 %v7100_v55, %v2311_v13 }
 0x34b   : > { %v2469_v42 = vmax.f32 %v2437_v41, 0.0  ;;  %v2436_v0 = vadd.f32 %v7107_v61, %v2397_v21 }
 0x34c   : > { %v2654_v29 = vld [vmem:[#allocation4 + $0xf9] sm:$0xff] }
 0x34d   : > { %2558 = vst.msk [vmem:[#allocation4 + $0x111] sm:$0xff] %vm2480_vm12, %v2469_v42  ;;  %v2468_v43 = vmax.f32 %v2436_v0, 0.0  ;;  %2739 = vrot.lane.b32.xlu1 %v2654_v29, %s5595_s19 }
 0x34e   : > { %v2653_v26 = vld [vmem:[#allocation4 + $0xf1] sm:$0xff] }
 0x34f   : > { %v7298_v44 = vld [vmem:[#allocation4 + $0xf8] sm:$0xff]  ;;  %2557 = vst.msk [vmem:[#allocation4 + $0x109] sm:$0xff] %vm2480_vm12, %v2468_v43  ;;  %2737 = vrot.lane.b32.xlu0 %v2653_v26, %s5595_s19  ;;  %v7305_v50 = vld [vmem:[#allocation4 + $0xf0] sm:$0xff] }
 0x350   : > { %2622 = vst.msk [vmem:[#allocation5 + $0xa8] sm:$0xff] %vm2480_vm12, %v7298_v44  ;;  %2621 = vst.msk [vmem:[#allocation5 + $0xa0] sm:$0xff] %vm2480_vm12, %v7305_v50 }
 0x354   : > { %v2656_v25 = vld [vmem:[#allocation4 + $0x111] sm:$0xff] }
 0x355   : > { %2743 = vrot.lane.b32.xlu1 %v2656_v25, %s5595_s19 }
 0x356   : > { %v5379_v28 = vpop.f32.mrf.mxu0  ;;  %v2655_v30 = vld [vmem:[#allocation4 + $0x109] sm:$0xff] }
 0x357   : > { %v2400_v31 = vmul.f32 %v5379_v28, %v7100_v55  ;;  %v7314_v32 = vld [vmem:[#allocation4 + $0x110] sm:$0xff]  ;;  %2741 = vrot.lane.b32.xlu0 %v2655_v30, %s5595_s19  ;;  %v7321_v54 = vld [vmem:[#allocation4 + $0x108] sm:$0xff] }
 0x358   : > { %v2321_v53 = vpop.f32.mrf.mxu0  ;;  %2624 = vst.msk [vmem:[#allocation5 + $0xb8] sm:$0xff] %vm2480_vm12, %v7314_v32  ;;  %2623 = vst.msk [vmem:[#allocation5 + $0xb0] sm:$0xff] %vm2480_vm12, %v7321_v54 }
 0x359   : > { %v2439_v14 = vadd.f32 %v7107_v61, %v2400_v31  ;;  %v2399_v22 = vmul.f32 %v7100_v55, %v2321_v53 }
 0x35a   : > { %v5382_v36 = vpop.f32.mrf.mxu0 }
 0x35b   : > { %v2471_v49 = vmax.f32 %v2439_v14, 0.0  ;;  %v2438_v33 = vadd.f32 %v7107_v61, %v2399_v22  ;;  %v2402_v45 = vmul.f32 %v5382_v36, %v7100_v55 }
 0x35c   : > { %v2331_v57 = vpop.f32.mrf.mxu0 }
 0x35d   : > { %2560 = vst.msk [vmem:[#allocation4 + $0x129] sm:$0xff] %vm2480_vm12, %v2471_v49  ;;  %v2470_v46 = vmax.f32 %v2438_v33, 0.0  ;;  %v2441_v59 = vadd.f32 %v7107_v61, %v2402_v45  ;;  %v2401_v58 = vmul.f32 %v7100_v55, %v2331_v57 }
 0x35e   : > { %v5385_v6 = vpop.f32.mrf.mxu0 }
 0x35f   : > { %2559 = vst.msk [vmem:[#allocation4 + $0x121] sm:$0xff] %vm2480_vm12, %v2470_v46  ;;  %v2473_v1 = vmax.f32 %v2441_v59, 0.0  ;;  %v2440_v62 = vadd.f32 %v7107_v61, %v2401_v58  ;;  %v2404_v13 = vmul.f32 %v5385_v6, %v7100_v55 }
 0x360   : > { %v2341_v21 = vpop.f32.mrf.mxu0 }
 0x361   : > { %2562 = vst.msk [vmem:[#allocation4 + $0x141] sm:$0xff] %vm2480_vm12, %v2473_v1  ;;  %v2472_v7 = vmax.f32 %v2440_v62, 0.0  ;;  %v2443_v42 = vadd.f32 %v7107_v61, %v2404_v13  ;;  %v2403_v0 = vmul.f32 %v7100_v55, %v2341_v21  ;;  %v2826_v13 = vld [vmem:[#allocation4 + $0x2] sm:$0xff] }
 0x362   : > { %v2829_v21 = vld [vmem:[#allocation4 + $0x22] sm:$0xff] }
 0x363   : > { %2561 = vst.msk [vmem:[#allocation4 + $0x139] sm:$0xff] %vm2480_vm12, %v2472_v7  ;;  %v2475_v29 = vmax.f32 %v2443_v42, 0.0  ;;  %v2442_v43 = vadd.f32 %v7107_v61, %v2403_v0  ;;  %v2827_v7 = vld [vmem:[#allocation4 + $0xa] sm:$0xff]  ;;  %v2828_v42 = vld [vmem:[#allocation4 + $0x1a] sm:$0xff] }
 0x364   : > { %v2658_v5 = vld [vmem:[#allocation4 + $0x129] sm:$0xff] }
 0x365   : > { %2747 = vrot.lane.b32.xlu1 %v2658_v5, %s5595_s19  ;;  %2564 = vst.msk [vmem:[#allocation4 + $0x159] sm:$0xff] %vm2480_vm12, %v2475_v29  ;;  %v2474_v26 = vmax.f32 %v2442_v43, 0.0  ;;  %v7369_v29 = vld [vmem:[#allocation4 + $0x3a] sm:$0xff] }
 0x366   : > { %v2657_v9 = vld [vmem:[#allocation4 + $0x121] sm:$0xff]  ;;  %v5388_v31 = vpop.f32.mrf.mxu0 }
 0x367   : > { %v7330_v12 = vld [vmem:[#allocation4 + $0x128] sm:$0xff]  ;;  %2745 = vrot.lane.b32.xlu0 %v2657_v9, %s5595_s19  ;;  %v7337_v41 = vld [vmem:[#allocation4 + $0x120] sm:$0xff]  ;;  %2563 = vst.msk [vmem:[#allocation4 + $0x151] sm:$0xff] %vm2480_vm12, %v2474_v26  ;;  %v2406_v22 = vmul.f32 %v5388_v31, %v7100_v55  ;;  %v7379_v31 = vld [vmem:[#allocation4 + $0x52] sm:$0xff] }
 0x368   : > { %2626 = vst.msk [vmem:[#allocation5 + $0xc8] sm:$0xff] %vm2480_vm12, %v7330_v12  ;;  %2625 = vst.msk [vmem:[#allocation5 + $0xc0] sm:$0xff] %vm2480_vm12, %v7337_v41  ;;  %v2660_v28 = vld [vmem:[#allocation4 + $0x141] sm:$0xff]  ;;  %v2351_v33 = vpop.f32.mrf.mxu0 }
 0x369   : > { %2751 = vrot.lane.b32.xlu1 %v2660_v28, %s5595_s19  ;;  %v2445_v25 = vadd.f32 %v7107_v61, %v2406_v22  ;;  %v2405_v46 = vmul.f32 %v7100_v55, %v2351_v33  ;;  %v7374_v28 = vld [vmem:[#allocation4 + $0x32] sm:$0xff] }
 0x36a   : > { %v2659_v53 = vld [vmem:[#allocation4 + $0x139] sm:$0xff] }
 0x36b   : > { %v2596_v14 = vld [vmem:[#allocation4 + $0x140] sm:$0xff]  ;;  %2749 = vrot.lane.b32.xlu0 %v2659_v53, %s5595_s19  ;;  %v2595_v49 = vld [vmem:[#allocation4 + $0x138] sm:$0xff]  ;;  %v2477_v36 = vmax.f32 %v2445_v25, 0.0  ;;  %v2444_v30 = vadd.f32 %v7107_v61, %v2405_v46 }
 0x36c   : > { %2628 = vst.msk [vmem:[#allocation5 + $0xd8] sm:$0xff] %vm2480_vm12, %v2596_v14  ;;  %2627 = vst.msk [vmem:[#allocation5 + $0xd0] sm:$0xff] %vm2480_vm12, %v2595_v49  ;;  %v2662_v45 = vld [vmem:[#allocation4 + $0x159] sm:$0xff]  ;;  %v7384_v14 = vld [vmem:[#allocation4 + $0x4a] sm:$0xff] }
 0x36d   : > { %2566 = vst.msk [vmem:[#allocation4 + $0x171] sm:$0xff] %vm2480_vm12, %v2477_v36  ;;  %v2476_v57 = vmax.f32 %v2444_v30, 0.0  ;;  %2755 = vrot.lane.b32.xlu1 %v2662_v45, %s5595_s19  ;;  %v7389_v49 = vld [vmem:[#allocation4 + $0x6a] sm:$0xff]  ;;  %v7394_v25 = vld [vmem:[#allocation4 + $0x62] sm:$0xff]  ;;  %v7402_v36 = vld [vmem:[#allocation4 + $0x7a] sm:$0xff] }
 0x36e   : > { %v2661_v59 = vld [vmem:[#allocation4 + $0x151] sm:$0xff]  ;;  %v7398_v46 = vld [vmem:[#allocation4 + $0x82] sm:$0xff]  ;;  %v7407_v45 = vld [vmem:[#allocation4 + $0x9a] sm:$0xff] }
 0x36f   : > { %v2598_v58 = vld [vmem:[#allocation4 + $0x158] sm:$0xff]  ;;  %2565 = vst.msk [vmem:[#allocation4 + $0x169] sm:$0xff] %vm2480_vm12, %v2476_v57  ;;  %2753 = vrot.lane.b32.xlu0 %v2661_v59, %s5595_s19  ;;  %v2597_v1 = vld [vmem:[#allocation4 + $0x150] sm:$0xff] }
 0x370   : > { %2630 = vst.msk [vmem:[#allocation5 + $0xe8] sm:$0xff] %vm2480_vm12, %v2598_v58  ;;  %2629 = vst.msk [vmem:[#allocation5 + $0xe0] sm:$0xff] %vm2480_vm12, %v2597_v1  ;;  %v7412_v59 = vld [vmem:[#allocation4 + $0x92] sm:$0xff]  ;;  %v7420_v1 = vld [vmem:[#allocation4 + $0xaa] sm:$0xff] }
 0x371   : > { %v7416_v58 = vld [vmem:[#allocation4 + $0xb2] sm:$0xff] }
 0x374   : > { %v2664_v62 = vld [vmem:[#allocation4 + $0x171] sm:$0xff] }
 0x375   : > { %2759 = vrot.lane.b32.xlu1 %v2664_v62, %s5595_s19 }
 0x376   : > { %v2663_v5 = vld [vmem:[#allocation4 + $0x169] sm:$0xff] }
 0x377   : > { %v2600_v6 = vld [vmem:[#allocation4 + $0x170] sm:$0xff]  ;;  %2757 = vrot.lane.b32.xlu0 %v2663_v5, %s5595_s19  ;;  %v2599_v9 = vld [vmem:[#allocation4 + $0x168] sm:$0xff] }
 0x378   : > { %2632 = vst.msk [vmem:[#allocation5 + $0xf8] sm:$0xff] %vm2480_vm12, %v2600_v6  ;;  %2631 = vst.msk [vmem:[#allocation5 + $0xf0] sm:$0xff] %vm2480_vm12, %v2599_v9  ;;  %v7425_v5 = vld [vmem:[#allocation4 + $0xca] sm:$0xff]  ;;  %v7430_v6 = vld [vmem:[#allocation4 + $0xc2] sm:$0xff] }
 0x379   : > { %2892 = vrot.lane.b32.xlu1 %v2827_v7, %s5597_s21  ;;  %v7434_v9 = vld [vmem:[#allocation4 + $0xe2] sm:$0xff] }
 0x37b   : > { %2890 = vrot.lane.b32.xlu0 %v2826_v13, %s5597_s21  ;;  %v7438_v13 = vld [vmem:[#allocation4 + $0xda] sm:$0xff] }
 0x37d   : > { %2896 = vrot.lane.b32.xlu1 %v2829_v21, %s5597_s21 }
 0x37f   : > { %v2704_v0 = vpop.permute.xlu1 %2703  ;;  %2894 = vrot.lane.b32.xlu0 %v2828_v42, %s5597_s21  ;;  %v2847_v42 = vld [vmem:[#allocation4 + $0xfa] sm:$0xff] }
 0x380   : > { %2797 = vst.msk [vmem:[#allocation5 + $0x18] sm:$0xff] %vm2793_vm14, %v2704_v0 }
 0x381   : > { %v2702_v43 = vpop.permute.xlu0 %2701  ;;  %2900 = vrot.lane.b32.xlu1 %v7369_v29, %s5597_s21 }
 0x382   : > { %2796 = vst.msk [vmem:[#allocation5 + $0x10] sm:$0xff] %vm2793_vm14, %v2702_v43  ;;  %v7445_v43 = vld [vmem:[#allocation4 + $0xf2] sm:$0xff] }
 0x383   : > { %v2708_v26 = vpop.permute.xlu1 %2707  ;;  %2898 = vrot.lane.b32.xlu0 %v7374_v28, %s5597_s21 }
 0x384   : > { %2799 = vst.msk [vmem:[#allocation5 + $0x28] sm:$0xff] %vm2793_vm14, %v2708_v26  ;;  %v2849_v26 = vld [vmem:[#allocation4 + $0x112] sm:$0xff] }
 0x385   : > { %v2706_v53 = vpop.permute.xlu0 %2705  ;;  %2904 = vrot.lane.b32.xlu1 %v7379_v31, %s5597_s21 }
 0x386   : > { %2798 = vst.msk [vmem:[#allocation5 + $0x20] sm:$0xff] %vm2793_vm14, %v2706_v53  ;;  %v2848_v53 = vld [vmem:[#allocation4 + $0x10a] sm:$0xff] }
 0x387   : > { %v2712_v22 = vpop.permute.xlu1 %2711  ;;  %2902 = vrot.lane.b32.xlu0 %v7384_v14, %s5597_s21 }
 0x388   : > { %2801 = vst.msk [vmem:[#allocation5 + $0x38] sm:$0xff] %vm2793_vm14, %v2712_v22 }
 0x389   : > { %v2710_v33 = vpop.permute.xlu0 %2709  ;;  %2908 = vrot.lane.b32.xlu1 %v7389_v49, %s5597_s21 }
 0x38a   : > { %2800 = vst.msk [vmem:[#allocation5 + $0x30] sm:$0xff] %vm2793_vm14, %v2710_v33  ;;  %v2851_v33 = vld [vmem:[#allocation4 + $0x12a] sm:$0xff] }
 0x38b   : > { %2906 = vrot.lane.b32.xlu0 %v7394_v25, %s5597_s21 }
 0x38d   : > { %2912 = vrot.lane.b32.xlu1 %v7398_v46, %s5597_s21 }
 0x38f   : > { %v2716_v30 = vpop.permute.xlu1 %2715  ;;  %2910 = vrot.lane.b32.xlu0 %v7402_v36, %s5597_s21 }
 0x390   : > { %2803 = vst.msk [vmem:[#allocation5 + $0x48] sm:$0xff] %vm2793_vm14, %v2716_v30 }
 0x391   : > { %v2714_v57 = vpop.permute.xlu0 %2713  ;;  %2916 = vrot.lane.b32.xlu1 %v7407_v45, %s5597_s21 }
 0x392   : > { %2802 = vst.msk [vmem:[#allocation5 + $0x40] sm:$0xff] %vm2793_vm14, %v2714_v57  ;;  %v2850_v57 = vld [vmem:[#allocation4 + $0x122] sm:$0xff] }
 0x393   : > { %2914 = vrot.lane.b32.xlu0 %v7412_v59, %s5597_s21 }
 0x395   : > { %2920 = vrot.lane.b32.xlu1 %v7416_v58, %s5597_s21 }
 0x397   : > { %v2720_v62 = vpop.permute.xlu1 %2719  ;;  %2918 = vrot.lane.b32.xlu0 %v7420_v1, %s5597_s21 }
 0x398   : > { %2805 = vst.msk [vmem:[#allocation5 + $0x58] sm:$0xff] %vm2793_vm14, %v2720_v62  ;;  %v2853_v62 = vld [vmem:[#allocation4 + $0x142] sm:$0xff] }
 0x399   : > { %v2718_v7 = vpop.permute.xlu0 %2717  ;;  %2924 = vrot.lane.b32.xlu1 %v7425_v5, %s5597_s21 }
 0x39a   : > { %2804 = vst.msk [vmem:[#allocation5 + $0x50] sm:$0xff] %vm2793_vm14, %v2718_v7  ;;  %v2852_v7 = vld [vmem:[#allocation4 + $0x13a] sm:$0xff] }
 0x39b   : > { %2922 = vrot.lane.b32.xlu0 %v7430_v6, %s5597_s21 }
 0x39d   : > { %2928 = vrot.lane.b32.xlu1 %v7434_v9, %s5597_s21 }
 0x39f   : > { %v2724_v21 = vpop.permute.xlu1 %2723  ;;  %2926 = vrot.lane.b32.xlu0 %v7438_v13, %s5597_s21 }
 0x3a0   : > { %2807 = vst.msk [vmem:[#allocation5 + $0x68] sm:$0xff] %vm2793_vm14, %v2724_v21 }
 0x3a1   : > { %v2722_v0 = vpop.permute.xlu0 %2721  ;;  %2932 = vrot.lane.b32.xlu1 %v2847_v42, %s5597_s21  ;;  %v2855_v42 = vld [vmem:[#allocation4 + $0x15a] sm:$0xff] }
 0x3a2   : > { %2806 = vst.msk [vmem:[#allocation5 + $0x60] sm:$0xff] %vm2793_vm14, %v2722_v0 }
 0x3a3   : > { %2930 = vrot.lane.b32.xlu0 %v7445_v43, %s5597_s21 }
 0x3a5   : > { %2936 = vrot.lane.b32.xlu1 %v2849_v26, %s5597_s21  ;;  %v2854_v26 = vld [vmem:[#allocation4 + $0x152] sm:$0xff] }
 0x3a7   : > { %v2728_v22 = vpop.permute.xlu1 %2727  ;;  %2934 = vrot.lane.b32.xlu0 %v2848_v53, %s5597_s21  ;;  %v2857_v53 = vld [vmem:[#allocation4 + $0x172] sm:$0xff] }
 0x3a8   : > { %2809 = vst.msk [vmem:[#allocation5 + $0x78] sm:$0xff] %vm2793_vm14, %v2728_v22  ;;  %v2856_v22 = vld [vmem:[#allocation4 + $0x16a] sm:$0xff] }
 0x3a9   : > { %v2726_v30 = vpop.permute.xlu0 %2725  ;;  %2940 = vrot.lane.b32.xlu1 %v2851_v33, %s5597_s21 }
 0x3aa   : > { %2808 = vst.msk [vmem:[#allocation5 + $0x70] sm:$0xff] %vm2793_vm14, %v2726_v30 }
 0x3ab   : > { %2938 = vrot.lane.b32.xlu0 %v2850_v57, %s5597_s21 }
 0x3ad   : > { %2944 = vrot.lane.b32.xlu1 %v2853_v62, %s5597_s21 }
 0x3af   : > { %v2732_v21 = vpop.permute.xlu1 %2731  ;;  %2942 = vrot.lane.b32.xlu0 %v2852_v7, %s5597_s21 }
 0x3b0   : > { %2811 = vst.msk [vmem:[#allocation5 + $0x88] sm:$0xff] %vm2793_vm14, %v2732_v21 }
 0x3b1   : > { %v2730_v0 = vpop.permute.xlu0 %2729  ;;  %2948 = vrot.lane.b32.xlu1 %v2855_v42, %s5597_s21  ;;  %v4218_v42 = vld [vmem:[%s8405_s4 + $0x40] sm:$0xff] }
 0x3b2   : > { %2810 = vst.msk [vmem:[#allocation5 + $0x80] sm:$0xff] %vm2793_vm14, %v2730_v0  ;;  %5458 = vmatprep.subr.mxu1 %v4218_v42  ;;  %5392 = vmatprep.subr.mxu0 %v4218_v42 }
 0x3b3   : > { %2946 = vrot.lane.b32.xlu0 %v2854_v26, %s5597_s21  ;;  %5467 = vmatpush3.msra.mxu1 %v4218_v42  ;;  %v4217_v26 = vld [vmem:[%s8405_s4 + $0x38] sm:$0xff] }
 0x3b4   : > { %5459 = vmatprep.subr.mxu1 %v4217_v26  ;;  %5393 = vmatpush3.msra.mxu0 %v4218_v42 }
 0x3b5   : > { %2952 = vrot.lane.b32.xlu1 %v2857_v53, %s5597_s21  ;;  %5468 = vmatpush3.msra.mxu1 %v4217_v26 }
 0x3b6   : > { %5394 = vmatprep.subr.mxu0 %v4217_v26 }
 0x3b7   : > { %v2736_v33 = vpop.permute.xlu1 %2735  ;;  %2950 = vrot.lane.b32.xlu0 %v2856_v22, %s5597_s21  ;;  %v4215_v22 = vld [vmem:[%s8405_s4 + $0x28] sm:$0xff]  ;;  %5395 = vmatpush3.msra.mxu0 %v4217_v26  ;;  %s5255_s21 = sshll.u32 %s5669_s28, 10 }
 0x3b8   : > { %2813 = vst.msk [vmem:[#allocation5 + $0x98] sm:$0xff] %vm2793_vm14, %v2736_v33 }
 0x3b9   : > { %v2734_v30 = vpop.permute.xlu0 %2733  ;;  %3085 = vrot.lane.b32.xlu1 %v7128_v27, %s5599_s23 }
 0x3ba   : > { %2812 = vst.msk [vmem:[#allocation5 + $0x90] sm:$0xff] %vm2793_vm14, %v2734_v30 }
 0x3bb   : > { %3083 = vrot.lane.b32.xlu0 %v7135_v47, %s5599_s23 }
 0x3bd   : > { %3089 = vrot.lane.b32.xlu1 %v7147_v63, %s5599_s23 }
 0x3bf   : > { %v2740_v57 = vpop.permute.xlu1 %2739  ;;  %3087 = vrot.lane.b32.xlu0 %v7154_v15, %s5599_s23 }
 0x3c0   : > { %2815 = vst.msk [vmem:[#allocation5 + $0xa8] sm:$0xff] %vm2793_vm14, %v2740_v57  ;;  %v4211_v57 = vld [vmem:[%s8405_s4 + $0x8] sm:$0xff] }
 0x3c1   : > { %v2738_v62 = vpop.permute.xlu0 %2737  ;;  %3093 = vrot.lane.b32.xlu1 %v7165_v23, %s5599_s23 }
 0x3c2   : > { %2814 = vst.msk [vmem:[#allocation5 + $0xa0] sm:$0xff] %vm2793_vm14, %v2738_v62 }
 0x3c3   : > { %3091 = vrot.lane.b32.xlu0 %v7173_v48, %s5599_s23 }
 0x3c5   : > { %3097 = vrot.lane.b32.xlu1 %v7187_v38, %s5599_s23 }
 0x3c7   : > { %v2744_v27 = vpop.permute.xlu1 %2743  ;;  %3095 = vrot.lane.b32.xlu0 %v7195_v40, %s5599_s23 }
 0x3c8   : > { %2817 = vst.msk [vmem:[#allocation5 + $0xb8] sm:$0xff] %vm2793_vm14, %v2744_v27 }
 0x3c9   : > { %v2742_v47 = vpop.permute.xlu0 %2741  ;;  %3101 = vrot.lane.b32.xlu1 %v7209_v2, %s5599_s23 }
 0x3ca   : > { %2816 = vst.msk [vmem:[#allocation5 + $0xb0] sm:$0xff] %vm2793_vm14, %v2742_v47 }
 0x3cb   : > { %3099 = vrot.lane.b32.xlu0 %v7217_v4, %s5599_s23 }
 0x3cd   : > { %3105 = vrot.lane.b32.xlu1 %v7231_v17, %s5599_s23 }
 0x3cf   : > { %3103 = vrot.lane.b32.xlu0 %v7239_v24, %s5599_s23 }
 0x3d1   : > { %3109 = vrot.lane.b32.xlu1 %v7250_v11, %s5599_s23 }
 0x3d3   : > { %3107 = vrot.lane.b32.xlu0 %v7257_v19, %s5599_s23 }
 0x3d5   : > { %3113 = vrot.lane.b32.xlu1 %v7266_v51, %s5599_s23 }
 0x3d7   : > { %v2748_v63 = vpop.permute.xlu1 %2747  ;;  %3111 = vrot.lane.b32.xlu0 %v7273_v52, %s5599_s23 }
 0x3d8   : > { %2819 = vst.msk [vmem:[#allocation5 + $0xc8] sm:$0xff] %vm2793_vm14, %v2748_v63  ;;  %v5391_v63 = vpop.f32.mrf.mxu0 }
 0x3d9   : > { %v2746_v15 = vpop.permute.xlu0 %2745  ;;  %3117 = vrot.lane.b32.xlu1 %v7282_v8, %s5599_s23 }
 0x3da   : > { %2818 = vst.msk [vmem:[#allocation5 + $0xc0] sm:$0xff] %vm2793_vm14, %v2746_v15 }
 0x3db   : > { %v2752_v7 = vpop.permute.xlu1 %2751  ;;  %3115 = vrot.lane.b32.xlu0 %v7289_v16, %s5599_s23 }
 0x3dc   : > { %2821 = vst.msk [vmem:[#allocation5 + $0xd8] sm:$0xff] %vm2793_vm14, %v2752_v7  ;;  %v2361_v7 = vpop.f32.mrf.mxu0 }
 0x3dd   : > { %v2750_v21 = vpop.permute.xlu0 %2749  ;;  %3280 = vrot.lane.b32.xlu1 %v7145_v56, %s5601_s8  ;;  %v4216_v56 = vld [vmem:[%s8405_s4 + $0x30] sm:$0xff]  ;;  %v2407_v42 = vmul.f32 %v7100_v55, %v2361_v7 }
 0x3de   : > { %2820 = vst.msk [vmem:[#allocation5 + $0xd0] sm:$0xff] %vm2793_vm14, %v2750_v21  ;;  %5460 = vmatprep.subr.mxu1 %v4216_v56  ;;  %5396 = vmatprep.subr.mxu0 %v4216_v56 }
 0x3df   : > { %v2756_v0 = vpop.permute.xlu1 %2755  ;;  %3119 = vrot.lane.b32.xlu0 %v7305_v50, %s5599_s23  ;;  %5469 = vmatpush3.msra.mxu1 %v4216_v56 }
 0x3e0   : > { %2823 = vst.msk [vmem:[#allocation5 + $0xe8] sm:$0xff] %vm2793_vm14, %v2756_v0  ;;  %5461 = vmatprep.subr.mxu1 %v4215_v22  ;;  %5397 = vmatpush3.msra.mxu0 %v4216_v56 }
 0x3e1   : > { %v2754_v53 = vpop.permute.xlu0 %2753  ;;  %3473 = vrot.lane.b32.xlu1 %v7374_v28, %s5602_s18  ;;  %5470 = vmatpush3.msra.mxu1 %v4215_v22  ;;  %v4214_v28 = vld [vmem:[%s8405_s4 + $0x20] sm:$0xff] }
 0x3e2   : > { %2822 = vst.msk [vmem:[#allocation5 + $0xe0] sm:$0xff] %vm2793_vm14, %v2754_v53  ;;  %5462 = vmatprep.subr.mxu1 %v4214_v28  ;;  %5398 = vmatprep.subr.mxu0 %v4215_v22  ;;  %v2446_v53 = vadd.f32 %v7107_v61, %v2407_v42 }
 0x3e3   : > { %3282 = vrot.lane.b32.xlu0 %v7137_v34, %s5601_s8  ;;  %5471 = vmatpush3.msra.mxu1 %v4214_v28  ;;  %v4213_v34 = vld [vmem:[%s8405_s4 + $0x18] sm:$0xff] }
 0x3e4   : > { %5463 = vmatprep.subr.mxu1 %v4213_v34  ;;  %5399 = vmatpush3.msra.mxu0 %v4215_v22 }
 0x3e5   : > { %3667 = vrot.lane.b32.xlu1 %v7173_v48, %s5603_s13  ;;  %5472 = vmatpush3.msra.mxu1 %v4213_v34 }
 0x3e6   : > { %5400 = vmatprep.subr.mxu0 %v4214_v28 }
 0x3e7   : > { %v2760_v33 = vpop.permute.xlu1 %2759  ;;  %3475 = vrot.lane.b32.xlu0 %v7369_v29, %s5602_s18  ;;  %v4212_v29 = vld [vmem:[%s8405_s4 + $0x10] sm:$0xff]  ;;  %5401 = vmatpush3.msra.mxu0 %v4214_v28 }
 0x3e8   : > { %2825 = vst.msk [vmem:[#allocation5 + $0xf8] sm:$0xff] %vm2793_vm14, %v2760_v33  ;;  %5464 = vmatprep.subr.mxu1 %v4212_v29  ;;  %5402 = vmatprep.subr.mxu0 %v4213_v34 }
 0x3e9   : > { %3860 = vrot.lane.b32.xlu1 %v7163_v35, %s5604_s17  ;;  %v2758_v48 = vpop.permute.xlu0 %2757  ;;  %5473 = vmatpush3.msra.mxu1 %v4212_v29 }
 0x3ea   : > { %2824 = vst.msk [vmem:[#allocation5 + $0xf0] sm:$0xff] %vm2793_vm14, %v2758_v48  ;;  %5465 = vmatprep.subr.mxu1 %v4211_v57  ;;  %5403 = vmatpush3.msra.mxu0 %v4213_v34 }
 0x3eb   : > { %v2893_v30 = vpop.permute.xlu1 %2892  ;;  %3669 = vrot.lane.b32.xlu0 %v7165_v23, %s5603_s13  ;;  %5474 = vmatpush3.msra.mxu1 %v4211_v57  ;;  %v4210_v23 = vld [vmem:[%s8405_s4] sm:$0xff] }
 0x3ec   : > { %2988 = vst.msk [vmem:[#allocation5 + $0x8] sm:$0xff] %vm2986_vm15, %v2893_v30  ;;  %5466 = vmatprep.subr.mxu1 %v4210_v23  ;;  %5404 = vmatprep.subr.mxu0 %v4212_v29 }
 0x3ed   : > { %3862 = vrot.lane.b32.xlu1 %v7156_v18, %s5604_s17  ;;  %v2891_v62 = vpop.permute.xlu0 %2890  ;;  %5475 = vmatpush3.msra.mxu1 %v4210_v23 }
 0x3ee   : > { %2987 = vst.msk [vmem:[#allocation5] sm:$0xff] %vm2986_vm15, %v2891_v62  ;;  %5405 = vmatpush3.msra.mxu0 %v4212_v29 }
 0x3ef   : > { %v2897_v27 = vpop.permute.xlu1 %2896  ;;  %3284 = vrot.lane.b32.xlu0 %v7163_v35, %s5601_s8  ;;  %v2408_v35 = vmul.f32 %v5391_v63, %v7100_v55  ;;  %5406 = vmatprep.subr.mxu0 %v4211_v57  ;;  %v2478_v55 = vmax.f32 %v2446_v53, 0.0  ;;  %v3804_v53 = vld [vmem:[#allocation4 + $0xc1] sm:$0xff] }
 0x3f0   : > { %2990 = vst.msk [vmem:[#allocation5 + $0x18] sm:$0xff] %vm2986_vm15, %v2897_v27  ;;  %5407 = vmatpush3.msra.mxu0 %v4211_v57 }
 0x3f1   : > { %3286 = vrot.lane.b32.xlu1 %v7156_v18, %s5601_s8  ;;  %v2895_v47 = vpop.permute.xlu0 %2894  ;;  %v2447_v21 = vadd.f32 %v7107_v61, %v2408_v35  ;;  %5408 = vmatprep.subr.mxu0 %v4210_v23  ;;  %2567 = vst.msk [vmem:[#allocation4 + $0x181] sm:$0xff] %vm2480_vm12, %v2478_v55 }
 0x3f2   : > { %2989 = vst.msk [vmem:[#allocation5 + $0x10] sm:$0xff] %vm2986_vm15, %v2895_v47  ;;  %5409 = vmatpush3.msra.mxu0 %v4210_v23  ;;  %v3223_v23 = vld [vmem:[#allocation4 + $0x99] sm:$0xff] }
 0x3f3   : > { %v2901_v15 = vpop.permute.xlu1 %2900  ;;  %4053 = vrot.lane.b32.xlu0 %v7384_v14, %s5605_s15  ;;  %v2479_v26 = vmax.f32 %v2447_v21, 0.0 }
 0x3f4   : > { %2992 = vst.msk [vmem:[#allocation5 + $0x28] sm:$0xff] %vm2986_vm15, %v2901_v15  ;;  %v3802_v15 = vld [vmem:[#allocation4 + $0xa9] sm:$0xff] }
 0x3f5   : > { %4055 = vrot.lane.b32.xlu1 %v7379_v31, %s5605_s15  ;;  %v2899_v18 = vpop.permute.xlu0 %2898  ;;  %2568 = vst.msk [vmem:[#allocation4 + $0x189] sm:$0xff] %vm2480_vm12, %v2479_v26 }
 0x3f6   : > { %2991 = vst.msk [vmem:[#allocation5 + $0x20] sm:$0xff] %vm2986_vm15, %v2899_v18 }
 0x3f7   : > { %v2905_v0 = vpop.permute.xlu1 %2904  ;;  %3477 = vrot.lane.b32.xlu0 %v7384_v14, %s5602_s18 }
 0x3f8   : > { %2994 = vst.msk [vmem:[#allocation5 + $0x38] sm:$0xff] %vm2986_vm15, %v2905_v0 }
 0x3f9   : > { %3671 = vrot.lane.b32.xlu1 %v7195_v40, %s5603_s13  ;;  %v2903_v56 = vpop.permute.xlu0 %2902 }
 0x3fa   : > { %2993 = vst.msk [vmem:[#allocation5 + $0x30] sm:$0xff] %vm2986_vm15, %v2903_v56 }
 0x3fb   : > { %v2909_v22 = vpop.permute.xlu1 %2908  ;;  %3479 = vrot.lane.b32.xlu0 %v7379_v31, %s5602_s18 }
 0x3fc   : > { %2996 = vst.msk [vmem:[#allocation5 + $0x48] sm:$0xff] %vm2986_vm15, %v2909_v22 }
 0x3fd   : > { %3864 = vrot.lane.b32.xlu1 %v7185_v39, %s5604_s17  ;;  %v2907_v61 = vpop.permute.xlu0 %2906 }
 0x3fe   : > { %2995 = vst.msk [vmem:[#allocation5 + $0x40] sm:$0xff] %vm2986_vm15, %v2907_v61 }
 0x3ff   : > { %v2913_v40 = vpop.permute.xlu1 %2912  ;;  %3673 = vrot.lane.b32.xlu0 %v7187_v38, %s5603_s13 }
 0x400   : > { %2998 = vst.msk [vmem:[#allocation5 + $0x58] sm:$0xff] %vm2986_vm15, %v2913_v40 }
 0x401   : > { %3866 = vrot.lane.b32.xlu1 %v7180_v37, %s5604_s17  ;;  %v2911_v31 = vpop.permute.xlu0 %2910 }
 0x402   : > { %2997 = vst.msk [vmem:[#allocation5 + $0x50] sm:$0xff] %vm2986_vm15, %v2911_v31 }
 0x403   : > { %v2917_v14 = vpop.permute.xlu1 %2916  ;;  %3288 = vrot.lane.b32.xlu0 %v7185_v39, %s5601_s8 }
 0x404   : > { %3000 = vst.msk [vmem:[#allocation5 + $0x68] sm:$0xff] %vm2986_vm15, %v2917_v14 }
 0x405   : > { %3290 = vrot.lane.b32.xlu1 %v7180_v37, %s5601_s8  ;;  %v2915_v28 = vpop.permute.xlu0 %2914 }
 0x406   : > { %2999 = vst.msk [vmem:[#allocation5 + $0x60] sm:$0xff] %vm2986_vm15, %v2915_v28  ;;  %v3806_v28 = vld [vmem:[#allocation4 + $0xd9] sm:$0xff] }
 0x407   : > { %v2921_v38 = vpop.permute.xlu1 %2920  ;;  %4057 = vrot.lane.b32.xlu0 %v7394_v25, %s5605_s15 }
 0x408   : > { %3002 = vst.msk [vmem:[#allocation5 + $0x78] sm:$0xff] %vm2986_vm15, %v2921_v38 }
 0x409   : > { %4059 = vrot.lane.b32.xlu1 %v7389_v49, %s5605_s15  ;;  %v2919_v33 = vpop.permute.xlu0 %2918 }
 0x40a   : > { %3001 = vst.msk [vmem:[#allocation5 + $0x70] sm:$0xff] %vm2986_vm15, %v2919_v33 }
 0x40b   : > { %v2925_v39 = vpop.permute.xlu1 %2924  ;;  %3481 = vrot.lane.b32.xlu0 %v7394_v25, %s5602_s18 }
 0x40c   : > { %3004 = vst.msk [vmem:[#allocation5 + $0x88] sm:$0xff] %vm2986_vm15, %v2925_v39 }
 0x40d   : > { %3675 = vrot.lane.b32.xlu1 %v7217_v4, %s5603_s13  ;;  %v2923_v37 = vpop.permute.xlu0 %2922 }
 0x40e   : > { %3003 = vst.msk [vmem:[#allocation5 + $0x80] sm:$0xff] %vm2986_vm15, %v2923_v37 }
 0x40f   : > { %v2929_v34 = vpop.permute.xlu1 %2928  ;;  %3483 = vrot.lane.b32.xlu0 %v7389_v49, %s5602_s18 }
 0x410   : > { %3006 = vst.msk [vmem:[#allocation5 + $0x98] sm:$0xff] %vm2986_vm15, %v2929_v34 }
 0x411   : > { %3868 = vrot.lane.b32.xlu1 %v7207_v3, %s5604_s17  ;;  %v2927_v48 = vpop.permute.xlu0 %2926 }
 0x412   : > { %3005 = vst.msk [vmem:[#allocation5 + $0x90] sm:$0xff] %vm2986_vm15, %v2927_v48 }
 0x413   : > { %v2933_v25 = vpop.permute.xlu1 %2932  ;;  %3677 = vrot.lane.b32.xlu0 %v7209_v2, %s5603_s13 }
 0x414   : > { %3008 = vst.msk [vmem:[#allocation5 + $0xa8] sm:$0xff] %vm2986_vm15, %v2933_v25 }
 0x415   : > { %3870 = vrot.lane.b32.xlu1 %v7202_v60, %s5604_s17  ;;  %v2931_v4 = vpop.permute.xlu0 %2930 }
 0x416   : > { %3007 = vst.msk [vmem:[#allocation5 + $0xa0] sm:$0xff] %vm2986_vm15, %v2931_v4 }
 0x417   : > { %v2937_v49 = vpop.permute.xlu1 %2936  ;;  %3292 = vrot.lane.b32.xlu0 %v7207_v3, %s5601_s8 }
 0x418   : > { %3010 = vst.msk [vmem:[#allocation5 + $0xb8] sm:$0xff] %vm2986_vm15, %v2937_v49 }
 0x419   : > { %3294 = vrot.lane.b32.xlu1 %v7202_v60, %s5601_s8  ;;  %v2935_v29 = vpop.permute.xlu0 %2934 }
 0x41a   : > { %3009 = vst.msk [vmem:[#allocation5 + $0xb0] sm:$0xff] %vm2986_vm15, %v2935_v29  ;;  %v3808_v29 = vld [vmem:[#allocation4 + $0xf1] sm:$0xff] }
 0x41b   : > { %v2941_v2 = vpop.permute.xlu1 %2940  ;;  %4061 = vrot.lane.b32.xlu0 %v7402_v36, %s5605_s15 }
 0x41c   : > { %3012 = vst.msk [vmem:[#allocation5 + $0xc8] sm:$0xff] %vm2986_vm15, %v2941_v2 }
 0x41d   : > { %4063 = vrot.lane.b32.xlu1 %v7398_v46, %s5605_s15  ;;  %v2939_v30 = vpop.permute.xlu0 %2938 }
 0x41e   : > { %3011 = vst.msk [vmem:[#allocation5 + $0xc0] sm:$0xff] %vm2986_vm15, %v2939_v30 }
 0x41f   : > { %v2945_v3 = vpop.permute.xlu1 %2944  ;;  %3485 = vrot.lane.b32.xlu0 %v7402_v36, %s5602_s18 }
 0x420   : > { %3014 = vst.msk [vmem:[#allocation5 + $0xd8] sm:$0xff] %vm2986_vm15, %v2945_v3  ;;  %v3809_v3 = vld [vmem:[#allocation4 + $0xf9] sm:$0xff] }
 0x421   : > { %3679 = vrot.lane.b32.xlu1 %v7239_v24, %s5603_s13  ;;  %v2943_v60 = vpop.permute.xlu0 %2942 }
 0x422   : > { %3013 = vst.msk [vmem:[#allocation5 + $0xd0] sm:$0xff] %vm2986_vm15, %v2943_v60 }
 0x423   : > { %v2949_v57 = vpop.permute.xlu1 %2948  ;;  %3487 = vrot.lane.b32.xlu0 %v7398_v46, %s5602_s18 }
 0x424   : > { %3016 = vst.msk [vmem:[#allocation5 + $0xe8] sm:$0xff] %vm2986_vm15, %v2949_v57 }
 0x425   : > { %3872 = vrot.lane.b32.xlu1 %v7229_v20, %s5604_s17  ;;  %v2947_v62 = vpop.permute.xlu0 %2946 }
 0x426   : > { %3015 = vst.msk [vmem:[#allocation5 + $0xe0] sm:$0xff] %vm2986_vm15, %v2947_v62 }
 0x427   : > { %v2953_v36 = vpop.permute.xlu1 %2952  ;;  %3681 = vrot.lane.b32.xlu0 %v7231_v17, %s5603_s13 }
 0x428   : > { %3018 = vst.msk [vmem:[#allocation5 + $0xf8] sm:$0xff] %vm2986_vm15, %v2953_v36 }
 0x429   : > { %3874 = vrot.lane.b32.xlu1 %v7224_v10, %s5604_s17  ;;  %v2951_v24 = vpop.permute.xlu0 %2950 }
 0x42a   : > { %3017 = vst.msk [vmem:[#allocation5 + $0xf0] sm:$0xff] %vm2986_vm15, %v2951_v24  ;;  %v3424_v24 = vld [vmem:[#allocation4 + $0xfa] sm:$0xff] }
 0x42b   : > { %v3086_v46 = vpop.permute.xlu1 %3085  ;;  %3296 = vrot.lane.b32.xlu0 %v7229_v20, %s5601_s8 }
 0x42c   : > { %3181 = vst.msk [vmem:[#allocation5 + $0x8] sm:$0xff] %vm3179_vm0, %v3086_v46 }
 0x42d   : > { %3298 = vrot.lane.b32.xlu1 %v3223_v23, %s5601_s8  ;;  %v3084_v27 = vpop.permute.xlu0 %3083 }
 0x42e   : > { %3180 = vst.msk [vmem:[#allocation5] sm:$0xff] %vm3179_vm0, %v3084_v27 }
 0x42f   : > { %v3090_v17 = vpop.permute.xlu1 %3089  ;;  %4065 = vrot.lane.b32.xlu0 %v7412_v59, %s5605_s15 }
 0x430   : > { %3183 = vst.msk [vmem:[#allocation5 + $0x18] sm:$0xff] %vm3179_vm0, %v3090_v17  ;;  %v3810_v17 = vld [vmem:[#allocation4 + $0x109] sm:$0xff] }
 0x431   : > { %4067 = vrot.lane.b32.xlu1 %v7407_v45, %s5605_s15  ;;  %v3088_v10 = vpop.permute.xlu0 %3087 }
 0x432   : > { %3182 = vst.msk [vmem:[#allocation5 + $0x10] sm:$0xff] %vm3179_vm0, %v3088_v10 }
 0x433   : > { %v3094_v20 = vpop.permute.xlu1 %3093  ;;  %3489 = vrot.lane.b32.xlu0 %v7412_v59, %s5602_s18 }
 0x434   : > { %3185 = vst.msk [vmem:[#allocation5 + $0x28] sm:$0xff] %vm3179_vm0, %v3094_v20 }
 0x435   : > { %3683 = vrot.lane.b32.xlu1 %v7257_v19, %s5603_s13  ;;  %v3092_v47 = vpop.permute.xlu0 %3091  ;;  %v3803_v19 = vld [vmem:[#allocation4 + $0xb1] sm:$0xff] }
 0x436   : > { %3184 = vst.msk [vmem:[#allocation5 + $0x20] sm:$0xff] %vm3179_vm0, %v3092_v47 }
 0x437   : > { %v3098_v63 = vpop.permute.xlu1 %3097  ;;  %3491 = vrot.lane.b32.xlu0 %v7407_v45, %s5602_s18 }
 0x438   : > { %3187 = vst.msk [vmem:[#allocation5 + $0x38] sm:$0xff] %vm3179_vm0, %v3098_v63  ;;  %v4003_v63 = vld [vmem:[#allocation4 + $0x10a] sm:$0xff] }
 0x439   : > { %3876 = vrot.lane.b32.xlu1 %v3802_v15, %s5604_s17  ;;  %v3096_v35 = vpop.permute.xlu0 %3095 }
 0x43a   : > { %3186 = vst.msk [vmem:[#allocation5 + $0x30] sm:$0xff] %vm3179_vm0, %v3096_v35 }
 0x43b   : > { %v3102_v59 = vpop.permute.xlu1 %3101  ;;  %3685 = vrot.lane.b32.xlu0 %v7250_v11, %s5603_s13 }
 0x43c   : > { %3189 = vst.msk [vmem:[#allocation5 + $0x48] sm:$0xff] %vm3179_vm0, %v3102_v59  ;;  %v3811_v59 = vld [vmem:[#allocation4 + $0x111] sm:$0xff] }
 0x43d   : > { %3878 = vrot.lane.b32.xlu1 %v3803_v19, %s5604_s17  ;;  %v3100_v7 = vpop.permute.xlu0 %3099 }
 0x43e   : > { %3188 = vst.msk [vmem:[#allocation5 + $0x40] sm:$0xff] %vm3179_vm0, %v3100_v7 }
 0x43f   : > { %v3106_v45 = vpop.permute.xlu1 %3105  ;;  %3300 = vrot.lane.b32.xlu0 %v3802_v15, %s5601_s8 }
 0x440   : > { %3191 = vst.msk [vmem:[#allocation5 + $0x58] sm:$0xff] %vm3179_vm0, %v3106_v45 }
 0x441   : > { %3302 = vrot.lane.b32.xlu1 %v3803_v19, %s5601_s8  ;;  %v3104_v18 = vpop.permute.xlu0 %3103 }
 0x442   : > { %3190 = vst.msk [vmem:[#allocation5 + $0x50] sm:$0xff] %vm3179_vm0, %v3104_v18  ;;  %v3426_v18 = vld [vmem:[#allocation4 + $0x112] sm:$0xff] }
 0x443   : > { %v3110_v21 = vpop.permute.xlu1 %3109  ;;  %4069 = vrot.lane.b32.xlu0 %v7420_v1, %s5605_s15 }
 0x444   : > { %3193 = vst.msk [vmem:[#allocation5 + $0x68] sm:$0xff] %vm3179_vm0, %v3110_v21 }
 0x445   : > { %4071 = vrot.lane.b32.xlu1 %v7416_v58, %s5605_s15  ;;  %v3108_v11 = vpop.permute.xlu0 %3107 }
 0x446   : > { %3192 = vst.msk [vmem:[#allocation5 + $0x60] sm:$0xff] %vm3179_vm0, %v3108_v11 }
 0x447   : > { %v3114_v42 = vpop.permute.xlu1 %3113  ;;  %3493 = vrot.lane.b32.xlu0 %v7420_v1, %s5602_s18 }
 0x448   : > { %3195 = vst.msk [vmem:[#allocation5 + $0x78] sm:$0xff] %vm3179_vm0, %v3114_v42 }
 0x449   : > { %3687 = vrot.lane.b32.xlu1 %v7273_v52, %s5603_s13  ;;  %v3112_v0 = vpop.permute.xlu0 %3111  ;;  %v3805_v52 = vld [vmem:[#allocation4 + $0xc9] sm:$0xff] }
 0x44a   : > { %3194 = vst.msk [vmem:[#allocation5 + $0x70] sm:$0xff] %vm3179_vm0, %v3112_v0 }
 0x44b   : > { %v3118_v26 = vpop.permute.xlu1 %3117  ;;  %3495 = vrot.lane.b32.xlu0 %v7416_v58, %s5602_s18 }
 0x44c   : > { %3197 = vst.msk [vmem:[#allocation5 + $0x88] sm:$0xff] %vm3179_vm0, %v3118_v26  ;;  %v3812_v26 = vld [vmem:[#allocation4 + $0x121] sm:$0xff] }
 0x44d   : > { %3880 = vrot.lane.b32.xlu1 %v3804_v53, %s5604_s17  ;;  %v3116_v56 = vpop.permute.xlu0 %3115 }
 0x44e   : > { %3196 = vst.msk [vmem:[#allocation5 + $0x80] sm:$0xff] %vm3179_vm0, %v3116_v56 }
 0x44f   : > { %v3281_v1 = vpop.permute.xlu1 %3280  ;;  %3689 = vrot.lane.b32.xlu0 %v7266_v51, %s5603_s13 }
 0x450   : > { %3375 = vst.msk [vmem:[#allocation5 + $0x10] sm:$0xff] %vm3372_vm1, %v3281_v1 }
 0x451   : > { %3882 = vrot.lane.b32.xlu1 %v3805_v52, %s5604_s17  ;;  %v3120_v55 = vpop.permute.xlu0 %3119 }
 0x452   : > { %3198 = vst.msk [vmem:[#allocation5 + $0x90] sm:$0xff] %vm3179_vm0, %v3120_v55 }
 0x453   : > { %v3474_v58 = vpop.permute.xlu1 %3473  ;;  %3304 = vrot.lane.b32.xlu0 %v3804_v53, %s5601_s8 }
 0x454   : > { %3568 = vst.msk [vmem:[#allocation5 + $0x10] sm:$0xff] %vm3565_vm2, %v3474_v58  ;;  %v4005_v58 = vld [vmem:[#allocation4 + $0x122] sm:$0xff] }
 0x455   : > { %3306 = vrot.lane.b32.xlu1 %v3805_v52, %s5601_s8  ;;  %v3283_v22 = vpop.permute.xlu0 %3282 }
 0x456   : > { %3376 = vst.msk [vmem:[#allocation5 + $0x18] sm:$0xff] %vm3372_vm1, %v3283_v22 }
 0x457   : > { %v3668_v51 = vpop.permute.xlu1 %3667  ;;  %4073 = vrot.lane.b32.xlu0 %v7430_v6, %s5605_s15 }
 0x458   : > { %3762 = vst.msk [vmem:[#allocation5 + $0x10] sm:$0xff] %vm3759_vm3, %v3668_v51  ;;  %v3813_v51 = vld [vmem:[#allocation4 + $0x129] sm:$0xff] }
 0x459   : > { %4075 = vrot.lane.b32.xlu1 %v7425_v5, %s5605_s15  ;;  %v3476_v61 = vpop.permute.xlu0 %3475 }
 0x45a   : > { %3569 = vst.msk [vmem:[#allocation5 + $0x18] sm:$0xff] %vm3565_vm2, %v3476_v61 }
 0x45b   : > { %v3861_v40 = vpop.permute.xlu1 %3860  ;;  %3497 = vrot.lane.b32.xlu0 %v7430_v6, %s5602_s18 }
 0x45c   : > { %3955 = vst.msk [vmem:[#allocation5 + $0x10] sm:$0xff] %vm3952_vm4, %v3861_v40 }
 0x45d   : > { %3691 = vrot.lane.b32.xlu1 %v7289_v16, %s5603_s13  ;;  %v3670_v31 = vpop.permute.xlu0 %3669  ;;  %v3807_v16 = vld [vmem:[#allocation4 + $0xe1] sm:$0xff] }
 0x45e   : > { %3763 = vst.msk [vmem:[#allocation5 + $0x18] sm:$0xff] %vm3759_vm3, %v3670_v31  ;;  %v3428_v31 = vld [vmem:[#allocation4 + $0x12a] sm:$0xff] }
 0x45f   : > { %v3863_v14 = vpop.permute.xlu1 %3862  ;;  %3499 = vrot.lane.b32.xlu0 %v7425_v5, %s5602_s18 }
 0x460   : > { %3956 = vst.msk [vmem:[#allocation5 + $0x18] sm:$0xff] %vm3952_vm4, %v3863_v14 }
 0x461   : > { %3884 = vrot.lane.b32.xlu1 %v3806_v28, %s5604_s17  ;;  %v3285_v38 = vpop.permute.xlu0 %3284 }
 0x462   : > { %3377 = vst.msk [vmem:[#allocation5 + $0x20] sm:$0xff] %vm3372_vm1, %v3285_v38  ;;  %v3043_v38 = vld [vmem:[#allocation4 + $0x138] sm:$0xff] }
 0x463   : > { %v3287_v6 = vpop.permute.xlu1 %3286  ;;  %3693 = vrot.lane.b32.xlu0 %v7282_v8, %s5603_s13 }
 0x464   : > { %3378 = vst.msk [vmem:[#allocation5 + $0x28] sm:$0xff] %vm3372_vm1, %v3287_v6 }
 0x465   : > { %3886 = vrot.lane.b32.xlu1 %v3807_v16, %s5604_s17  ;;  %v4054_v33 = vpop.permute.xlu0 %4053 }
 0x466   : > { %4148 = vst.msk [vmem:[#allocation5 + $0x10] sm:$0xff] %vm4145_vm5, %v4054_v33  ;;  %v3814_v33 = vld [vmem:[#allocation4 + $0x139] sm:$0xff] }
 0x467   : > { %v4056_v5 = vpop.permute.xlu1 %4055  ;;  %3308 = vrot.lane.b32.xlu0 %v3806_v28, %s5601_s8 }
 0x468   : > { %4149 = vst.msk [vmem:[#allocation5 + $0x18] sm:$0xff] %vm4145_vm5, %v4056_v5 }
 0x469   : > { %3310 = vrot.lane.b32.xlu1 %v3807_v16, %s5601_s8  ;;  %v3478_v39 = vpop.permute.xlu0 %3477 }
 0x46a   : > { %3570 = vst.msk [vmem:[#allocation5 + $0x20] sm:$0xff] %vm3565_vm2, %v3478_v39 }
 0x46b   : > { %v3672_v8 = vpop.permute.xlu1 %3671  ;;  %4077 = vrot.lane.b32.xlu0 %v7438_v13, %s5605_s15 }
 0x46c   : > { %3764 = vst.msk [vmem:[#allocation5 + $0x20] sm:$0xff] %vm3759_vm3, %v3672_v8  ;;  %v3622_v8 = vld [vmem:[#allocation4 + $0x140] sm:$0xff] }
 0x46d   : > { %4079 = vrot.lane.b32.xlu1 %v7434_v9, %s5605_s15  ;;  %v3480_v37 = vpop.permute.xlu0 %3479  ;;  %v4180_v34 = vld [vmem:[#allocation5 + $0x10] sm:$0xff] }
 0x46e   : > { %3571 = vst.msk [vmem:[#allocation5 + $0x28] sm:$0xff] %vm3565_vm2, %v3480_v37  ;;  %5413 = vmatprep.mubr.msk.f32.mxu1 %vm4219_vm6, %v4180_v34 }
 0x46f   : > { %v3865_v48 = vpop.permute.xlu1 %3864  ;;  %3501 = vrot.lane.b32.xlu0 %v7438_v13, %s5602_s18  ;;  %v4181_v25 = vld [vmem:[#allocation5 + $0x18] sm:$0xff] }
 0x470   : > { %3957 = vst.msk [vmem:[#allocation5 + $0x20] sm:$0xff] %vm3952_vm4, %v3865_v48  ;;  %5414 = vmatmul.mubr.msk.f32.vlgmr.msra.gmra.mxu1 %vm4219_vm6, %v4181_v25 }
 0x471   : > { %3695 = vrot.lane.b32.xlu1 %v7305_v50, %s5603_s13  ;;  %v3674_v4 = vpop.permute.xlu0 %3673 }
 0x472   : > { %3765 = vst.msk [vmem:[#allocation5 + $0x28] sm:$0xff] %vm3759_vm3, %v3674_v4  ;;  %v4007_v4 = vld [vmem:[#allocation4 + $0x13a] sm:$0xff] }
 0x473   : > { %v3867_v49 = vpop.permute.xlu1 %3866  ;;  %3503 = vrot.lane.b32.xlu0 %v7434_v9, %s5602_s18 }
 0x474   : > { %3958 = vst.msk [vmem:[#allocation5 + $0x28] sm:$0xff] %vm3952_vm4, %v3867_v49 }
 0x475   : > { %3888 = vrot.lane.b32.xlu1 %v3808_v29, %s5604_s17  ;;  %v3289_v13 = vpop.permute.xlu0 %3288 }
 0x476   : > { %3379 = vst.msk [vmem:[#allocation5 + $0x30] sm:$0xff] %vm3372_vm1, %v3289_v13 }
 0x477   : > { %v3291_v2 = vpop.permute.xlu1 %3290  ;;  %3697 = vrot.lane.b32.xlu0 %v7298_v44, %s5603_s13 }
 0x478   : > { %3380 = vst.msk [vmem:[#allocation5 + $0x38] sm:$0xff] %vm3372_vm1, %v3291_v2 }
 0x479   : > { %3312 = vrot.lane.b32.xlu1 %v3808_v29, %s5601_s8  ;;  %v4058_v50 = vpop.permute.xlu0 %4057  ;;  %v3815_v29 = vld [vmem:[#allocation4 + $0x141] sm:$0xff] }
 0x47a   : > { %4150 = vst.msk [vmem:[#allocation5 + $0x20] sm:$0xff] %vm4145_vm5, %v4058_v50 }
 0x47b   : > { %v4060_v9 = vpop.permute.xlu1 %4059  ;;  %3121 = vrot.lane.b32.xlu0 %v7298_v44, %s5599_s23 }
 0x47c   : > { %4151 = vst.msk [vmem:[#allocation5 + $0x28] sm:$0xff] %vm4145_vm5, %v4060_v9  ;;  %v3430_v9 = vld [vmem:[#allocation4 + $0x142] sm:$0xff] }
 0x47d   : > { %4081 = vrot.lane.b32.xlu1 %v7445_v43, %s5605_s15  ;;  %v3482_v30 = vpop.permute.xlu0 %3481 }
 0x47e   : > { %3572 = vst.msk [vmem:[#allocation5 + $0x30] sm:$0xff] %vm3565_vm2, %v3482_v30 }
 0x47f   : > { %v3676_v60 = vpop.permute.xlu1 %3675  ;;  %3890 = vrot.lane.b32.xlu0 %v3809_v3, %s5604_s17 }
 0x480   : > { %3766 = vst.msk [vmem:[#allocation5 + $0x30] sm:$0xff] %vm3759_vm3, %v3676_v60  ;;  %v3045_v60 = vld [vmem:[#allocation4 + $0x150] sm:$0xff] }
 0x481   : > { %3505 = vrot.lane.b32.xlu1 %v7445_v43, %s5602_s18  ;;  %v3484_v57 = vpop.permute.xlu0 %3483  ;;  %v4182_v62 = vld [vmem:[#allocation5 + $0x20] sm:$0xff] }
 0x482   : > { %3573 = vst.msk [vmem:[#allocation5 + $0x38] sm:$0xff] %vm3565_vm2, %v3484_v57  ;;  %5416 = vmatprep.mubr.msk.f32.mxu1 %vm4219_vm6, %v4182_v62 }
 0x483   : > { %v3869_v44 = vpop.permute.xlu1 %3868  ;;  %3314 = vrot.lane.b32.xlu0 %v3809_v3, %s5601_s8  ;;  %v4183_v36 = vld [vmem:[#allocation5 + $0x28] sm:$0xff] }
 0x484   : > { %3959 = vst.msk [vmem:[#allocation5 + $0x30] sm:$0xff] %vm3952_vm4, %v3869_v44  ;;  %5417 = vmatmul.mubr.msk.f32.gmra.mxu1 %vm4219_vm6, %v4183_v36 }
 0x485   : > { %3507 = vrot.lane.b32.xlu1 %v3424_v24, %s5602_s18  ;;  %v3678_v46 = vpop.permute.xlu0 %3677 }
 0x486   : > { %3767 = vst.msk [vmem:[#allocation5 + $0x38] sm:$0xff] %vm3759_vm3, %v3678_v46 }
 0x487   : > { %v3871_v43 = vpop.permute.xlu1 %3870  ;;  %4083 = vrot.lane.b32.xlu0 %v3424_v24, %s5605_s15  ;;  %v3816_v24 = vld [vmem:[#allocation4 + $0x151] sm:$0xff] }
 0x488   : > { %3960 = vst.msk [vmem:[#allocation5 + $0x38] sm:$0xff] %vm3952_vm4, %v3871_v43  ;;  %v3624_v43 = vld [vmem:[#allocation4 + $0x158] sm:$0xff] }
 0x489   : > { %3123 = vrot.lane.b32.xlu1 %v7321_v54, %s5599_s23  ;;  %v3293_v23 = vpop.permute.xlu0 %3292 }
 0x48a   : > { %3381 = vst.msk [vmem:[#allocation5 + $0x40] sm:$0xff] %vm3372_vm1, %v3293_v23 }
 0x48b   : > { %v3295_v27 = vpop.permute.xlu1 %3294  ;;  %3699 = vrot.lane.b32.xlu0 %v7321_v54, %s5603_s13 }
 0x48c   : > { %3382 = vst.msk [vmem:[#allocation5 + $0x48] sm:$0xff] %vm3372_vm1, %v3295_v27 }
 0x48d   : > { %3892 = vrot.lane.b32.xlu1 %v3810_v17, %s5604_s17  ;;  %v4062_v10 = vpop.permute.xlu0 %4061 }
 0x48e   : > { %4152 = vst.msk [vmem:[#allocation5 + $0x30] sm:$0xff] %vm4145_vm5, %v4062_v10  ;;  %v4009_v10 = vld [vmem:[#allocation4 + $0x152] sm:$0xff] }
 0x48f   : > { %v4064_v20 = vpop.permute.xlu1 %4063  ;;  %3701 = vrot.lane.b32.xlu0 %v7314_v32, %s5603_s13 }
 0x490   : > { %4153 = vst.msk [vmem:[#allocation5 + $0x38] sm:$0xff] %vm4145_vm5, %v4064_v20 }
 0x491   : > { %3316 = vrot.lane.b32.xlu1 %v3810_v17, %s5601_s8  ;;  %v3486_v47 = vpop.permute.xlu0 %3485 }
 0x492   : > { %3574 = vst.msk [vmem:[#allocation5 + $0x40] sm:$0xff] %vm3565_vm2, %v3486_v47  ;;  %v3817_v47 = vld [vmem:[#allocation4 + $0x159] sm:$0xff] }
 0x493   : > { %v3680_v54 = vpop.permute.xlu1 %3679  ;;  %3125 = vrot.lane.b32.xlu0 %v7314_v32, %s5599_s23 }
 0x494   : > { %3768 = vst.msk [vmem:[#allocation5 + $0x40] sm:$0xff] %vm3759_vm3, %v3680_v54 }
 0x495   : > { %4085 = vrot.lane.b32.xlu1 %v4003_v63, %s5605_s15  ;;  %v3488_v15 = vpop.permute.xlu0 %3487  ;;  %v4184_v35 = vld [vmem:[#allocation5 + $0x30] sm:$0xff] }
 0x496   : > { %3575 = vst.msk [vmem:[#allocation5 + $0x48] sm:$0xff] %vm3565_vm2, %v3488_v15  ;;  %5419 = vmatprep.mubr.msk.f32.mxu1 %vm4219_vm6, %v4184_v35  ;;  %v3432_v35 = vld [vmem:[#allocation4 + $0x15a] sm:$0xff] }
 0x497   : > { %v3873_v19 = vpop.permute.xlu1 %3872  ;;  %3894 = vrot.lane.b32.xlu0 %v3811_v59, %s5604_s17  ;;  %v4185_v7 = vld [vmem:[#allocation5 + $0x38] sm:$0xff] }
 0x498   : > { %3961 = vst.msk [vmem:[#allocation5 + $0x40] sm:$0xff] %vm3952_vm4, %v3873_v19  ;;  %5420 = vmatmul.mubr.msk.f32.gmra.mxu1 %vm4219_vm6, %v4185_v7 }
 0x499   : > { %3509 = vrot.lane.b32.xlu1 %v4003_v63, %s5602_s18  ;;  %v3682_v32 = vpop.permute.xlu0 %3681 }
 0x49a   : > { %3769 = vst.msk [vmem:[#allocation5 + $0x48] sm:$0xff] %vm3759_vm3, %v3682_v32 }
 0x49b   : > { %v3875_v45 = vpop.permute.xlu1 %3874  ;;  %3318 = vrot.lane.b32.xlu0 %v3811_v59, %s5601_s8 }
 0x49c   : > { %3962 = vst.msk [vmem:[#allocation5 + $0x48] sm:$0xff] %vm3952_vm4, %v3875_v45  ;;  %v3047_v45 = vld [vmem:[#allocation4 + $0x168] sm:$0xff] }
 0x49d   : > { %3511 = vrot.lane.b32.xlu1 %v3426_v18, %s5602_s18  ;;  %v3297_v21 = vpop.permute.xlu0 %3296 }
 0x49e   : > { %3383 = vst.msk [vmem:[#allocation5 + $0x50] sm:$0xff] %vm3372_vm1, %v3297_v21 }
 0x49f   : > { %v3299_v11 = vpop.permute.xlu1 %3298  ;;  %4087 = vrot.lane.b32.xlu0 %v3426_v18, %s5605_s15 }
 0x4a0   : > { %3384 = vst.msk [vmem:[#allocation5 + $0x58] sm:$0xff] %vm3372_vm1, %v3299_v11  ;;  %v3818_v11 = vld [vmem:[#allocation4 + $0x169] sm:$0xff] }
 0x4a1   : > { %3127 = vrot.lane.b32.xlu1 %v7337_v41, %s5599_s23  ;;  %v4066_v42 = vpop.permute.xlu0 %4065 }
 0x4a2   : > { %4154 = vst.msk [vmem:[#allocation5 + $0x40] sm:$0xff] %vm4145_vm5, %v4066_v42 }
 0x4a3   : > { %v4068_v0 = vpop.permute.xlu1 %4067  ;;  %3703 = vrot.lane.b32.xlu0 %v7337_v41, %s5603_s13 }
 0x4a4   : > { %4155 = vst.msk [vmem:[#allocation5 + $0x48] sm:$0xff] %vm4145_vm5, %v4068_v0  ;;  %v3626_v0 = vld [vmem:[#allocation4 + $0x170] sm:$0xff] }
 0x4a5   : > { %3896 = vrot.lane.b32.xlu1 %v3812_v26, %s5604_s17  ;;  %v3490_v53 = vpop.permute.xlu0 %3489 }
 0x4a6   : > { %3576 = vst.msk [vmem:[#allocation5 + $0x50] sm:$0xff] %vm3565_vm2, %v3490_v53 }
 0x4a7   : > { %v3684_v56 = vpop.permute.xlu1 %3683  ;;  %3705 = vrot.lane.b32.xlu0 %v7330_v12, %s5603_s13 }
 0x4a8   : > { %3770 = vst.msk [vmem:[#allocation5 + $0x50] sm:$0xff] %vm3759_vm3, %v3684_v56 }
 0x4a9   : > { %3320 = vrot.lane.b32.xlu1 %v3812_v26, %s5601_s8  ;;  %v3492_v1 = vpop.permute.xlu0 %3491  ;;  %v4186_v52 = vld [vmem:[#allocation5 + $0x40] sm:$0xff] }
 0x4aa   : > { %3577 = vst.msk [vmem:[#allocation5 + $0x58] sm:$0xff] %vm3565_vm2, %v3492_v1  ;;  %5422 = vmatprep.mubr.msk.f32.mxu1 %vm4219_vm6, %v4186_v52  ;;  %v4011_v1 = vld [vmem:[#allocation4 + $0x16a] sm:$0xff] }
 0x4ab   : > { %v3877_v41 = vpop.permute.xlu1 %3876  ;;  %3129 = vrot.lane.b32.xlu0 %v7330_v12, %s5599_s23  ;;  %v4187_v55 = vld [vmem:[#allocation5 + $0x48] sm:$0xff] }
 0x4ac   : > { %3963 = vst.msk [vmem:[#allocation5 + $0x50] sm:$0xff] %vm3952_vm4, %v3877_v41  ;;  %5423 = vmatmul.mubr.msk.f32.gmra.mxu1 %vm4219_vm6, %v4187_v55  ;;  %v3819_v41 = vld [vmem:[#allocation4 + $0x171] sm:$0xff] }
 0x4ad   : > { %4089 = vrot.lane.b32.xlu1 %v4005_v58, %s5605_s15  ;;  %v3686_v22 = vpop.permute.xlu0 %3685 }
 0x4ae   : > { %3771 = vst.msk [vmem:[#allocation5 + $0x58] sm:$0xff] %vm3759_vm3, %v3686_v22 }
 0x4af   : > { %v3879_v61 = vpop.permute.xlu1 %3878  ;;  %3898 = vrot.lane.b32.xlu0 %v3813_v51, %s5604_s17 }
 0x4b0   : > { %3964 = vst.msk [vmem:[#allocation5 + $0x58] sm:$0xff] %vm3952_vm4, %v3879_v61  ;;  %v3212_v61 = vld [vmem:[#allocation4 + $0x19] sm:$0xff] }
 0x4b1   : > { %3513 = vrot.lane.b32.xlu1 %v4005_v58, %s5602_s18  ;;  %v3301_v12 = vpop.permute.xlu0 %3300 }
 0x4b2   : > { %3385 = vst.msk [vmem:[#allocation5 + $0x60] sm:$0xff] %vm3372_vm1, %v3301_v12 }
 0x4b3   : > { %v3303_v40 = vpop.permute.xlu1 %3302  ;;  %3322 = vrot.lane.b32.xlu0 %v3813_v51, %s5601_s8 }
 0x4b4   : > { %3386 = vst.msk [vmem:[#allocation5 + $0x68] sm:$0xff] %vm3372_vm1, %v3303_v40  ;;  %v4012_v40 = vld [vmem:[#allocation4 + $0x172] sm:$0xff] }
 0x4b5   : > { %3515 = vrot.lane.b32.xlu1 %v3428_v31, %s5602_s18  ;;  %v4070_v14 = vpop.permute.xlu0 %4069 }
 0x4b6   : > { %4156 = vst.msk [vmem:[#allocation5 + $0x50] sm:$0xff] %vm4145_vm5, %v4070_v14  ;;  %v3627_v14 = vld [vmem:[#allocation4 + $0x180] sm:$0xff] }
 0x4b7   : > { %v4072_v28 = vpop.permute.xlu1 %4071  ;;  %4091 = vrot.lane.b32.xlu0 %v3428_v31, %s5605_s15 }
 0x4b8   : > { %4157 = vst.msk [vmem:[#allocation5 + $0x58] sm:$0xff] %vm4145_vm5, %v4072_v28 }
 0x4b9   : > { %3131 = vrot.lane.b32.xlu1 %v3043_v38, %s5599_s23  ;;  %v3494_v6 = vpop.permute.xlu0 %3493 }
 0x4ba   : > { %3578 = vst.msk [vmem:[#allocation5 + $0x60] sm:$0xff] %vm3565_vm2, %v3494_v6 }
 0x4bb   : > { %v3688_v16 = vpop.permute.xlu1 %3687  ;;  %3707 = vrot.lane.b32.xlu0 %v3043_v38, %s5603_s13 }
 0x4bc   : > { %3772 = vst.msk [vmem:[#allocation5 + $0x60] sm:$0xff] %vm3759_vm3, %v3688_v16  ;;  %v3213_v16 = vld [vmem:[#allocation4 + $0x21] sm:$0xff] }
 0x4bd   : > { %3900 = vrot.lane.b32.xlu1 %v3814_v33, %s5604_s17  ;;  %v3496_v5 = vpop.permute.xlu0 %3495  ;;  %v4188_v39 = vld [vmem:[#allocation5 + $0x50] sm:$0xff] }
 0x4be   : > { %3579 = vst.msk [vmem:[#allocation5 + $0x68] sm:$0xff] %vm3565_vm2, %v3496_v5  ;;  %5425 = vmatprep.mubr.msk.f32.mxu1 %vm4219_vm6, %v4188_v39  ;;  %v3628_v39 = vld [vmem:[#allocation4 + $0x188] sm:$0xff] }
 0x4bf   : > { %v3881_v37 = vpop.permute.xlu1 %3880  ;;  %3709 = vrot.lane.b32.xlu0 %v3622_v8, %s5603_s13  ;;  %v4189_v34 = vld [vmem:[#allocation5 + $0x58] sm:$0xff] }
 0x4c0   : > { %3965 = vst.msk [vmem:[#allocation5 + $0x60] sm:$0xff] %vm3952_vm4, %v3881_v37  ;;  %5426 = vmatmul.mubr.msk.f32.gmra.mxu1 %vm4219_vm6, %v4189_v34  ;;  %v3405_v37 = vld [vmem:[#allocation4 + $0x1a] sm:$0xff] }
 0x4c1   : > { %3324 = vrot.lane.b32.xlu1 %v3814_v33, %s5601_s8  ;;  %v3690_v48 = vpop.permute.xlu0 %3689 }
 0x4c2   : > { %3773 = vst.msk [vmem:[#allocation5 + $0x68] sm:$0xff] %vm3759_vm3, %v3690_v48 }
 0x4c3   : > { %v3883_v25 = vpop.permute.xlu1 %3882  ;;  %3133 = vrot.lane.b32.xlu0 %v3622_v8, %s5599_s23 }
 0x4c4   : > { %3966 = vst.msk [vmem:[#allocation5 + $0x68] sm:$0xff] %vm3952_vm4, %v3883_v25  ;;  %v3820_v25 = vld [vmem:[#allocation4 + $0x181] sm:$0xff] }
 0x4c5   : > { %4093 = vrot.lane.b32.xlu1 %v4007_v4, %s5605_s15  ;;  %v3305_v49 = vpop.permute.xlu0 %3304 }
 0x4c6   : > { %3387 = vst.msk [vmem:[#allocation5 + $0x70] sm:$0xff] %vm3372_vm1, %v3305_v49 }
 0x4c7   : > { %v3307_v13 = vpop.permute.xlu1 %3306  ;;  %3902 = vrot.lane.b32.xlu0 %v3815_v29, %s5604_s17 }
 0x4c8   : > { %3388 = vst.msk [vmem:[#allocation5 + $0x78] sm:$0xff] %vm3372_vm1, %v3307_v13 }
 0x4c9   : > { %3517 = vrot.lane.b32.xlu1 %v4007_v4, %s5602_s18  ;;  %v4074_v2 = vpop.permute.xlu0 %4073 }
 0x4ca   : > { %4158 = vst.msk [vmem:[#allocation5 + $0x60] sm:$0xff] %vm4145_vm5, %v4074_v2 }
 0x4cb   : > { %v4076_v50 = vpop.permute.xlu1 %4075  ;;  %3326 = vrot.lane.b32.xlu0 %v3815_v29, %s5601_s8  ;;  %v3406_v29 = vld [vmem:[#allocation4 + $0x22] sm:$0xff] }
 0x4cc   : > { %4159 = vst.msk [vmem:[#allocation5 + $0x68] sm:$0xff] %vm4145_vm5, %v4076_v50  ;;  %v3821_v50 = vld [vmem:[#allocation4 + $0x189] sm:$0xff] }
 0x4cd   : > { %3519 = vrot.lane.b32.xlu1 %v3430_v9, %s5602_s18  ;;  %v3498_v30 = vpop.permute.xlu0 %3497 }
 0x4ce   : > { %3580 = vst.msk [vmem:[#allocation5 + $0x70] sm:$0xff] %vm3565_vm2, %v3498_v30  ;;  %v3599_v30 = vld [vmem:[#allocation4 + $0x30] sm:$0xff] }
 0x4cf   : > { %v3692_v3 = vpop.permute.xlu1 %3691  ;;  %4095 = vrot.lane.b32.xlu0 %v3430_v9, %s5605_s15 }
 0x4d0   : > { %3774 = vst.msk [vmem:[#allocation5 + $0x70] sm:$0xff] %vm3759_vm3, %v3692_v3 }
 0x4d1   : > { %3135 = vrot.lane.b32.xlu1 %v3045_v60, %s5599_s23  ;;  %v3500_v57 = vpop.permute.xlu0 %3499  ;;  %v4190_v62 = vld [vmem:[#allocation5 + $0x60] sm:$0xff] }
 0x4d2   : > { %3581 = vst.msk [vmem:[#allocation5 + $0x78] sm:$0xff] %vm3565_vm2, %v3500_v57  ;;  %5428 = vmatprep.mubr.msk.f32.mxu1 %vm4219_vm6, %v4190_v62  ;;  %v4013_v62 = vld [vmem:[#allocation4 + $0x182] sm:$0xff] }
 0x4d3   : > { %v3885_v44 = vpop.permute.xlu1 %3884  ;;  %3711 = vrot.lane.b32.xlu0 %v3045_v60, %s5603_s13  ;;  %v4191_v36 = vld [vmem:[#allocation5 + $0x68] sm:$0xff] }
 0x4d4   : > { %3967 = vst.msk [vmem:[#allocation5 + $0x70] sm:$0xff] %vm3952_vm4, %v3885_v44  ;;  %5429 = vmatmul.mubr.msk.f32.gmra.mxu1 %vm4219_vm6, %v4191_v36  ;;  %v3600_v36 = vld [vmem:[#allocation4 + $0x38] sm:$0xff] }
 0x4d5   : > { %3904 = vrot.lane.b32.xlu1 %v3816_v24, %s5604_s17  ;;  %v3694_v46 = vpop.permute.xlu0 %3693 }
 0x4d6   : > { %3775 = vst.msk [vmem:[#allocation5 + $0x78] sm:$0xff] %vm3759_vm3, %v3694_v46 }
 0x4d7   : > { %v3887_v23 = vpop.permute.xlu1 %3886  ;;  %3713 = vrot.lane.b32.xlu0 %v3624_v43, %s5603_s13 }
 0x4d8   : > { %3968 = vst.msk [vmem:[#allocation5 + $0x78] sm:$0xff] %vm3952_vm4, %v3887_v23 }
 0x4d9   : > { %3328 = vrot.lane.b32.xlu1 %v3816_v24, %s5601_s8  ;;  %v3309_v27 = vpop.permute.xlu0 %3308 }
 0x4da   : > { %3389 = vst.msk [vmem:[#allocation5 + $0x80] sm:$0xff] %vm3372_vm1, %v3309_v27  ;;  %v3792_v27 = vld [vmem:[#allocation4 + $0x31] sm:$0xff] }
 0x4db   : > { %v3311_v17 = vpop.permute.xlu1 %3310  ;;  %3137 = vrot.lane.b32.xlu0 %v3624_v43, %s5599_s23  ;;  %v4014_v43 = vld [vmem:[#allocation4 + $0x18a] sm:$0xff] }
 0x4dc   : > { %3390 = vst.msk [vmem:[#allocation5 + $0x88] sm:$0xff] %vm3372_vm1, %v3311_v17  ;;  %v3629_v17 = vld [vmem:[#allocation4 + $0x198] sm:$0xff] }
 0x4dd   : > { %4097 = vrot.lane.b32.xlu1 %v4009_v10, %s5605_s15  ;;  %v4078_v20 = vpop.permute.xlu0 %4077 }
 0x4de   : > { %4160 = vst.msk [vmem:[#allocation5 + $0x70] sm:$0xff] %vm4145_vm5, %v4078_v20 }
 0x4df   : > { %v4080_v54 = vpop.permute.xlu1 %4079  ;;  %3906 = vrot.lane.b32.xlu0 %v3817_v47, %s5604_s17 }
 0x4e0   : > { %4161 = vst.msk [vmem:[#allocation5 + $0x78] sm:$0xff] %vm4145_vm5, %v4080_v54 }
 0x4e1   : > { %3521 = vrot.lane.b32.xlu1 %v4009_v10, %s5602_s18  ;;  %v3502_v63 = vpop.permute.xlu0 %3501 }
 0x4e2   : > { %3582 = vst.msk [vmem:[#allocation5 + $0x80] sm:$0xff] %vm3565_vm2, %v3502_v63  ;;  %v3985_v63 = vld [vmem:[#allocation4 + $0x32] sm:$0xff] }
 0x4e3   : > { %v3696_v15 = vpop.permute.xlu1 %3695  ;;  %3330 = vrot.lane.b32.xlu0 %v3817_v47, %s5601_s8 }
 0x4e4   : > { %3776 = vst.msk [vmem:[#allocation5 + $0x80] sm:$0xff] %vm3759_vm3, %v3696_v15 }
 0x4e5   : > { %3523 = vrot.lane.b32.xlu1 %v3432_v35, %s5602_s18  ;;  %v3504_v59 = vpop.permute.xlu0 %3503  ;;  %v4192_v19 = vld [vmem:[#allocation5 + $0x70] sm:$0xff] }
 0x4e6   : > { %3583 = vst.msk [vmem:[#allocation5 + $0x88] sm:$0xff] %vm3565_vm2, %v3504_v59  ;;  %5431 = vmatprep.mubr.msk.f32.mxu1 %vm4219_vm6, %v4192_v19  ;;  %v3822_v59 = vld [vmem:[#allocation4 + $0x199] sm:$0xff] }
 0x4e7   : > { %v3889_v7 = vpop.permute.xlu1 %3888  ;;  %4099 = vrot.lane.b32.xlu0 %v3432_v35, %s5605_s15  ;;  %v4193_v32 = vld [vmem:[#allocation5 + $0x78] sm:$0xff]  ;;  %v3793_v35 = vld [vmem:[#allocation4 + $0x39] sm:$0xff] }
 0x4e8   : > { %3969 = vst.msk [vmem:[#allocation5 + $0x80] sm:$0xff] %vm3952_vm4, %v3889_v7  ;;  %5432 = vmatmul.mubr.msk.f32.gmra.mxu1 %vm4219_vm6, %v4193_v32  ;;  %v3630_v7 = vld [vmem:[#allocation4 + $0x1a0] sm:$0xff] }
 0x4e9   : > { %3139 = vrot.lane.b32.xlu1 %v3047_v45, %s5599_s23  ;;  %v3698_v18 = vpop.permute.xlu0 %3697 }
 0x4ea   : > { %3777 = vst.msk [vmem:[#allocation5 + $0x88] sm:$0xff] %vm3759_vm3, %v3698_v18  ;;  %v3823_v18 = vld [vmem:[#allocation4 + $0x1a1] sm:$0xff] }
 0x4eb   : > { %v3313_v21 = vpop.permute.xlu1 %3312  ;;  %3715 = vrot.lane.b32.xlu0 %v3047_v45, %s5603_s13  ;;  %v7974_v45 = vld [vmem:[%s8406_s5] ss:$0 sm:$0xff] }
 0x4ec   : > { %3391 = vst.msk [vmem:[#allocation5 + $0x90] sm:$0xff] %vm3372_vm1, %v3313_v21 }
 0x4ed   : > { %3908 = vrot.lane.b32.xlu1 %v3818_v11, %s5604_s17  ;;  %v3122_v42 = vpop.permute.xlu0 %3121 }
 0x4ee   : > { %3199 = vst.msk [vmem:[#allocation5 + $0x98] sm:$0xff] %vm3179_vm0, %v3122_v42  ;;  %v7981_v42 = vld [vmem:[%s8407_s6] ss:$0 sm:$0xff] }
 0x4ef   : > { %v4082_v26 = vpop.permute.xlu1 %4081  ;;  %3717 = vrot.lane.b32.xlu0 %v3626_v0, %s5603_s13 }
 0x4f0   : > { %4162 = vst.msk [vmem:[#allocation5 + $0x80] sm:$0xff] %vm4145_vm5, %v4082_v26 }
 0x4f1   : > { %3332 = vrot.lane.b32.xlu1 %v3818_v11, %s5601_s8  ;;  %v3891_v53 = vpop.permute.xlu0 %3890 }
 0x4f2   : > { %3970 = vst.msk [vmem:[#allocation5 + $0x88] sm:$0xff] %vm3952_vm4, %v3891_v53 }
 0x4f3   : > { %v3506_v56 = vpop.permute.xlu1 %3505  ;;  %3141 = vrot.lane.b32.xlu0 %v3626_v0, %s5599_s23 }
 0x4f4   : > { %3584 = vst.msk [vmem:[#allocation5 + $0x90] sm:$0xff] %vm3565_vm2, %v3506_v56 }
 0x4f5   : > { %4101 = vrot.lane.b32.xlu1 %v4011_v1, %s5605_s15  ;;  %v3315_v52 = vpop.permute.xlu0 %3314 }
 0x4f6   : > { %3392 = vst.msk [vmem:[#allocation5 + $0x98] sm:$0xff] %vm3372_vm1, %v3315_v52  ;;  %v4016_v52 = vld [vmem:[#allocation4 + $0x1a2] sm:$0xff] }
 0x4f7   : > { %v3508_v55 = vpop.permute.xlu1 %3507  ;;  %3910 = vrot.lane.b32.xlu0 %v3819_v41, %s5604_s17  ;;  %v4194_v58 = vld [vmem:[#allocation5 + $0x80] sm:$0xff] }
 0x4f8   : > { %3585 = vst.msk [vmem:[#allocation5 + $0x98] sm:$0xff] %vm3565_vm2, %v3508_v55  ;;  %5434 = vmatprep.mubr.msk.f32.mxu1 %vm4219_vm6, %v4194_v58 }
 0x4f9   : > { %3525 = vrot.lane.b32.xlu1 %v4011_v1, %s5602_s18  ;;  %v4084_v22 = vpop.permute.xlu0 %4083  ;;  %v3986_v1 = vld [vmem:[#allocation4 + $0x3a] sm:$0xff] }
 0x4fa   : > { %4163 = vst.msk [vmem:[#allocation5 + $0x88] sm:$0xff] %vm4145_vm5, %v4084_v22  ;;  %v4015_v22 = vld [vmem:[#allocation4 + $0x19a] sm:$0xff] }
 0x4fb   : > { %v3124_v51 = vpop.permute.xlu1 %3123  ;;  %3334 = vrot.lane.b32.xlu0 %v3819_v41, %s5601_s8 }
 0x4fc   : > { %3200 = vst.msk [vmem:[#allocation5 + $0xa0] sm:$0xff] %vm3179_vm0, %v3124_v51 }
 0x4fd   : > { %3276 = vrot.lane.b32.xlu1 %v3212_v61, %s5601_s8  ;;  %v3700_v12 = vpop.permute.xlu0 %3699 }
 0x4fe   : > { %3778 = vst.msk [vmem:[#allocation5 + $0x90] sm:$0xff] %vm3759_vm3, %v3700_v12 }
 0x4ff   : > { %v3893_v31 = vpop.permute.xlu1 %3892  ;;  %4103 = vrot.lane.b32.xlu0 %v4012_v40, %s5605_s15 }
 0x500   : > { %3971 = vst.msk [vmem:[#allocation5 + $0x90] sm:$0xff] %vm3952_vm4, %v3893_v31 }
 0x501   : > { %v3702_v28 = vpop.permute.xlu0 %3701  ;;  %3719 = vrot.lane.b32.xlu1 %v3627_v14, %s5603_s13  ;;  %v4195_v38 = vld [vmem:[#allocation5 + $0x88] sm:$0xff] }
 0x502   : > { %3779 = vst.msk [vmem:[#allocation5 + $0x98] sm:$0xff] %vm3759_vm3, %v3702_v28  ;;  %5435 = vmatmul.mubr.msk.f32.gmra.mxu1 %vm4219_vm6, %v4195_v38 }
 0x503   : > { %v3317_v6 = vpop.permute.xlu1 %3316  ;;  %3527 = vrot.lane.b32.xlu0 %v4012_v40, %s5602_s18 }
 0x504   : > { %3393 = vst.msk [vmem:[#allocation5 + $0xa0] sm:$0xff] %vm3372_vm1, %v3317_v6 }
 0x505   : > { %v3126_v33 = vpop.permute.xlu0 %3125  ;;  %3278 = vrot.lane.b32.xlu1 %v3213_v16, %s5601_s8 }
 0x506   : > { %3201 = vst.msk [vmem:[#allocation5 + $0xa8] sm:$0xff] %vm3179_vm0, %v3126_v33 }
 0x507   : > { %v4086_v5 = vpop.permute.xlu1 %4085  ;;  %3143 = vrot.lane.b32.xlu0 %v3627_v14, %s5599_s23 }
 0x508   : > { %4164 = vst.msk [vmem:[#allocation5 + $0x90] sm:$0xff] %vm4145_vm5, %v4086_v5 }
 0x509   : > { %v3895_v8 = vpop.permute.xlu0 %3894  ;;  %3721 = vrot.lane.b32.xlu1 %v3628_v39, %s5603_s13 }
 0x50a   : > { %3972 = vst.msk [vmem:[#allocation5 + $0x98] sm:$0xff] %vm3952_vm4, %v3895_v8 }
 0x50b   : > { %v3510_v34 = vpop.permute.xlu1 %3509  ;;  %3469 = vrot.lane.b32.xlu0 %v3405_v37, %s5602_s18 }
 0x50c   : > { %3586 = vst.msk [vmem:[#allocation5 + $0xa0] sm:$0xff] %vm3565_vm2, %v3510_v34 }
 0x50d   : > { %v3319_v48 = vpop.permute.xlu0 %3318  ;;  %3145 = vrot.lane.b32.xlu1 %v3628_v39, %s5599_s23 }
 0x50e   : > { %3394 = vst.msk [vmem:[#allocation5 + $0xa8] sm:$0xff] %vm3372_vm1, %v3319_v48 }
 0x50f   : > { %v3512_v4 = vpop.permute.xlu1 %3511  ;;  %3912 = vrot.lane.b32.xlu0 %v3820_v25, %s5604_s17  ;;  %v4196_v49 = vld [vmem:[#allocation5 + $0x90] sm:$0xff] }
 0x510   : > { %3587 = vst.msk [vmem:[#allocation5 + $0xa8] sm:$0xff] %vm3565_vm2, %v3512_v4  ;;  %5437 = vmatprep.mubr.msk.f32.mxu1 %vm4219_vm6, %v4196_v49 }
 0x511   : > { %v4088_v13 = vpop.permute.xlu0 %4087  ;;  %3471 = vrot.lane.b32.xlu1 %v3406_v29, %s5602_s18 }
 0x512   : > { %4165 = vst.msk [vmem:[#allocation5 + $0x98] sm:$0xff] %vm4145_vm5, %v4088_v13 }
 0x513   : > { %v3128_v2 = vpop.permute.xlu1 %3127  ;;  %3336 = vrot.lane.b32.xlu0 %v3820_v25, %s5601_s8 }
 0x514   : > { %3202 = vst.msk [vmem:[#allocation5 + $0xb0] sm:$0xff] %vm3179_vm0, %v3128_v2 }
 0x515   : > { %v3704_v9 = vpop.permute.xlu0 %3703  ;;  %3914 = vrot.lane.b32.xlu1 %v3821_v50, %s5604_s17 }
 0x516   : > { %3780 = vst.msk [vmem:[#allocation5 + $0xa0] sm:$0xff] %vm3759_vm3, %v3704_v9 }
 0x517   : > { %v3897_v3 = vpop.permute.xlu1 %3896  ;;  %3663 = vrot.lane.b32.xlu0 %v3599_v30, %s5603_s13 }
 0x518   : > { %3973 = vst.msk [vmem:[#allocation5 + $0xa0] sm:$0xff] %vm3952_vm4, %v3897_v3 }
 0x519   : > { %v3706_v60 = vpop.permute.xlu0 %3705  ;;  %3338 = vrot.lane.b32.xlu1 %v3821_v50, %s5601_s8  ;;  %v4197_v57 = vld [vmem:[#allocation5 + $0x98] sm:$0xff]  ;;  %s8338_s8 = scalar_lea.hbm %s8408_s7, %s5255_s21 }
 0x51a   : > { %3781 = vst.msk [vmem:[#allocation5 + $0xa8] sm:$0xff] %vm3759_vm3, %v3706_v60  ;;  %5438 = vmatmul.mubr.msk.f32.gmra.mxu1 %vm4219_vm6, %v4197_v57 }
 0x51b   : > { %v3321_v44 = vpop.permute.xlu1 %3320  ;;  %4105 = vrot.lane.b32.xlu0 %v4013_v62, %s5605_s15 }
 0x51c   : > { %3395 = vst.msk [vmem:[#allocation5 + $0xb0] sm:$0xff] %vm3372_vm1, %v3321_v44 }
 0x51d   : > { %v3130_v24 = vpop.permute.xlu0 %3129  ;;  %3665 = vrot.lane.b32.xlu1 %v3600_v36, %s5603_s13 }
 0x51e   : > { %3203 = vst.msk [vmem:[#allocation5 + $0xb8] sm:$0xff] %vm3179_vm0, %v3130_v24 }
 0x51f   : > { %v4090_v46 = vpop.permute.xlu1 %4089  ;;  %3529 = vrot.lane.b32.xlu0 %v4013_v62, %s5602_s18 }
 0x520   : > { %4166 = vst.msk [vmem:[#allocation5 + $0xa0] sm:$0xff] %vm4145_vm5, %v4090_v46 }
 0x521   : > { %v3899_v23 = vpop.permute.xlu0 %3898  ;;  %4107 = vrot.lane.b32.xlu1 %v4014_v43, %s5605_s15 }
 0x522   : > { %3974 = vst.msk [vmem:[#allocation5 + $0xa8] sm:$0xff] %vm3952_vm4, %v3899_v23 }
 0x523   : > { %v3514_v10 = vpop.permute.xlu1 %3513  ;;  %3856 = vrot.lane.b32.xlu0 %v3792_v27, %s5604_s17 }
 0x524   : > { %3588 = vst.msk [vmem:[#allocation5 + $0xb0] sm:$0xff] %vm3565_vm2, %v3514_v10 }
 0x525   : > { %v3323_v20 = vpop.permute.xlu0 %3322  ;;  %3723 = vrot.lane.b32.xlu1 %v3629_v17, %s5603_s13 }
 0x526   : > { %3396 = vst.msk [vmem:[#allocation5 + $0xb8] sm:$0xff] %vm3372_vm1, %v3323_v20 }
 0x527   : > { %v3516_v47 = vpop.permute.xlu1 %3515  ;;  %3531 = vrot.lane.b32.xlu0 %v4014_v43, %s5602_s18  ;;  %v4198_v54 = vld [vmem:[#allocation5 + $0xa0] sm:$0xff] }
 0x528   : > { %3589 = vst.msk [vmem:[#allocation5 + $0xb8] sm:$0xff] %vm3565_vm2, %v3516_v47  ;;  %5440 = vmatprep.mubr.msk.f32.mxu1 %vm4219_vm6, %v4198_v54 }
 0x529   : > { %v4092_v15 = vpop.permute.xlu0 %4091  ;;  %4049 = vrot.lane.b32.xlu1 %v3985_v63, %s5605_s15 }
 0x52a   : > { %4167 = vst.msk [vmem:[#allocation5 + $0xa8] sm:$0xff] %vm4145_vm5, %v4092_v15 }
 0x52b   : > { %v3132_v19 = vpop.permute.xlu1 %3131  ;;  %3858 = vrot.lane.b32.xlu0 %v3793_v35, %s5604_s17 }
 0x52c   : > { %3204 = vst.msk [vmem:[#allocation5 + $0xc0] sm:$0xff] %vm3179_vm0, %v3132_v19 }
 0x52d   : > { %v3708_v32 = vpop.permute.xlu0 %3707  ;;  %3916 = vrot.lane.b32.xlu1 %v3822_v59, %s5604_s17 }
 0x52e   : > { %3782 = vst.msk [vmem:[#allocation5 + $0xb0] sm:$0xff] %vm3759_vm3, %v3708_v32 }
 0x52f   : > { %v3901_v21 = vpop.permute.xlu1 %3900  ;;  %3725 = vrot.lane.b32.xlu0 %v3630_v7, %s5603_s13  ;;  %s269_s13 = sand.u32 1, %s5583_s25  }
 0x530   : > { %3975 = vst.msk [vmem:[#allocation5 + $0xb0] sm:$0xff] %vm3952_vm4, %v3901_v21  ;;  %v5415_v11 = vpop.f32.mrf.mxu1  ;;  %s8360_s18 = scalar_lea.sflag [#allocation8], %s269_s13 }
 0x531   : > { %v4551_v0 = vmul.f32 %v5415_v11, %v7974_v45  ;;  %v3710_v26 = vpop.permute.xlu0 %3709  ;;  %v4199_v53 = vld [vmem:[#allocation5 + $0xa8] sm:$0xff]  ;;  %3918 = vrot.lane.b32.xlu1 %v3823_v18, %s5604_s17  ;;  %s5177_s17 = sshll.u32 %s269_s13, 6 }
 0x532   : > { %3783 = vst.msk [vmem:[#allocation5 + $0xb8] sm:$0xff] %vm3759_vm3, %v3710_v26  ;;  %v4392_v56 = vpop.f32.mrf.mxu1  ;;  %5441 = vmatmul.mubr.msk.f32.gmra.mxu1 %vm4219_vm6, %v4199_v53  ;;  %s8066_s20 = scalar_lea.vmem [#allocation7], %s5177_s17  ;;  %s5606_s17 = smov [#allocation7]  }
 0x533   : > { %v4590_v41 = vadd.f32 %v7981_v42, %v4551_v0  ;;  %v4550_v55 = vmul.f32 %v7974_v45, %v4392_v56  ;;  %v3325_v58 = vpop.permute.xlu1 %3324  ;;  %4051 = vrot.lane.b32.xlu0 %v3986_v1, %s5605_s15  ;;  %s5535_s22 = sshll.u32 %s5606_s17, 4  ;;  %s5536_s22 = int_to_ptr.vmem [resolvable:$false] %s5535_s22 }
 0x534   : > { %3397 = vst.msk [vmem:[#allocation5 + $0xc0] sm:$0xff] %vm3372_vm1, %v3325_v58  ;;  %s5537_s29 = scalar_lea.vmem %s5536_s22, 2048 }
 0x535   : > { %v4622_v51 = vmax.f32 %v4590_v41, 0.0  ;;  %v4589_v61 = vadd.f32 %v7981_v42, %v4550_v55  ;;  %v3134_v12 = vpop.permute.xlu0 %3133  ;;  %4111 = vrot.lane.b32.xlu1 %v4016_v52, %s5605_s15 }
 0x536   : > { %3205 = vst.msk [vmem:[#allocation5 + $0xc8] sm:$0xff] %vm3179_vm0, %v3134_v12 }
 0x537   : > { %4709 = vst.msk [vmem:[#allocation6 + $0x39] sm:$0xff] %vm2480_vm12, %v4622_v51  ;;  %v4621_v40 = vmax.f32 %v4589_v61, 0.0  ;;  %v4094_v31 = vpop.permute.xlu1 %4093  ;;  %4109 = vrot.lane.b32.xlu0 %v4015_v22, %s5605_s15  ;;  %s5111_s15 = sshll.u32 %s8066_s20, 4  ;;  %s8340_s15 = int_to_ptr.vmem [resolvable:$true] %s5111_s15 }
 0x538   : > { %4168 = vst.msk [vmem:[#allocation5 + $0xb0] sm:$0xff] %vm4145_vm5, %v4094_v31  ;;  %s5531_s16 = scalar_lea.vmem %s8340_s15, 1024  ;;  %p5538_p0 = scmp.lt.s32.totalorder %s8340_s15, %s5536_s22 }
 0x539   : > { %4708 = vst.msk [vmem:[#allocation6 + $0x31] sm:$0xff] %vm2480_vm12, %v4621_v40  ;;  %v3903_v14 = vpop.permute.xlu0 %3902  ;;  %p5532_p11 = scmp.ne.s32.totalorder %s8340_s15, %s5531_s16  ;;  %p5539_p1 = scmp.lt.s32.totalorder %s5537_s29, %s5531_s16 }
 0x53a   : > { %3976 = vst.msk [vmem:[#allocation5 + $0xb8] sm:$0xff] %vm3952_vm4, %v3903_v14 }
 0x53b   : > { %v3518_v28 = vpop.permute.xlu1 %3517  ;;  %p5533_p12 = pnand %p5532_p11, %p5686_p5  ;;  %p5540_p2 = por %p5539_p1, %p5538_p0 }
 0x53c   : > { %3590 = vst.msk [vmem:[#allocation5 + $0xc0] sm:$0xff] %vm3565_vm2, %v3518_v28 }
 0x53d   : > { %v3327_v38 = vpop.permute.xlu0 %3326  ;;  %p5534_p13 = pneg %p5533_p12 }
 0x53e   : > { %3398 = vst.msk [vmem:[#allocation5 + $0xc8] sm:$0xff] %vm3372_vm1, %v3327_v38  ;;  %v4743_v32 = vld [vmem:[#allocation6 + $0x40] sm:$0x3] }
 0x53f   : > { %v3520_v6 = vpop.permute.xlu1 %3519  ;;  %v4200_v16 = vld [vmem:[#allocation5 + $0xb0] sm:$0xff]  ;;  %p5541_p3 = pnand %p5540_p2, %p5534_p13 }
 0x540   : > { %3591 = vst.msk [vmem:[#allocation5 + $0xc8] sm:$0xff] %vm3565_vm2, %v3520_v6  ;;  %5443 = vmatprep.mubr.msk.f32.mxu1 %vm4219_vm6, %v4200_v16  ;;  %v8036_v26 = vld [vmem:[#allocation6 + $0x30] sm:$0xff]  ;;  %v8038_v53 = vld [vmem:[#allocation6 + $0x38] sm:$0xff] }
 0x541   : > { %v4096_v33 = vpop.permute.xlu0 %4095 }
 0x542   : > { %4169 = vst.msk [vmem:[#allocation5 + $0xb8] sm:$0xff] %vm4145_vm5, %v4096_v33 }
 0x543   : > { %v3136_v5 = vpop.permute.xlu1 %3135 }
 0x544   : > { %3206 = vst.msk [vmem:[#allocation5 + $0xd0] sm:$0xff] %vm3179_vm0, %v3136_v5  ;;  %v5418_v39 = vpop.f32.mrf.mxu1 }
 0x545   : > { %v4553_v8 = vmul.f32 %v5418_v39, %v7974_v45  ;;  %v3712_v37 = vpop.permute.xlu0 %3711 }
 0x546   : > { %3784 = vst.msk [vmem:[#allocation5 + $0xc0] sm:$0xff] %vm3759_vm3, %v3712_v37  ;;  %v4402_v34 = vpop.f32.mrf.mxu1 }
 0x547   : > { %v4592_v48 = vadd.f32 %v7981_v42, %v4553_v8  ;;  %v4552_v25 = vmul.f32 %v7974_v45, %v4402_v34  ;;  %v3905_v4 = vpop.permute.xlu1 %3904 }
 0x548   : > { %3977 = vst.msk [vmem:[#allocation5 + $0xc0] sm:$0xff] %vm3952_vm4, %v3905_v4 }
 0x549   : > { %v4624_v49 = vmax.f32 %v4592_v48, 0.0  ;;  %v4591_v29 = vadd.f32 %v7981_v42, %v4552_v25  ;;  %v3714_v13 = vpop.permute.xlu0 %3713  ;;  %v4201_v2 = vld [vmem:[#allocation5 + $0xb8] sm:$0xff] }
 0x54a   : > { %3785 = vst.msk [vmem:[#allocation5 + $0xc8] sm:$0xff] %vm3759_vm3, %v3714_v13  ;;  %5444 = vmatmul.mubr.msk.f32.gmra.mxu1 %vm4219_vm6, %v4201_v2 }
 0x54b   : > { %4711 = vst.msk [vmem:[#allocation6 + $0x51] sm:$0xff] %vm2480_vm12, %v4624_v49  ;;  %v4623_v50 = vmax.f32 %v4591_v29, 0.0  ;;  %v3329_v9 = vpop.permute.xlu1 %3328 }
 0x54c   : > { %3399 = vst.msk [vmem:[#allocation5 + $0xd0] sm:$0xff] %vm3372_vm1, %v3329_v9 }
 0x54d   : > { %4710 = vst.msk [vmem:[#allocation6 + $0x49] sm:$0xff] %vm2480_vm12, %v4623_v50  ;;  %v3138_v30 = vpop.permute.xlu0 %3137 }
 0x54e   : > { %3207 = vst.msk [vmem:[#allocation5 + $0xd8] sm:$0xff] %vm3179_vm0, %v3138_v30 }
 0x54f   : > { %v4098_v3 = vpop.permute.xlu1 %4097 }
 0x550   : > { %4170 = vst.msk [vmem:[#allocation5 + $0xc0] sm:$0xff] %vm4145_vm5, %v4098_v3 }
 0x551   : > { %v3907_v60 = vpop.permute.xlu0 %3906 }
 0x552   : > { %3978 = vst.msk [vmem:[#allocation5 + $0xc8] sm:$0xff] %vm3952_vm4, %v3907_v60  ;;  %v4767_v19 = vld [vmem:[#allocation6 + $0x58] sm:$0x3] }
 0x553   : > { %v3522_v57 = vpop.permute.xlu1 %3521  ;;  %v4791_v11 = vmax.f32 %v4743_v32, %v4767_v19 }
 0x554   : > { %3592 = vst.msk [vmem:[#allocation5 + $0xd0] sm:$0xff] %vm3565_vm2, %v3522_v57  ;;  %v4765_v18 = vld [vmem:[#allocation6 + $0x48] sm:$0xff]  ;;  %v4766_v21 = vld [vmem:[#allocation6 + $0x50] sm:$0xff] }
 0x555   : > { %v3331_v62 = vpop.permute.xlu0 %3330  ;;  %v4789_v1 = vmax.f32 %v8036_v26, %v4765_v18  ;;  %v4790_v52 = vmax.f32 %v8038_v53, %v4766_v21 }
 0x556   : > { %3400 = vst.msk [vmem:[#allocation5 + $0xd8] sm:$0xff] %vm3372_vm1, %v3331_v62 }
 0x557   : > { %v3524_v44 = vpop.permute.xlu1 %3523  ;;  %v4202_v36 = vld [vmem:[#allocation5 + $0xc0] sm:$0xff] }
 0x558   : > { %3593 = vst.msk [vmem:[#allocation5 + $0xd8] sm:$0xff] %vm3565_vm2, %v3524_v44  ;;  %v5421_v24 = vpop.f32.mrf.mxu1  ;;  %5446 = vmatprep.mubr.msk.f32.mxu1 %vm4219_vm6, %v4202_v36 }
 0x559   : > { %v4555_v46 = vmul.f32 %v5421_v24, %v7974_v45  ;;  %v4100_v43 = vpop.permute.xlu0 %4099 }
 0x55a   : > { %4171 = vst.msk [vmem:[#allocation5 + $0xc8] sm:$0xff] %vm4145_vm5, %v4100_v43  ;;  %v4412_v23 = vpop.f32.mrf.mxu1 }
 0x55b   : > { %v4594_v27 = vadd.f32 %v7981_v42, %v4555_v46  ;;  %v4554_v17 = vmul.f32 %v7974_v45, %v4412_v23  ;;  %v3140_v10 = vpop.permute.xlu1 %3139 }
 0x55c   : > { %3208 = vst.msk [vmem:[#allocation5 + $0xe0] sm:$0xff] %vm3179_vm0, %v3140_v10 }
 0x55d   : > { %v4626_v20 = vmax.f32 %v4594_v27, 0.0  ;;  %v4593_v47 = vadd.f32 %v7981_v42, %v4554_v17  ;;  %v3716_v54 = vpop.permute.xlu0 %3715 }
 0x55e   : > { %3786 = vst.msk [vmem:[#allocation5 + $0xd0] sm:$0xff] %vm3759_vm3, %v3716_v54 }
 0x55f   : > { %4713 = vst.msk [vmem:[#allocation6 + $0x69] sm:$0xff] %vm2480_vm12, %v4626_v20  ;;  %v4625_v63 = vmax.f32 %v4593_v47, 0.0  ;;  %v3909_v15 = vpop.permute.xlu1 %3908 }
 0x560   : > { %3979 = vst.msk [vmem:[#allocation5 + $0xd0] sm:$0xff] %vm3952_vm4, %v3909_v15 }
 0x561   : > { %4712 = vst.msk [vmem:[#allocation6 + $0x61] sm:$0xff] %vm2480_vm12, %v4625_v63  ;;  %v3718_v35 = vpop.permute.xlu0 %3717  ;;  %v4203_v59 = vld [vmem:[#allocation5 + $0xc8] sm:$0xff] }
 0x562   : > { %3787 = vst.msk [vmem:[#allocation5 + $0xd8] sm:$0xff] %vm3759_vm3, %v3718_v35  ;;  %5447 = vmatmul.mubr.msk.f32.gmra.mxu1 %vm4219_vm6, %v4203_v59 }
 0x563   : > { %v3333_v7 = vpop.permute.xlu1 %3332 }
 0x564   : > { %3401 = vst.msk [vmem:[#allocation5 + $0xe0] sm:$0xff] %vm3372_vm1, %v3333_v7 }
 0x565   : > { %v3142_v0 = vpop.permute.xlu0 %3141 }
 0x566   : > { %v4816_v56 = vld [vmem:[#allocation6 + $0x70] sm:$0x3]  ;;  %3209 = vst.msk [vmem:[#allocation5 + $0xe8] sm:$0xff] %vm3179_vm0, %v3142_v0 }
 0x567   : > { %v4840_v41 = vmax.f32 %v4791_v11, %v4816_v56  ;;  %v4102_v55 = vpop.permute.xlu1 %4101  ;;  %v4746_v56 = vld [vmem:[#allocation6 + $0x70] sm:$0x3] }
 0x568   : > { %v8043_v58 = vld [vmem:[#allocation6 + $0x60] sm:$0xff]  ;;  %v8045_v22 = vld [vmem:[#allocation6 + $0x68] sm:$0xff]  ;;  %4172 = vst.msk [vmem:[#allocation5 + $0xd0] sm:$0xff] %vm4145_vm5, %v4102_v55 }
 0x569   : > { %v4838_v51 = vmax.f32 %v4789_v1, %v8043_v58  ;;  %v4839_v61 = vmax.f32 %v4790_v52, %v8045_v22  ;;  %v3911_v12 = vpop.permute.xlu0 %3910  ;;  %v4892_v40 = vrot.slane %v4840_v41, 1  ;;  %v4965_v33 = vrot.slane %v4840_v41, 2 }
 0x56a   : > { %3980 = vst.msk [vmem:[#allocation5 + $0xd8] sm:$0xff] %vm3952_vm4, %v3911_v12 }
 0x56b   : > { %v4889_v31 = vrot.slane %v4838_v51, 1  ;;  %v4890_v14 = vrot.slane %v4839_v61, 1  ;;  %v4962_v28 = vrot.slane %v4838_v51, 2  ;;  %v4963_v38 = vrot.slane %v4839_v61, 2  ;;  %v3526_v6 = vpop.permute.xlu1 %3525 }
 0x56c   : > { %3594 = vst.msk [vmem:[#allocation5 + $0xe0] sm:$0xff] %vm3565_vm2, %v3526_v6  ;;  %v5424_v16 = vpop.f32.mrf.mxu1 }
 0x56d   : > { %v4891_v5 = vsel %vm4883_vm7, %v4889_v31, %v4890_v14  ;;  %v4893_v39 = vsel %vm4883_vm7, %v4890_v14, %v4892_v40  ;;  %v3335_v8 = vpop.permute.xlu0 %3334  ;;  %v4557_v48 = vmul.f32 %v5424_v16, %v7974_v45  ;;  %v4964_v4 = vsel %vm4956_vm8, %v4962_v28, %v4963_v38 }
 0x56e   : > { %v4942_v37 = vmax.f32 %v4838_v51, %v4891_v5  ;;  %v4943_v34 = vmax.f32 %v4839_v61, %v4893_v39  ;;  %3402 = vst.msk [vmem:[#allocation5 + $0xe8] sm:$0xff] %vm3372_vm1, %v3335_v8  ;;  %v4422_v25 = vpop.f32.mrf.mxu1  ;;  %v4966_v49 = vsel %vm4956_vm8, %v4963_v38, %v4965_v33 }
 0x56f   : > { %v4556_v29 = vmul.f32 %v7974_v45, %v4422_v25  ;;  %v3277_v13 = vpop.permute.xlu1 %3276  ;;  %v4204_v2 = vld [vmem:[#allocation5 + $0xd0] sm:$0xff]  ;;  %v4596_v30 = vadd.f32 %v7981_v42, %v4557_v48 }
 0x570   : > { %v5015_v50 = vmax.f32 %v4942_v37, %v4964_v4  ;;  %v5016_v9 = vmax.f32 %v4943_v34, %v4966_v49  ;;  %3373 = vst.msk [vmem:[#allocation5] sm:$0xff] %vm3372_vm1, %v3277_v13  ;;  %5449 = vmatprep.mubr.msk.f32.mxu1 %vm4219_vm6, %v4204_v2 }
 0x571   : > { %v4595_v3 = vadd.f32 %v7981_v42, %v4556_v29  ;;  %v4104_v60 = vpop.permute.xlu0 %4103  ;;  %v4628_v57 = vmax.f32 %v4596_v30, 0.0 }
 0x572   : > { %5031 = vst.msk [vmem:[%s8066_s20 + $0x8] sm:$0x1] %vm5029_vm9, %v5015_v50  ;;  %5066 = vst.msk [vmem:[%s8066_s20 + $0xc] sm:$0x1] %vm5029_vm9, %v5016_v9 }
 0x573   : > { %5040 = vst.msk [vmem:[%s8066_s20 + $0x7] sm:$0x4] %vm5038_vm10, %v5015_v50  ;;  %5074 = vst.msk [vmem:[%s8066_s20 + $0xb] sm:$0x4] %vm5038_vm10, %v5016_v9  ;;  %v4627_v62 = vmax.f32 %v4595_v3, 0.0  ;;  %v3720_v44 = vpop.permute.xlu1 %3719 }
 0x574   : > { %5049 = vst.msk [vmem:[%s8066_s20 + $0x6] sm:$0x10] %vm5047_vm11, %v5015_v50  ;;  %5082 = vst.msk [vmem:[%s8066_s20 + $0xa] sm:$0x10] %vm5047_vm11, %v5016_v9 }
 0x575   : > { %5058 = vst.msk [vmem:[%s8066_s20 + $0x5] sm:$0x40] %vm5056_vm13, %v5015_v50  ;;  %5090 = vst.msk [vmem:[%s8066_s20 + $0x9] sm:$0x40] %vm5056_vm13, %v5016_v9  ;;  %v3528_v36 = vpop.permute.xlu0 %3527 }
 0x576   : > { %4173 = vst.msk [vmem:[#allocation5 + $0xd8] sm:$0xff] %vm4145_vm5, %v4104_v60 }
 0x577   : > { %4715 = vst.msk [vmem:[#allocation6 + $0x81] sm:$0xff] %vm2480_vm12, %v4628_v57  ;;  %4714 = vst.msk [vmem:[#allocation6 + $0x79] sm:$0xff] %vm2480_vm12, %v4627_v62  ;;  %v3279_v24 = vpop.permute.xlu1 %3278 }
 0x578   : > { %3788 = vst.msk [vmem:[#allocation5 + $0xe0] sm:$0xff] %vm3759_vm3, %v3720_v44 }
 0x579   : > { %3595 = vst.msk [vmem:[#allocation5 + $0xe8] sm:$0xff] %vm3565_vm2, %v3528_v36  ;;  %v3144_v46 = vpop.permute.xlu0 %3143 }
 0x57a   : > { %3374 = vst.msk [vmem:[#allocation5 + $0x8] sm:$0xff] %vm3372_vm1, %v3279_v24 }
 0x57b   : > { %3210 = vst.msk [vmem:[#allocation5 + $0xf0] sm:$0xff] %vm3179_vm0, %v3144_v46  ;;  %v3722_v23 = vpop.permute.xlu1 %3721 }
 0x57c   : > { %3789 = vst.msk [vmem:[#allocation5 + $0xe8] sm:$0xff] %vm3759_vm3, %v3722_v23 }
 0x57d   : > { %v4205_v43 = vld [vmem:[#allocation5 + $0xd8] sm:$0xff]  ;;  %v3470_v27 = vpop.permute.xlu0 %3469 }
 0x57e   : > { %5450 = vmatmul.mubr.msk.f32.gmra.mxu1 %vm4219_vm6, %v4205_v43  ;;  %3566 = vst.msk [vmem:[#allocation5] sm:$0xff] %vm3565_vm2, %v3470_v27  ;;  %v4770_v11 = vld [vmem:[#allocation6 + $0x88] sm:$0x3]  ;;  %v4768_v1 = vld [vmem:[#allocation6 + $0x78] sm:$0xff]  ;;  %v4769_v52 = vld [vmem:[#allocation6 + $0x80] sm:$0xff] }
 0x57f   : > { %v3146_v17 = vpop.permute.xlu1 %3145  ;;  %v4794_v41 = vmax.f32 %v4746_v56, %v4770_v11  ;;  %v4792_v61 = vmax.f32 %v8043_v58, %v4768_v1  ;;  %v4793_v12 = vmax.f32 %v8045_v22, %v4769_v52 }
 0x580   : > { %3211 = vst.msk [vmem:[#allocation5 + $0xf8] sm:$0xff] %vm3179_vm0, %v3146_v17  ;;  %v5427_v10 = vpop.f32.mrf.mxu1 }
 0x581   : > { %v4559_v20 = vmul.f32 %v5427_v10, %v7974_v45  ;;  %v3913_v47 = vpop.permute.xlu0 %3912 }
 0x582   : > { %3981 = vst.msk [vmem:[#allocation5 + $0xe0] sm:$0xff] %vm3952_vm4, %v3913_v47  ;;  %v4432_v54 = vpop.f32.mrf.mxu1 }
 0x583   : > { %v4598_v63 = vadd.f32 %v7981_v42, %v4559_v20  ;;  %v4558_v15 = vmul.f32 %v7974_v45, %v4432_v54  ;;  %v3472_v35 = vpop.permute.xlu1 %3471 }
 0x584   : > { %3567 = vst.msk [vmem:[#allocation5 + $0x8] sm:$0xff] %vm3565_vm2, %v3472_v35 }
 0x585   : > { %v4630_v59 = vmax.f32 %v4598_v63, 0.0  ;;  %v4597_v19 = vadd.f32 %v7981_v42, %v4558_v15  ;;  %v3337_v7 = vpop.permute.xlu0 %3336 }
 0x586   : > { %3403 = vst.msk [vmem:[#allocation5 + $0xf0] sm:$0xff] %vm3372_vm1, %v3337_v7 }
 0x587   : > { %4717 = vst.msk [vmem:[#allocation6 + $0x99] sm:$0xff] %vm2480_vm12, %v4630_v59  ;;  %v4629_v32 = vmax.f32 %v4597_v19, 0.0  ;;  %v3915_v18 = vpop.permute.xlu1 %3914 }
 0x588   : > { %3982 = vst.msk [vmem:[#allocation5 + $0xe8] sm:$0xff] %vm3952_vm4, %v3915_v18 }
 0x589   : > { %4716 = vst.msk [vmem:[#allocation6 + $0x91] sm:$0xff] %vm2480_vm12, %v4629_v32  ;;  %v3664_v21 = vpop.permute.xlu0 %3663 }
 0x58a   : > { %3760 = vst.msk [vmem:[#allocation5] sm:$0xff] %vm3759_vm3, %v3664_v21 }
 0x58b   : > { %v3339_v0 = vpop.permute.xlu1 %3338 }
 0x58c   : > { %3404 = vst.msk [vmem:[#allocation5 + $0xf8] sm:$0xff] %vm3372_vm1, %v3339_v0 }
 0x58d   : > { %v4106_v55 = vpop.permute.xlu0 %4105 }
 0x58e   : > { %v4819_v51 = vld [vmem:[#allocation6 + $0xa0] sm:$0x3]  ;;  %4174 = vst.msk [vmem:[#allocation5 + $0xe0] sm:$0xff] %vm4145_vm5, %v4106_v55 }
 0x58f   : > { %v4843_v40 = vmax.f32 %v4794_v41, %v4819_v51  ;;  %v3666_v31 = vpop.permute.xlu1 %3665  ;;  %v4749_v55 = vld [vmem:[#allocation6 + $0xa0] sm:$0x3] }
 0x590   : > { %v8110_v14 = vld [vmem:[#allocation6 + $0x90] sm:$0xff]  ;;  %v8112_v28 = vld [vmem:[#allocation6 + $0x98] sm:$0xff]  ;;  %3761 = vst.msk [vmem:[#allocation5 + $0x8] sm:$0xff] %vm3759_vm3, %v3666_v31 }
 0x591   : > { %v4841_v38 = vmax.f32 %v4792_v61, %v8110_v14  ;;  %v4842_v6 = vmax.f32 %v4793_v12, %v8112_v28  ;;  %v3530_v16 = vpop.permute.xlu0 %3529  ;;  %v4897_v33 = vrot.slane %v4843_v40, 1  ;;  %v4970_v34 = vrot.slane %v4843_v40, 2 }
 0x592   : > { %3596 = vst.msk [vmem:[#allocation5 + $0xf0] sm:$0xff] %vm3565_vm2, %v3530_v16 }
 0x593   : > { %v4894_v5 = vrot.slane %v4841_v38, 1  ;;  %v4895_v58 = vrot.slane %v4842_v6, 1  ;;  %v4967_v39 = vrot.slane %v4841_v38, 2  ;;  %v4968_v22 = vrot.slane %v4842_v6, 2  ;;  %v4108_v8 = vpop.permute.xlu1 %4107 }
 0x594   : > { %4175 = vst.msk [vmem:[#allocation5 + $0xe8] sm:$0xff] %vm4145_vm5, %v4108_v8  ;;  %v5430_v37 = vpop.f32.mrf.mxu1 }
 0x595   : > { %v4896_v48 = vsel %vm4883_vm7, %v4894_v5, %v4895_v58  ;;  %v4898_v25 = vsel %vm4883_vm7, %v4895_v58, %v4897_v33  ;;  %v3857_v4 = vpop.permute.xlu0 %3856  ;;  %v4206_v49 = vld [vmem:[#allocation5 + $0xe0] sm:$0xff]  ;;  %v4561_v2 = vmul.f32 %v5430_v37, %v7974_v45  ;;  %v4969_v9 = vsel %vm4956_vm8, %v4967_v39, %v4968_v22 }
 0x596   : > { %v4944_v29 = vmax.f32 %v4841_v38, %v4896_v48  ;;  %v4945_v13 = vmax.f32 %v4842_v6, %v4898_v25  ;;  %3953 = vst.msk [vmem:[#allocation5] sm:$0xff] %vm3952_vm4, %v3857_v4  ;;  %v4442_v50 = vpop.f32.mrf.mxu1  ;;  %5452 = vmatprep.mubr.msk.f32.mxu1 %vm4219_vm6, %v4206_v49  ;;  %v4971_v30 = vsel %vm4956_vm8, %v4968_v22, %v4970_v34 }
 0x597   : > { %v4560_v3 = vmul.f32 %v7974_v45, %v4442_v50  ;;  %v3724_v60 = vpop.permute.xlu1 %3723  ;;  %v4600_v44 = vadd.f32 %v7981_v42, %v4561_v2 }
 0x598   : > { %v5017_v57 = vmax.f32 %v4944_v29, %v4969_v9  ;;  %v5018_v62 = vmax.f32 %v4945_v13, %v4971_v30  ;;  %3790 = vst.msk [vmem:[#allocation5 + $0xf0] sm:$0xff] %vm3759_vm3, %v3724_v60 }
 0x599   : > { %v4599_v36 = vadd.f32 %v7981_v42, %v4560_v3  ;;  %v3532_v24 = vpop.permute.xlu0 %3531  ;;  %v4632_v46 = vmax.f32 %v4600_v44, 0.0 }
 0x59a   : > { %5032 = vst.msk [vmem:[%s8066_s20 + $0x10] sm:$0x1] %vm5029_vm9, %v5017_v57  ;;  %5067 = vst.msk [vmem:[%s8066_s20 + $0x14] sm:$0x1] %vm5029_vm9, %v5018_v62 }
 0x59b   : > { %5041 = vst.msk [vmem:[%s8066_s20 + $0xf] sm:$0x4] %vm5038_vm10, %v5017_v57  ;;  %5075 = vst.msk [vmem:[%s8066_s20 + $0x13] sm:$0x4] %vm5038_vm10, %v5018_v62  ;;  %v4631_v43 = vmax.f32 %v4599_v36, 0.0  ;;  %v4050_v23 = vpop.permute.xlu1 %4049  ;;  %v4207_v27 = vld [vmem:[#allocation5 + $0xe8] sm:$0xff] }
 0x59c   : > { %5050 = vst.msk [vmem:[%s8066_s20 + $0xe] sm:$0x10] %vm5047_vm11, %v5017_v57  ;;  %5083 = vst.msk [vmem:[%s8066_s20 + $0x12] sm:$0x10] %vm5047_vm11, %v5018_v62  ;;  %5453 = vmatmul.mubr.msk.f32.gmra.mxu1 %vm4219_vm6, %v4207_v27 }
 0x59d   : > { %5059 = vst.msk [vmem:[%s8066_s20 + $0xd] sm:$0x40] %vm5056_vm13, %v5017_v57  ;;  %5091 = vst.msk [vmem:[%s8066_s20 + $0x11] sm:$0x40] %vm5056_vm13, %v5018_v62  ;;  %v3859_v17 = vpop.permute.xlu0 %3858 }
 0x59e   : > { %3597 = vst.msk [vmem:[#allocation5 + $0xf8] sm:$0xff] %vm3565_vm2, %v3532_v24 }
 0x59f   : > { %4719 = vst.msk [vmem:[#allocation6 + $0xb1] sm:$0xff] %vm2480_vm12, %v4632_v46  ;;  %4718 = vst.msk [vmem:[#allocation6 + $0xa9] sm:$0xff] %vm2480_vm12, %v4631_v43  ;;  %v3917_v10 = vpop.permute.xlu1 %3916 }
 0x5a0   : > { %4146 = vst.msk [vmem:[#allocation5] sm:$0xff] %vm4145_vm5, %v4050_v23 }
 0x5a1   : > { %3954 = vst.msk [vmem:[#allocation5 + $0x8] sm:$0xff] %vm3952_vm4, %v3859_v17  ;;  %3983 = vst.msk [vmem:[#allocation5 + $0xf0] sm:$0xff] %vm3952_vm4, %v3917_v10  ;;  %v3726_v20 = vpop.permute.xlu0 %3725 }
 0x5a2   : > { %3791 = vst.msk [vmem:[#allocation5 + $0xf8] sm:$0xff] %vm3759_vm3, %v3726_v20 }
 0x5a3   : > { %v3919_v54 = vpop.permute.xlu1 %3918 }
 0x5a4   : > { %3984 = vst.msk [vmem:[#allocation5 + $0xf8] sm:$0xff] %vm3952_vm4, %v3919_v54 }
 0x5a5   : > { %v4052_v63 = vpop.permute.xlu0 %4051 }
 0x5a6   : > { %4147 = vst.msk [vmem:[#allocation5 + $0x8] sm:$0xff] %vm4145_vm5, %v4052_v63  ;;  %v4773_v41 = vld [vmem:[#allocation6 + $0xb8] sm:$0x3]  ;;  %v4771_v51 = vld [vmem:[#allocation6 + $0xa8] sm:$0xff]  ;;  %v4772_v61 = vld [vmem:[#allocation6 + $0xb0] sm:$0xff] }
 0x5a7   : > { %v4178_v47 = vld [vmem:[#allocation5] sm:$0xff]  ;;  %v4112_v15 = vpop.permute.xlu1 %4111  ;;  %v4797_v12 = vmax.f32 %v4749_v55, %v4773_v41  ;;  %v4795_v31 = vmax.f32 %v8110_v14, %v4771_v51  ;;  %v4796_v38 = vmax.f32 %v8112_v28, %v4772_v61 }
 0x5a8   : > { %5410 = vmatprep.mubr.msk.f32.mxu0 %vm4219_vm6, %v4178_v47  ;;  %v5433_v35 = vpop.f32.mrf.mxu1  ;;  %4177 = vst.msk [vmem:[#allocation5 + $0xf8] sm:$0xff] %vm4145_vm5, %v4112_v15 }
 0x5a9   : > { %v4563_v59 = vmul.f32 %v5433_v35, %v7974_v45  ;;  %v4110_v19 = vpop.permute.xlu0 %4109 }
 0x5aa   : > { %4176 = vst.msk [vmem:[#allocation5 + $0xf0] sm:$0xff] %vm4145_vm5, %v4110_v19  ;;  %v4452_v7 = vpop.f32.mrf.mxu1 }
 0x5ab   : > { %v4602_v32 = vadd.f32 %v7981_v42, %v4563_v59  ;;  %v4562_v18 = vmul.f32 %v7974_v45, %v4452_v7 }
 0x5ad   : > { %v4634_v21 = vmax.f32 %v4602_v32, 0.0  ;;  %v4601_v11 = vadd.f32 %v7981_v42, %v4562_v18  ;;  %v4179_v0 = vld [vmem:[#allocation5 + $0x8] sm:$0xff] }
 0x5ae   : > { %5411 = vmatmul.mubr.msk.f32.vlgmr.msra.gmra.mxu0 %vm4219_vm6, %v4179_v0 }
 0x5af   : > { %4721 = vst.msk [vmem:[#allocation6 + $0xc9] sm:$0xff] %vm2480_vm12, %v4634_v21  ;;  %v4633_v56 = vmax.f32 %v4601_v11, 0.0  ;;  %v4209_v1 = vld [vmem:[#allocation5 + $0xf8] sm:$0xff] }
 0x5b1   : > { %4720 = vst.msk [vmem:[#allocation6 + $0xc1] sm:$0xff] %vm2480_vm12, %v4633_v56  ;;  %v4208_v52 = vld [vmem:[#allocation5 + $0xf0] sm:$0xff] }
 0x5b2   : > { %5455 = vmatprep.mubr.msk.f32.mxu1 %vm4219_vm6, %v4208_v52 }
 0x5b3   : > { %5456 = vmatmul.mubr.msk.f32.gmra.mxu1 %vm4219_vm6, %v4209_v1 }
 0x5b6   : > { %v4822_v40 = vld [vmem:[#allocation6 + $0xd0] sm:$0x3] }
 0x5b7   : > { %v4846_v6 = vmax.f32 %v4797_v12, %v4822_v40  ;;  %v4752_v47 = vld [vmem:[#allocation6 + $0xd0] sm:$0x3] }
 0x5b8   : > { %v4750_v16 = vld [vmem:[#allocation6 + $0xc0] sm:$0xff]  ;;  %v4751_v33 = vld [vmem:[#allocation6 + $0xc8] sm:$0xff] }
 0x5b9   : > { %v4844_v5 = vmax.f32 %v4795_v31, %v4750_v16  ;;  %v4845_v58 = vmax.f32 %v4796_v38, %v4751_v33  ;;  %v4902_v39 = vrot.slane %v4846_v6, 1  ;;  %v4975_v14 = vrot.slane %v4846_v6, 2 }
 0x5bb   : > { %v4899_v22 = vrot.slane %v4844_v5, 1  ;;  %v4900_v8 = vrot.slane %v4845_v58, 1  ;;  %v4972_v37 = vrot.slane %v4844_v5, 2  ;;  %v4973_v34 = vrot.slane %v4845_v58, 2 }
 0x5bd   : > { %v4901_v28 = vsel %vm4883_vm7, %v4899_v22, %v4900_v8  ;;  %v4903_v48 = vsel %vm4883_vm7, %v4900_v8, %v4902_v39  ;;  %v4974_v49 = vsel %vm4956_vm8, %v4972_v37, %v4973_v34  ;;  %v4976_v29 = vsel %vm4956_vm8, %v4973_v34, %v4975_v14 }
 0x5be   : > { %v4946_v25 = vmax.f32 %v4844_v5, %v4901_v28  ;;  %v4947_v4 = vmax.f32 %v4845_v58, %v4903_v48 }
 0x5c0   : > { %v5019_v13 = vmax.f32 %v4946_v25, %v4974_v49  ;;  %v5020_v2 = vmax.f32 %v4947_v4, %v4976_v29 }
 0x5c2   : > { %5033 = vst.msk [vmem:[%s8066_s20 + $0x18] sm:$0x1] %vm5029_vm9, %v5019_v13  ;;  %5068 = vst.msk [vmem:[%s8066_s20 + $0x1c] sm:$0x1] %vm5029_vm9, %v5020_v2  ;;  %v5436_v50 = vpop.f32.mrf.mxu1 }
 0x5c3   : > { %5042 = vst.msk [vmem:[%s8066_s20 + $0x17] sm:$0x4] %vm5038_vm10, %v5019_v13  ;;  %5076 = vst.msk [vmem:[%s8066_s20 + $0x1b] sm:$0x4] %vm5038_vm10, %v5020_v2  ;;  %v4565_v9 = vmul.f32 %v5436_v50, %v7974_v45 }
 0x5c4   : > { %5051 = vst.msk [vmem:[%s8066_s20 + $0x16] sm:$0x10] %vm5047_vm11, %v5019_v13  ;;  %5084 = vst.msk [vmem:[%s8066_s20 + $0x1a] sm:$0x10] %vm5047_vm11, %v5020_v2  ;;  %v4462_v30 = vpop.f32.mrf.mxu1 }
 0x5c5   : > { %5060 = vst.msk [vmem:[%s8066_s20 + $0x15] sm:$0x40] %vm5056_vm13, %v5019_v13  ;;  %5092 = vst.msk [vmem:[%s8066_s20 + $0x19] sm:$0x40] %vm5056_vm13, %v5020_v2  ;;  %v4604_v3 = vadd.f32 %v7981_v42, %v4565_v9  ;;  %v4564_v60 = vmul.f32 %v7974_v45, %v4462_v30 }
 0x5c7   : > { %v4636_v57 = vmax.f32 %v4604_v3, 0.0  ;;  %v4603_v62 = vadd.f32 %v7981_v42, %v4564_v60 }
 0x5c9   : > { %4723 = vst.msk [vmem:[#allocation6 + $0xe1] sm:$0xff] %vm2480_vm12, %v4636_v57  ;;  %v4635_v44 = vmax.f32 %v4603_v62, 0.0 }
 0x5cb   : > { %4722 = vst.msk [vmem:[#allocation6 + $0xd9] sm:$0xff] %vm2480_vm12, %v4635_v44 }
 0x5d0   : > { %v4776_v20 = vld [vmem:[#allocation6 + $0xe8] sm:$0x3] }
 0x5d1   : > { %v4800_v15 = vmax.f32 %v4752_v47, %v4776_v20 }
 0x5d2   : > { %v4774_v54 = vld [vmem:[#allocation6 + $0xd8] sm:$0xff]  ;;  %v4775_v63 = vld [vmem:[#allocation6 + $0xe0] sm:$0xff] }
 0x5d3   : > { %v4798_v59 = vmax.f32 %v4750_v16, %v4774_v54  ;;  %v4799_v19 = vmax.f32 %v4751_v33, %v4775_v63 }
 0x5da   : > { %v5439_v36 = vpop.f32.mrf.mxu1 }
 0x5db   : > { %v4567_v24 = vmul.f32 %v5439_v36, %v7974_v45 }
 0x5dc   : > { %v4472_v46 = vpop.f32.mrf.mxu1 }
 0x5dd   : > { %v4606_v43 = vadd.f32 %v7981_v42, %v4567_v24  ;;  %v4566_v23 = vmul.f32 %v7974_v45, %v4472_v46 }
 0x5df   : > { %v4638_v27 = vmax.f32 %v4606_v43, 0.0  ;;  %v4605_v17 = vadd.f32 %v7981_v42, %v4566_v23 }
 0x5e1   : > { %4725 = vst.msk [vmem:[#allocation6 + $0xf9] sm:$0xff] %vm2480_vm12, %v4638_v27  ;;  %v4637_v10 = vmax.f32 %v4605_v17, 0.0 }
 0x5e3   : > { %4724 = vst.msk [vmem:[#allocation6 + $0xf1] sm:$0xff] %vm2480_vm12, %v4637_v10 }
 0x5e8   : > { %v4825_v35 = vld [vmem:[#allocation6 + $0x100] sm:$0x3] }
 0x5e9   : > { %v4849_v7 = vmax.f32 %v4800_v15, %v4825_v35  ;;  %v4755_v50 = vld [vmem:[#allocation6 + $0x100] sm:$0x3] }
 0x5ea   : > { %v4753_v32 = vld [vmem:[#allocation6 + $0xf0] sm:$0xff]  ;;  %v4754_v18 = vld [vmem:[#allocation6 + $0xf8] sm:$0xff] }
 0x5eb   : > { %v4847_v21 = vmax.f32 %v4798_v59, %v4753_v32  ;;  %v4848_v11 = vmax.f32 %v4799_v19, %v4754_v18  ;;  %v4907_v0 = vrot.slane %v4849_v7, 1  ;;  %v4980_v55 = vrot.slane %v4849_v7, 2 }
 0x5ed   : > { %v4904_v56 = vrot.slane %v4847_v21, 1  ;;  %v4905_v1 = vrot.slane %v4848_v11, 1  ;;  %v4977_v52 = vrot.slane %v4847_v21, 2  ;;  %v4978_v41 = vrot.slane %v4848_v11, 2 }
 0x5ef   : > { %v4906_v51 = vsel %vm4883_vm7, %v4904_v56, %v4905_v1  ;;  %v4908_v61 = vsel %vm4883_vm7, %v4905_v1, %v4907_v0  ;;  %v4979_v31 = vsel %vm4956_vm8, %v4977_v52, %v4978_v41  ;;  %v4981_v38 = vsel %vm4956_vm8, %v4978_v41, %v4980_v55 }
 0x5f0   : > { %v4948_v12 = vmax.f32 %v4847_v21, %v4906_v51  ;;  %v4949_v40 = vmax.f32 %v4848_v11, %v4908_v61 }
 0x5f2   : > { %v5021_v6 = vmax.f32 %v4948_v12, %v4979_v31  ;;  %v5022_v16 = vmax.f32 %v4949_v40, %v4981_v38  ;;  %v5442_v33 = vpop.f32.mrf.mxu1 }
 0x5f3   : > { %v4569_v5 = vmul.f32 %v5442_v33, %v7974_v45 }
 0x5f4   : > { %5034 = vst.msk [vmem:[%s8066_s20 + $0x20] sm:$0x1] %vm5029_vm9, %v5021_v6  ;;  %5069 = vst.msk [vmem:[%s8066_s20 + $0x24] sm:$0x1] %vm5029_vm9, %v5022_v16  ;;  %v4482_v58 = vpop.f32.mrf.mxu1 }
 0x5f5   : > { %5043 = vst.msk [vmem:[%s8066_s20 + $0x1f] sm:$0x4] %vm5038_vm10, %v5021_v6  ;;  %5077 = vst.msk [vmem:[%s8066_s20 + $0x23] sm:$0x4] %vm5038_vm10, %v5022_v16  ;;  %v4608_v39 = vadd.f32 %v7981_v42, %v4569_v5  ;;  %v4568_v22 = vmul.f32 %v7974_v45, %v4482_v58 }
 0x5f6   : > { %5052 = vst.msk [vmem:[%s8066_s20 + $0x1e] sm:$0x10] %vm5047_vm11, %v5021_v6  ;;  %5085 = vst.msk [vmem:[%s8066_s20 + $0x22] sm:$0x10] %vm5047_vm11, %v5022_v16 }
 0x5f7   : > { %5061 = vst.msk [vmem:[%s8066_s20 + $0x1d] sm:$0x40] %vm5056_vm13, %v5021_v6  ;;  %5093 = vst.msk [vmem:[%s8066_s20 + $0x21] sm:$0x40] %vm5056_vm13, %v5022_v16  ;;  %v4640_v8 = vmax.f32 %v4608_v39, 0.0  ;;  %v4607_v37 = vadd.f32 %v7981_v42, %v4568_v22 }
 0x5f9   : > { %4727 = vst.msk [vmem:[#allocation6 + $0x111] sm:$0xff] %vm2480_vm12, %v4640_v8  ;;  %v4639_v34 = vmax.f32 %v4607_v37, 0.0 }
 0x5fb   : > { %4726 = vst.msk [vmem:[#allocation6 + $0x109] sm:$0xff] %vm2480_vm12, %v4639_v34 }
 0x600   : > { %v4779_v2 = vld [vmem:[#allocation6 + $0x118] sm:$0x3] }
 0x601   : > { %v4803_v3 = vmax.f32 %v4755_v50, %v4779_v2 }
 0x602   : > { %v4777_v9 = vld [vmem:[#allocation6 + $0x108] sm:$0xff]  ;;  %v4778_v30 = vld [vmem:[#allocation6 + $0x110] sm:$0xff] }
 0x603   : > { %v4801_v57 = vmax.f32 %v4753_v32, %v4777_v9  ;;  %v4802_v62 = vmax.f32 %v4754_v18, %v4778_v30 }
 0x60a   : > { %v5445_v14 = vpop.f32.mrf.mxu1 }
 0x60b   : > { %v4571_v28 = vmul.f32 %v5445_v14, %v7974_v45 }
 0x60c   : > { %v4492_v48 = vpop.f32.mrf.mxu1 }
 0x60d   : > { %v4610_v25 = vadd.f32 %v7981_v42, %v4571_v28  ;;  %v4570_v4 = vmul.f32 %v7974_v45, %v4492_v48 }
 0x60f   : > { %v4642_v49 = vmax.f32 %v4610_v25, 0.0  ;;  %v4609_v29 = vadd.f32 %v7981_v42, %v4570_v4 }
 0x611   : > { %4729 = vst.msk [vmem:[#allocation6 + $0x129] sm:$0xff] %vm2480_vm12, %v4642_v49  ;;  %v4641_v13 = vmax.f32 %v4609_v29, 0.0 }
 0x613   : > { %4728 = vst.msk [vmem:[#allocation6 + $0x121] sm:$0xff] %vm2480_vm12, %v4641_v13 }
 0x618   : > { %v4828_v60 = vld [vmem:[#allocation6 + $0x130] sm:$0x3] }
 0x619   : > { %v4852_v44 = vmax.f32 %v4803_v3, %v4828_v60  ;;  %v4758_v33 = vld [vmem:[#allocation6 + $0x130] sm:$0x3] }
 0x61a   : > { %v4756_v36 = vld [vmem:[#allocation6 + $0x120] sm:$0xff]  ;;  %v4757_v24 = vld [vmem:[#allocation6 + $0x128] sm:$0xff] }
 0x61b   : > { %v4850_v46 = vmax.f32 %v4801_v57, %v4756_v36  ;;  %v4851_v43 = vmax.f32 %v4802_v62, %v4757_v24  ;;  %v4912_v23 = vrot.slane %v4852_v44, 1  ;;  %v4985_v47 = vrot.slane %v4852_v44, 2 }
 0x61d   : > { %v4909_v27 = vrot.slane %v4850_v46, 1  ;;  %v4910_v17 = vrot.slane %v4851_v43, 1  ;;  %v4982_v10 = vrot.slane %v4850_v46, 2  ;;  %v4983_v20 = vrot.slane %v4851_v43, 2 }
 0x61f   : > { %v4911_v54 = vsel %vm4883_vm7, %v4909_v27, %v4910_v17  ;;  %v4913_v63 = vsel %vm4883_vm7, %v4910_v17, %v4912_v23  ;;  %v4984_v59 = vsel %vm4956_vm8, %v4982_v10, %v4983_v20  ;;  %v4986_v19 = vsel %vm4956_vm8, %v4983_v20, %v4985_v47  ;;  %v5530_v10 = vld [vmem:[%s8407_s6] ss:$0 sm:$0xff] }
 0x620   : > { %v4950_v15 = vmax.f32 %v4850_v46, %v4911_v54  ;;  %v4951_v35 = vmax.f32 %v4851_v43, %v4913_v63 }
 0x622   : > { %v5023_v7 = vmax.f32 %v4950_v15, %v4984_v59  ;;  %v5024_v32 = vmax.f32 %v4951_v35, %v4986_v19  ;;  %v5448_v18 = vpop.f32.mrf.mxu1 }
 0x623   : > { %v4573_v21 = vmul.f32 %v5448_v18, %v7974_v45 }
 0x624   : > { %5035 = vst.msk [vmem:[%s8066_s20 + $0x28] sm:$0x1] %vm5029_vm9, %v5023_v7  ;;  %5070 = vst.msk [vmem:[%s8066_s20 + $0x2c] sm:$0x1] %vm5029_vm9, %v5024_v32  ;;  %v4502_v11 = vpop.f32.mrf.mxu1 }
 0x625   : > { %5044 = vst.msk [vmem:[%s8066_s20 + $0x27] sm:$0x4] %vm5038_vm10, %v5023_v7  ;;  %5078 = vst.msk [vmem:[%s8066_s20 + $0x2b] sm:$0x4] %vm5038_vm10, %v5024_v32  ;;  %v4612_v0 = vadd.f32 %v7981_v42, %v4573_v21  ;;  %v4572_v56 = vmul.f32 %v7974_v45, %v4502_v11 }
 0x626   : > { %5053 = vst.msk [vmem:[%s8066_s20 + $0x26] sm:$0x10] %vm5047_vm11, %v5023_v7  ;;  %5086 = vst.msk [vmem:[%s8066_s20 + $0x2a] sm:$0x10] %vm5047_vm11, %v5024_v32 }
 0x627   : > { %5062 = vst.msk [vmem:[%s8066_s20 + $0x25] sm:$0x40] %vm5056_vm13, %v5023_v7  ;;  %5094 = vst.msk [vmem:[%s8066_s20 + $0x29] sm:$0x40] %vm5056_vm13, %v5024_v32  ;;  %v4644_v1 = vmax.f32 %v4612_v0, 0.0  ;;  %v4611_v52 = vadd.f32 %v7981_v42, %v4572_v56 }
 0x629   : > { %4731 = vst.msk [vmem:[#allocation6 + $0x141] sm:$0xff] %vm2480_vm12, %v4644_v1  ;;  %v4643_v41 = vmax.f32 %v4611_v52, 0.0  ;;  %v4740_v52 = vld [vmem:[#allocation6 + $0x10] sm:$0x3] }
 0x62b   : > { %4730 = vst.msk [vmem:[#allocation6 + $0x139] sm:$0xff] %vm2480_vm12, %v4643_v41 }
 0x630   : > { %v4782_v16 = vld [vmem:[#allocation6 + $0x148] sm:$0x3] }
 0x631   : > { %v4806_v39 = vmax.f32 %v4758_v33, %v4782_v16 }
 0x632   : > { %v4780_v5 = vld [vmem:[#allocation6 + $0x138] sm:$0xff]  ;;  %v4781_v58 = vld [vmem:[#allocation6 + $0x140] sm:$0xff] }
 0x633   : > { %v4804_v8 = vmax.f32 %v4756_v36, %v4780_v5  ;;  %v4805_v37 = vmax.f32 %v4757_v24, %v4781_v58  ;;  %v5529_v24 = vld [vmem:[%s8406_s5] ss:$0 sm:$0xff] }
 0x63e   : > { %v5451_v55 = vpop.f32.mrf.mxu1 }
 0x63f   : > { %v4575_v51 = vmul.f32 %v5451_v55, %v7974_v45 }
 0x640   : > { %v4512_v61 = vpop.f32.mrf.mxu1 }
 0x641   : > { %v4614_v12 = vadd.f32 %v7981_v42, %v4575_v51  ;;  %v4574_v40 = vmul.f32 %v7974_v45, %v4512_v61  ;;  %v4738_v51 = vld [vmem:[#allocation6] sm:$0xff]  ;;  %v4739_v61 = vld [vmem:[#allocation6 + $0x8] sm:$0xff] }
 0x643   : > { %v4646_v31 = vmax.f32 %v4614_v12, 0.0  ;;  %v4613_v38 = vadd.f32 %v7981_v42, %v4574_v40 }
 0x645   : > { %4733 = vst.msk [vmem:[#allocation6 + $0x159] sm:$0xff] %vm2480_vm12, %v4646_v31  ;;  %v4645_v6 = vmax.f32 %v4613_v38, 0.0  ;;  %v4813_v31 = vld [vmem:[#allocation6 + $0x40] sm:$0x3] }
 0x647   : > { %4732 = vst.msk [vmem:[#allocation6 + $0x151] sm:$0xff] %vm2480_vm12, %v4645_v6 }
 0x64c   : > { %v4831_v22 = vld [vmem:[#allocation6 + $0x160] sm:$0x3] }
 0x64d   : > { %v4855_v34 = vmax.f32 %v4806_v39, %v4831_v22  ;;  %v4761_v16 = vld [vmem:[#allocation6 + $0x160] sm:$0x3] }
 0x64e   : > { %v8266_v14 = vld [vmem:[#allocation6 + $0x150] sm:$0xff]  ;;  %v8268_v45 = vld [vmem:[#allocation6 + $0x158] sm:$0xff] }
 0x64f   : > { %v4853_v28 = vmax.f32 %v4804_v8, %v8266_v14  ;;  %v4854_v48 = vmax.f32 %v4805_v37, %v8268_v45  ;;  %v4917_v25 = vrot.slane %v4855_v34, 1  ;;  %v4990_v2 = vrot.slane %v4855_v34, 2 }
 0x651   : > { %v4914_v4 = vrot.slane %v4853_v28, 1  ;;  %v4915_v49 = vrot.slane %v4854_v48, 1  ;;  %v4987_v29 = vrot.slane %v4853_v28, 2  ;;  %v4988_v13 = vrot.slane %v4854_v48, 2 }
 0x653   : > { %v4916_v50 = vsel %vm4883_vm7, %v4914_v4, %v4915_v49  ;;  %v4918_v9 = vsel %vm4883_vm7, %v4915_v49, %v4917_v25  ;;  %v4989_v60 = vsel %vm4956_vm8, %v4987_v29, %v4988_v13  ;;  %v4991_v57 = vsel %vm4956_vm8, %v4988_v13, %v4990_v2 }
 0x654   : > { %v4952_v30 = vmax.f32 %v4853_v28, %v4916_v50  ;;  %v4953_v3 = vmax.f32 %v4854_v48, %v4918_v9 }
 0x656   : > { %v5025_v62 = vmax.f32 %v4952_v30, %v4989_v60  ;;  %v5026_v44 = vmax.f32 %v4953_v3, %v4991_v57 }
 0x658   : > { %5036 = vst.msk [vmem:[%s8066_s20 + $0x30] sm:$0x1] %vm5029_vm9, %v5025_v62  ;;  %5071 = vst.msk [vmem:[%s8066_s20 + $0x34] sm:$0x1] %vm5029_vm9, %v5026_v44 }
 0x659   : > { %5045 = vst.msk [vmem:[%s8066_s20 + $0x2f] sm:$0x4] %vm5038_vm10, %v5025_v62  ;;  %5079 = vst.msk [vmem:[%s8066_s20 + $0x33] sm:$0x4] %vm5038_vm10, %v5026_v44 }
 0x65a   : > { %5054 = vst.msk [vmem:[%s8066_s20 + $0x2e] sm:$0x10] %vm5047_vm11, %v5025_v62  ;;  %5087 = vst.msk [vmem:[%s8066_s20 + $0x32] sm:$0x10] %vm5047_vm11, %v5026_v44 }
 0x65b   : > { %5063 = vst.msk [vmem:[%s8066_s20 + $0x2d] sm:$0x40] %vm5056_vm13, %v5025_v62  ;;  %5095 = vst.msk [vmem:[%s8066_s20 + $0x31] sm:$0x40] %vm5056_vm13, %v5026_v44 }
 0x65c   : > { %v5454_v36 = vpop.f32.mrf.mxu1 }
 0x65d   : > { %v4577_v46 = vmul.f32 %v5529_v24, %v5454_v36 }
 0x65e   : > { %v4522_v43 = vpop.f32.mrf.mxu1 }
 0x65f   : > { %v4616_v23 = vadd.f32 %v7981_v42, %v4577_v46  ;;  %v4576_v27 = vmul.f32 %v5529_v24, %v4522_v43 }
 0x661   : > { %v4648_v17 = vmax.f32 %v4616_v23, 0.0  ;;  %v4615_v20 = vadd.f32 %v5530_v10, %v4576_v27 }
 0x663   : > { %4735 = vst.msk [vmem:[#allocation6 + $0x171] sm:$0xff] %vm2480_vm12, %v4648_v17  ;;  %v4647_v47 = vmax.f32 %v4615_v20, 0.0 }
 0x665   : > { %4734 = vst.msk [vmem:[#allocation6 + $0x169] sm:$0xff] %vm2480_vm12, %v4647_v47 }
 0x66a   : > { %v4785_v12 = vld [vmem:[#allocation6 + $0x178] sm:$0x3] }
 0x66b   : > { %v4809_v8 = vmax.f32 %v4761_v16, %v4785_v12 }
 0x66c   : > { %v4783_v33 = vld [vmem:[#allocation6 + $0x168] sm:$0xff]  ;;  %v4784_v5 = vld [vmem:[#allocation6 + $0x170] sm:$0xff] }
 0x66d   : > { %v4807_v48 = vmax.f32 %v8266_v14, %v4783_v33  ;;  %v4808_v25 = vmax.f32 %v8268_v45, %v4784_v5 }
 0x66e   : > { %v5412_v54 = vpop.f32.mrf.mxu0 }
 0x66f   : > { %v4549_v63 = vmul.f32 %v5529_v24, %v5412_v54 }
 0x670   : > { %v4382_v15 = vpop.f32.mrf.mxu0 }
 0x671   : > { %v4588_v35 = vadd.f32 %v5530_v10, %v4549_v63  ;;  %v4548_v59 = vmul.f32 %v5529_v24, %v4382_v15 }
 0x673   : > { %v4620_v19 = vmax.f32 %v4588_v35, 0.0  ;;  %v4587_v7 = vadd.f32 %v5530_v10, %v4548_v59  ;;  %v5457_v42 = vpop.f32.mrf.mxu1 }
 0x674   : > { %v4579_v32 = vmul.f32 %v5529_v24, %v5457_v42 }
 0x675   : > { %4707 = vst.msk [vmem:[#allocation6 + $0x21] sm:$0xff] %vm2480_vm12, %v4620_v19  ;;  %v4619_v18 = vmax.f32 %v4587_v7, 0.0  ;;  %v4532_v21 = vpop.f32.mrf.mxu1 }
 0x676   : > { %v4618_v11 = vadd.f32 %v5530_v10, %v4579_v32  ;;  %v4578_v0 = vmul.f32 %v5529_v24, %v4532_v21 }
 0x677   : > { %4706 = vst.msk [vmem:[#allocation6 + $0x19] sm:$0xff] %vm2480_vm12, %v4619_v18 }
 0x678   : > { %v4650_v56 = vmax.f32 %v4618_v11, 0.0  ;;  %v4617_v1 = vadd.f32 %v5530_v10, %v4578_v0 }
 0x67a   : > { %4737 = vst.msk [vmem:[#allocation6 + $0x189] sm:$0xff] %vm2480_vm12, %v4650_v56  ;;  %v4649_v41 = vmax.f32 %v4617_v1, 0.0 }
 0x67c   : > { %v4764_v55 = vld [vmem:[#allocation6 + $0x28] sm:$0x3]  ;;  %4736 = vst.msk [vmem:[#allocation6 + $0x181] sm:$0xff] %vm2480_vm12, %v4649_v41 }
 0x67d   : > { %v4788_v40 = vmax.f32 %v4740_v52, %v4764_v55 }
 0x67e   : > { %v4762_v38 = vld [vmem:[#allocation6 + $0x18] sm:$0xff]  ;;  %v4763_v6 = vld [vmem:[#allocation6 + $0x20] sm:$0xff] }
 0x67f   : > { %v4837_v58 = vmax.f32 %v4788_v40, %v4813_v31  ;;  %v4786_v39 = vmax.f32 %v4738_v51, %v4762_v38  ;;  %v4787_v22 = vmax.f32 %v4739_v61, %v4763_v6 }
 0x681   : > { %v4835_v37 = vmax.f32 %v4786_v39, %v8036_v26  ;;  %v4836_v34 = vmax.f32 %v4787_v22, %v8038_v53  ;;  %v4834_v28 = vld [vmem:[#allocation6 + $0x190] sm:$0x3]  ;;  %v4887_v4 = vrot.slane %v4837_v58, 1  ;;  %v4960_v3 = vrot.slane %v4837_v58, 2 }
 0x682   : > { %v4858_v49 = vmax.f32 %v4809_v8, %v4834_v28 }
 0x683   : > { %v4884_v29 = vrot.slane %v4835_v37, 1  ;;  %v4885_v13 = vrot.slane %v4836_v34, 1  ;;  %v4957_v2 = vrot.slane %v4835_v37, 2  ;;  %v4958_v50 = vrot.slane %v4836_v34, 2  ;;  %v4832_v9 = vld [vmem:[#allocation6 + $0x180] sm:$0xff]  ;;  %v4833_v30 = vld [vmem:[#allocation6 + $0x188] sm:$0xff] }
 0x684   : > { %v4856_v60 = vmax.f32 %v4807_v48, %v4832_v9  ;;  %v4857_v57 = vmax.f32 %v4808_v25, %v4833_v30  ;;  %v4922_v14 = vrot.slane %v4858_v49, 1  ;;  %v4995_v62 = vrot.slane %v4858_v49, 2 }
 0x685   : > { %v4886_v26 = vsel %vm4883_vm7, %v4884_v29, %v4885_v13  ;;  %v4888_v53 = vsel %vm4883_vm7, %v4885_v13, %v4887_v4  ;;  %v4959_v46 = vsel %vm4956_vm8, %v4957_v2, %v4958_v50  ;;  %v4961_v43 = vsel %vm4956_vm8, %v4958_v50, %v4960_v3 }
 0x686   : > { %v4940_v45 = vmax.f32 %v4835_v37, %v4886_v26  ;;  %v4941_v44 = vmax.f32 %v4836_v34, %v4888_v53  ;;  %v4919_v36 = vrot.slane %v4856_v60, 1  ;;  %v4920_v24 = vrot.slane %v4857_v57, 1 }
 0x687   : > { %v4992_v23 = vrot.slane %v4856_v60, 2  ;;  %v4993_v27 = vrot.slane %v4857_v57, 2 }
 0x688   : > { %v5013_v17 = vmax.f32 %v4940_v45, %v4959_v46  ;;  %v5014_v10 = vmax.f32 %v4941_v44, %v4961_v43  ;;  %v4921_v20 = vsel %vm4883_vm7, %v4919_v36, %v4920_v24  ;;  %v4923_v47 = vsel %vm4883_vm7, %v4920_v24, %v4922_v14 }
 0x689   : > { %v4954_v54 = vmax.f32 %v4856_v60, %v4921_v20  ;;  %v4955_v63 = vmax.f32 %v4857_v57, %v4923_v47  ;;  %v4994_v15 = vsel %vm4956_vm8, %v4992_v23, %v4993_v27  ;;  %v4996_v35 = vsel %vm4956_vm8, %v4993_v27, %v4995_v62 }
 0x68a   : > { %5030 = vst.msk [vmem:[%s8066_s20] sm:$0x1] %vm5029_vm9, %v5013_v17  ;;  %5065 = vst.msk [vmem:[%s8066_s20 + $0x4] sm:$0x1] %vm5029_vm9, %v5014_v10 }
 0x68b   : > { %5039 = vst.msk [vmem:[%s8066_s20 - $0x1] sm:$0x4] %vm5038_vm10, %v5013_v17  ;;  %5073 = vst.msk [vmem:[%s8066_s20 + $0x3] sm:$0x4] %vm5038_vm10, %v5014_v10  ;;  %v5027_v59 = vmax.f32 %v4954_v54, %v4994_v15  ;;  %v5028_v19 = vmax.f32 %v4955_v63, %v4996_v35 }
 0x68c   : > { %5048 = vst.msk [vmem:[%s8066_s20 - $0x2] sm:$0x10] %vm5047_vm11, %v5013_v17  ;;  %5081 = vst.msk [vmem:[%s8066_s20 + $0x2] sm:$0x10] %vm5047_vm11, %v5014_v10 }
 0x68d   : > { %5057 = vst.msk [vmem:[%s8066_s20 - $0x3] sm:$0x40] %vm5056_vm13, %v5013_v17  ;;  %5089 = vst.msk [vmem:[%s8066_s20 + $0x1] sm:$0x40] %vm5056_vm13, %v5014_v10 }
 0x68e   : > { %5037 = vst.msk [vmem:[%s8066_s20 + $0x38] sm:$0x1] %vm5029_vm9, %v5027_v59  ;;  %5072 = vst.msk [vmem:[%s8066_s20 + $0x3c] sm:$0x1] %vm5029_vm9, %v5028_v19 }
 0x68f   : > { %5046 = vst.msk [vmem:[%s8066_s20 + $0x37] sm:$0x4] %vm5038_vm10, %v5027_v59  ;;  %5080 = vst.msk [vmem:[%s8066_s20 + $0x3b] sm:$0x4] %vm5038_vm10, %v5028_v19 }
 0x690   : > { %5055 = vst.msk [vmem:[%s8066_s20 + $0x36] sm:$0x10] %vm5047_vm11, %v5027_v59  ;;  %5088 = vst.msk [vmem:[%s8066_s20 + $0x3a] sm:$0x10] %vm5047_vm11, %v5028_v19 }
 0x691   : > { %5064 = vst.msk [vmem:[%s8066_s20 + $0x35] sm:$0x40] %vm5056_vm13, %v5027_v59  ;;  %5096 = vst.msk [vmem:[%s8066_s20 + $0x39] sm:$0x40] %vm5056_vm13, %v5028_v19 }
 0x692   : > { %5544 = shalt.err (!%p5541_p3)
}
 0x693   : > { %s5545_s13 = scalar_lea.hbm %s8338_s8, 1024  ;;  %s5549_s14 = scalar_lea.hbm %s8408_s7, 2048 }
 0x694   : > { %p5546_p4 = scmp.ne.s32.totalorder %s8338_s8, %s5545_s13  ;;  %p5550_p9 = scmp.lt.s32.totalorder %s8338_s8, %s8408_s7 }
 0x695   : > { %p5551_p10 = scmp.lt.s32.totalorder %s5549_s14, %s5545_s13 }
 0x696   : > { %p5547_p7 = pnand %p5546_p4, %p5686_p5 }
 0x697   : > { %p5552_p11 = por %p5551_p10, %p5550_p9 }
 0x698   : > { %p5548_p8 = pneg %p5547_p7 }
 0x69a   : > { %p5553_p12 = pnand %p5552_p11, %p5548_p8 }
 0x69c   : > { %5556 = shalt.err (!%p5553_p12)
}
 0x69d   : > { %s5607_s23 = smov 128  }
 0x69e   : > { %5476 = dma.vmem_to_hbm [thread:$0]  (%p5686_p5), %s8340_s15, 1024, %s8338_s8, %s8360_s18, %s5607_s23, %s5607_s23, %s5595_s19  }
 0x69f PF: > { %p5482_p13 = scmp.ge.s32.totalorder %s5591_s27, 2  ;;  %s5126_s16 = sand.u32 1, %s5579_s24  }
 0x6a0   : > { %s5127_s17 = scalar_lea.sflag [#allocation8], %s5126_s16 }
 0x6a1   : > { %p5479_p0 = pnand %p5482_p13, %p5690_p6 }
 0x6a3   : > { %p5480_p1 = pneg %p5479_p0 }
 0x6a5   : > { %5574 = dma.done.wait (%p5480_p1), %s5127_s17, 1024  }
 0x6a6   : > { %5576 = vsyncadd (%p5480_p1), %s5127_s17, 4294966272  ;;  %p17_p2 = scmp.ge.s32.totalorder %s5673_s30, 4   ;;  %s8504_s24 = smov %s5583_s25 }
 0x6a7   : > { %s8505_s25 = smov %s5587_s26  ;;  %s8506_s26 = smov %s5684_s10 }
 0x6a8   : > { %s8507_s27 = smov %s5673_s30  ;;  %19 = sbr.rel (!%p17_p2) target bundleno = 3 (0x3), region = 89 }
 0x6ad   :  { %5132 = vsyncpa [#allocation8], 1 }
 0x6ae   :  { %5134 = vsyncpa [#allocation8 + $0x1], 1 }

</bundles_post_ra>
